<compile_context>
chip_gen: v7x
topology: tpu7x:2x2x1
jax: 0.10.0
libtpu: 0.0.40
codegen_flags: <defaults>
</compile_context>

<pallas_src>
import jax
import jax.numpy as jnp
from jax.experimental import pallas as pl
from jax.experimental.pallas import tpu as pltpu


def _round_up(n, m):
    return -(-n // m) * m


_TAPS = tuple((dy, dx) for dy in range(3) for dx in range(3))


def _conv_gru_kernel(xh_ref, h_ref, wg_ref, wo_ref, b_ref, out_ref, rh_ref):
    # xh_ref : (1, H+2, W+2, Cxh)  f32  zero-padded cat([x, h]) for one batch
    # h_ref  : (H*W, Chp)          f32  previous state, lane-dense (Ch -> Chp pad)
    # wg_ref : (9, Cxh, 3*Chp)     bf16 per-tap [read | update | output-x] weights,
    #                                   each gate on its own 128-lane tile
    # wo_ref : (9, Chp, Chp)       bf16 per-tap output-conv weights (r*h half)
    # b_ref  : (1, 3*Chp)          f32  packed [b_r | b_u | b_o], lane-tile aligned
    # out_ref: (H*W, Chp)          f32  lane-dense output
    # rh_ref : (1, H+2, W+2, Chp)  f32  scratch: zero-haloed read_gate * h
    Bb, Hp, Wp, Cxh = xh_ref.shape
    H, W = Hp - 2, Wp - 2
    M = Bb * H * W
    Chp = h_ref.shape[-1]

    # ---- conv #1 (read gate | update gate | x-part of output conv):
    #      nine shifted-view MXU matmuls accumulated in f32 (no im2col buffer).
    acc = jnp.zeros((M, 3 * Chp), jnp.float32)
    for t, (dy, dx) in enumerate(_TAPS):
        tap = xh_ref[:, pl.ds(dy, H), pl.ds(dx, W), :].reshape(M, Cxh)
        acc += jnp.dot(tap.astype(jnp.bfloat16), wg_ref[t],
                       preferred_element_type=jnp.float32)
    pre = acc + b_ref[...]

    h = h_ref[...]                                   # (M, Chp) f32
    gates = jax.nn.sigmoid(pre[:, :2 * Chp])         # one EUP pass, whole lane tiles
    read_gate = gates[:, :Chp]
    update_gate = gates[:, Chp:]

    # ---- zero ONLY the 1-pixel halo of the scratch; interior is overwritten.
    #      (Scratch persists across grid steps, so do this every step.)
    zrow = jnp.zeros((Bb, 1, Wp, Chp), rh_ref.dtype)
    rh_ref[:, pl.ds(0, 1), :, :] = zrow
    rh_ref[:, pl.ds(Hp - 1, 1), :, :] = zrow
    zcol = jnp.zeros((Bb, Hp, 1, Chp), rh_ref.dtype)
    rh_ref[:, :, pl.ds(0, 1), :] = zcol
    rh_ref[:, :, pl.ds(Wp - 1, 1), :] = zcol

    rh_ref[:, pl.ds(1, H), pl.ds(1, W), :] = (
        (read_gate * h).reshape(Bb, H, W, Chp))

    # ---- conv #2: output conv over read_gate*h, nine shifted matmuls added
    #      on top of the x-contribution (+ bias) already sitting in `pre`.
    acc2 = pre[:, 2 * Chp:]
    for t, (dy, dx) in enumerate(_TAPS):
        tap = rh_ref[:, pl.ds(dy, H), pl.ds(dx, W), :].reshape(M, Chp)
        acc2 += jnp.dot(tap.astype(jnp.bfloat16), wo_ref[t],
                        preferred_element_type=jnp.float32)
    c = jax.nn.relu(acc2)

    out_ref[...] = update_gate * h + (1.0 - update_gate) * c


def pack_params(params):
    """Pack the three convs into per-tap MXU matrices (do this ONCE per weight set)."""
    (wrx, wrh, br), (wux, wuh, bu), (wox, woh, bo) = params
    Ch = br.shape[0]
    Chp = _round_up(Ch, 128)
    Cxh = wrx.shape[2] + wrh.shape[2]

    def pad_out(w):  # (3,3,Cin,Ch) -> (3,3,Cin,Chp): each gate on its own lane tile
        return jnp.pad(w, ((0, 0), (0, 0), (0, 0), (0, Chp - Ch)))

    w_read = pad_out(jnp.concatenate([wrx, wrh], axis=2))             # (3,3,Cxh,Chp)
    w_updt = pad_out(jnp.concatenate([wux, wuh], axis=2))
    w_outx = pad_out(jnp.concatenate([wox, jnp.zeros_like(woh)], axis=2))
    wg = jnp.concatenate([w_read, w_updt, w_outx], axis=3)            # (3,3,Cxh,3*Chp)
    wg = wg.reshape(9, Cxh, 3 * Chp).astype(jnp.bfloat16)

    wo = pad_out(woh)                                                 # (3,3,Ch,Chp)
    wo = jnp.pad(wo, ((0, 0), (0, 0), (0, Chp - Ch), (0, 0)))         # Cin -> Chp
    wo = wo.reshape(9, Chp, Chp).astype(jnp.bfloat16)

    def pad_b(v):
        return jnp.pad(v, (0, Chp - Ch))

    b = jnp.concatenate([pad_b(br), pad_b(bu), pad_b(bo)])
    b = b.reshape(1, 3 * Chp).astype(jnp.float32)
    return wg, wo, b


def _cell_step(x_nhwc, h_nhwc, wg, wo, b):
    """One ConvGRU step in NHWC with lane-dense internals."""
    B, H, W, Cx = x_nhwc.shape
    Ch = h_nhwc.shape[-1]
    Chp = _round_up(Ch, 128)
    Cxh = Cx + Ch
    M, Mb = B * H * W, H * W

    xh = jnp.concatenate([x_nhwc, h_nhwc], axis=-1)                     # (B,H,W,Cxh)
    xh_pad = jnp.pad(xh, ((0, 0), (1, 1), (1, 1), (0, 0)))              # zero halo
    h_flat = jnp.pad(h_nhwc.reshape(M, Ch), ((0, 0), (0, Chp - Ch)))    # lane-dense

    flops = 2 * M * 9 * (Cxh * 3 * Chp + Chp * Chp)
    bytes_accessed = (xh_pad.size * 4 + h_flat.size * 4 + wg.size * 2
                      + wo.size * 2 + b.size * 4 + M * Chp * 4)
    cost = pl.CostEstimate(flops=flops, transcendentals=2 * M * Chp,
                           bytes_accessed=bytes_accessed)

    out_flat = pl.pallas_call(
        _conv_gru_kernel,
        out_shape=jax.ShapeDtypeStruct((M, Chp), jnp.float32),
        grid=(B,),
        in_specs=[
            pl.BlockSpec((1, H + 2, W + 2, Cxh), lambda i: (i, 0, 0, 0)),
            pl.BlockSpec((Mb, Chp), lambda i: (i, 0)),
            pl.BlockSpec((9, Cxh, 3 * Chp), lambda i: (0, 0, 0)),   # resident weights
            pl.BlockSpec((9, Chp, Chp), lambda i: (0, 0, 0)),       # resident weights
            pl.BlockSpec((1, 3 * Chp), lambda i: (0, 0)),           # resident bias
        ],
        out_specs=pl.BlockSpec((Mb, Chp), lambda i: (i, 0)),
        scratch_shapes=[pltpu.VMEM((1, H + 2, W + 2, Chp), jnp.float32)],
        compiler_params=pltpu.CompilerParams(
            dimension_semantics=("parallel",),
            vmem_limit_bytes=48 * 1024 * 1024),
        cost_estimate=cost,
    )(xh_pad, h_flat, wg, wo, b)

    return out_flat[:, :Ch].reshape(B, H, W, Ch)


@jax.jit
def conv_gru_cell(x, prev_state, params):
    """ConvGRUCell.forward.  x: (B,Cx,H,W), prev_state: (B,Ch,H,W) (NCHW)."""
    wg, wo, b = pack_params(params)
    x_nhwc = jnp.transpose(x, (0, 2, 3, 1)).astype(jnp.float32)
    h_nhwc = jnp.transpose(prev_state, (0, 2, 3, 1)).astype(jnp.float32)
    out_nhwc = _cell_step(x_nhwc, h_nhwc, wg, wo, b)
    out = jnp.transpose(out_nhwc, (0, 3, 1, 2))
    return out, out


@jax.jit
def conv_gru(xs, hidden_state, params):
    """ConvGRU.forward.  xs: (T,B,Cx,H,W), hidden_state: (B,Ch,H,W) (NCHW)."""
    wg, wo, b = pack_params(params)                 # packed ONCE for all T steps
    h0 = jnp.transpose(hidden_state, (0, 2, 3, 1)).astype(jnp.float32)
    xs_nhwc = jnp.transpose(xs, (0, 1, 3, 4, 2)).astype(jnp.float32)

    def step(h, x):
        out = _cell_step(x, h, wg, wo, b)
        return out, out                              # state stays NHWC between steps

    _, outs = jax.lax.scan(step, h0, xs_nhwc)
    return jnp.transpose(outs, (0, 1, 4, 2, 3))      # (T,B,Ch,H,W)


def init_params(key, input_channels, output_channels, x_channels,
                kernel_size=3, sn_eps=1e-4):
    """Deterministic param init + spectral normalization of conv weights.

    Returns, per conv: (w_x (k,k,Cx,Cout), w_h (k,k,Ch,Cout), bias (Cout,)).
    """
    del sn_eps  # eps only stabilizes PyTorch's power iteration; sigma is exact here.

    def sn_conv(k):
        kw, kb = jax.random.split(k)
        fan_in = input_channels * kernel_size * kernel_size
        bound = 1.0 / jnp.sqrt(jnp.float32(fan_in))
        w = jax.random.uniform(
            kw, (output_channels, input_channels, kernel_size, kernel_size),
            jnp.float32, -bound, bound)
        b = jax.random.uniform(kb, (output_channels,), jnp.float32, -bound, bound)
        # spectral_norm: divide by the largest singular value of the
        # (Cout, Cin*kH*kW) weight matrix (converged power-iteration value).
        sigma = jnp.linalg.svd(w.reshape(output_channels, -1), compute_uv=False)[0]
        w = w / sigma
        w_hwio = jnp.transpose(w, (2, 3, 1, 0))   # (kH, kW, Cin, Cout)
        return w_hwio[:, :, :x_channels, :], w_hwio[:, :, x_channels:, :], b

    k1, k2, k3 = jax.random.split(key, 3)
    return sn_conv(k1), sn_conv(k2), sn_conv(k3)


def reference_conv_gru(x, h, params):
    """Pure-JAX (XLA conv) reference matching the PyTorch forward."""
    (wrx, wrh, br), (wux, wuh, bu), (wox, woh, bo) = params

    def conv(inp, wx, wh, b):
        w = jnp.concatenate([wx, wh], axis=2)  # (kH, kW, Cin, Cout)
        y = jax.lax.conv_general_dilated(
            inp, w, window_strides=(1, 1), padding="SAME",
            dimension_numbers=("NCHW", "HWIO", "NCHW"))
        return y + b[None, :, None, None]

    xh = jnp.concatenate([x, h], axis=1)
    r = jax.nn.sigmoid(conv(xh, wrx, wrh, br))
    u = jax.nn.sigmoid(conv(xh, wux, wuh, bu))
    gated = jnp.concatenate([x, r * h], axis=1)
    c = jax.nn.relu(conv(gated, wox, woh, bo))
    out = u * h + (1.0 - u) * c
    return out, out


if __name__ == "__main__":
    key = jax.random.PRNGKey(0)
    B, Cx, Ch, H, W, T = 2, 4, 32, 16, 16, 4

    kx, kh, kp, ks = jax.random.split(key, 4)
    x = jax.random.normal(kx, (B, Cx, H, W), jnp.float32)
    prev_state = jax.random.normal(kh, (B, Ch, H, W), jnp.float32)
    params = init_params(kp, input_channels=Cx + Ch, output_channels=Ch,
                         x_channels=Cx)

    # --- single cell step (ConvGRUCell.forward) ---
    out, new_state = conv_gru_cell(x, prev_state, params)
    out = jax.block_until_ready(out)
    assert out.shape == (B, Ch, H, W)

    ref_out, _ = reference_conv_gru(x, prev_state, params)
    max_err = float(jnp.max(jnp.abs(out - ref_out)))
    assert jnp.allclose(out, ref_out, atol=2e-2, rtol=2e-2), max_err

    # --- short sequence (ConvGRU.forward): weights packed once, NHWC state ---
    xs = jax.random.normal(ks, (T, B, Cx, H, W), jnp.float32)
    seq = jax.block_until_ready(conv_gru(xs, prev_state, params))
    assert seq.shape == (T, B, Ch, H, W)
    h_ref = prev_state
    for t_idx in range(T):
        step_ref, h_ref = reference_conv_gru(xs[t_idx], h_ref, params)
        err_t = float(jnp.max(jnp.abs(seq[t_idx] - step_ref)))
        assert jnp.allclose(seq[t_idx], step_ref, atol=3e-2, rtol=3e-2), (t_idx, err_t)

    print("KERNEL_OK")
</pallas_src>

<mosaic_0001>
module attributes {stable_mosaic.version = 11 : i64} {
  func.func @_conv_gru_kernel(%arg0: i32, %arg1: memref<1x18x18x36xf32, #tpu.memory_space<vmem>>, %arg2: memref<256x128xf32, #tpu.memory_space<vmem>>, %arg3: memref<9x36x384xbf16, #tpu.memory_space<vmem>>, %arg4: memref<9x128x128xbf16, #tpu.memory_space<vmem>>, %arg5: memref<1x384xf32, #tpu.memory_space<vmem>>, %arg6: memref<256x128xf32, #tpu.memory_space<vmem>>, %arg7: memref<1x18x18x128xf32, #tpu.memory_space<vmem>>) attributes {dimension_semantics = [#tpu.dimension_semantics<parallel>], iteration_bounds = array<i64: 2>, scalar_prefetch = 0 : i64, scratch_operands = 1 : i64, tpu.core_type = #tpu.core_type<tc>, window_params = [{transform_indices = @transform_0, window_bounds = array<i64: 1, 18, 18, 36>}, {transform_indices = @transform_1, window_bounds = array<i64: 256, 128>}, {pipeline_mode = #tpu.pipeline_mode<synchronous>, transform_indices = @transform_2, window_bounds = array<i64: 9, 36, 384>}, {pipeline_mode = #tpu.pipeline_mode<synchronous>, transform_indices = @transform_3, window_bounds = array<i64: 9, 128, 128>}, {pipeline_mode = #tpu.pipeline_mode<synchronous>, transform_indices = @transform_4, window_bounds = array<i64: 1, 384>}, {transform_indices = @transform_5, window_bounds = array<i64: 256, 128>}]} {
    %cst = arith.constant 0.000000e+00 : f32
    %0 = vector.broadcast %cst : f32 to vector<256x384xf32>
    %c0 = arith.constant 0 : index
    %c0_0 = arith.constant 0 : index
    %c0_1 = arith.constant 0 : index
    %c0_2 = arith.constant 0 : index
    %1 = vector.load %arg1[%c0, %c0_0, %c0_1, %c0_2] : memref<1x18x18x36xf32, #tpu.memory_space<vmem>>, vector<1x16x16x36xf32>
    %2 = vector.shape_cast %1 : vector<1x16x16x36xf32> to vector<256x36xf32>
    %3 = arith.truncf %2 : vector<256x36xf32> to vector<256x36xbf16>
    %c0_3 = arith.constant 0 : index
    %c0_4 = arith.constant 0 : index
    %c0_5 = arith.constant 0 : index
    %4 = vector.load %arg3[%c0_3, %c0_4, %c0_5] : memref<9x36x384xbf16, #tpu.memory_space<vmem>>, vector<1x36x384xbf16>
    %5 = vector.shape_cast %4 : vector<1x36x384xbf16> to vector<36x384xbf16>
    %cst_6 = arith.constant dense<0.000000e+00> : vector<256x384xf32>
    %6 = tpu.matmul %3, %5, %cst_6 {dimension_numbers = #tpu.dot_dimension_numbers<[1], [0], [0], [1], [0, 0, 1, 1], [], []>} : vector<256x36xbf16>, vector<36x384xbf16>, vector<256x384xf32> -> vector<256x384xf32>
    %7 = arith.addf %0, %6 : vector<256x384xf32>
    %c0_7 = arith.constant 0 : index
    %c0_8 = arith.constant 0 : index
    %c1 = arith.constant 1 : index
    %c0_9 = arith.constant 0 : index
    %8 = vector.load %arg1[%c0_7, %c0_8, %c1, %c0_9] : memref<1x18x18x36xf32, #tpu.memory_space<vmem>>, vector<1x16x16x36xf32>
    %9 = vector.shape_cast %8 : vector<1x16x16x36xf32> to vector<256x36xf32>
    %10 = arith.truncf %9 : vector<256x36xf32> to vector<256x36xbf16>
    %c1_10 = arith.constant 1 : index
    %c0_11 = arith.constant 0 : index
    %c0_12 = arith.constant 0 : index
    %11 = vector.load %arg3[%c1_10, %c0_11, %c0_12] : memref<9x36x384xbf16, #tpu.memory_space<vmem>>, vector<1x36x384xbf16>
    %12 = vector.shape_cast %11 : vector<1x36x384xbf16> to vector<36x384xbf16>
    %cst_13 = arith.constant dense<0.000000e+00> : vector<256x384xf32>
    %13 = tpu.matmul %10, %12, %cst_13 {dimension_numbers = #tpu.dot_dimension_numbers<[1], [0], [0], [1], [0, 0, 1, 1], [], []>} : vector<256x36xbf16>, vector<36x384xbf16>, vector<256x384xf32> -> vector<256x384xf32>
    %14 = arith.addf %7, %13 : vector<256x384xf32>
    %c0_14 = arith.constant 0 : index
    %c0_15 = arith.constant 0 : index
    %c2 = arith.constant 2 : index
    %c0_16 = arith.constant 0 : index
    %15 = vector.load %arg1[%c0_14, %c0_15, %c2, %c0_16] : memref<1x18x18x36xf32, #tpu.memory_space<vmem>>, vector<1x16x16x36xf32>
    %16 = vector.shape_cast %15 : vector<1x16x16x36xf32> to vector<256x36xf32>
    %17 = arith.truncf %16 : vector<256x36xf32> to vector<256x36xbf16>
    %c2_17 = arith.constant 2 : index
    %c0_18 = arith.constant 0 : index
    %c0_19 = arith.constant 0 : index
    %18 = vector.load %arg3[%c2_17, %c0_18, %c0_19] : memref<9x36x384xbf16, #tpu.memory_space<vmem>>, vector<1x36x384xbf16>
    %19 = vector.shape_cast %18 : vector<1x36x384xbf16> to vector<36x384xbf16>
    %cst_20 = arith.constant dense<0.000000e+00> : vector<256x384xf32>
    %20 = tpu.matmul %17, %19, %cst_20 {dimension_numbers = #tpu.dot_dimension_numbers<[1], [0], [0], [1], [0, 0, 1, 1], [], []>} : vector<256x36xbf16>, vector<36x384xbf16>, vector<256x384xf32> -> vector<256x384xf32>
    %21 = arith.addf %14, %20 : vector<256x384xf32>
    %c0_21 = arith.constant 0 : index
    %c1_22 = arith.constant 1 : index
    %c0_23 = arith.constant 0 : index
    %c0_24 = arith.constant 0 : index
    %22 = vector.load %arg1[%c0_21, %c1_22, %c0_23, %c0_24] : memref<1x18x18x36xf32, #tpu.memory_space<vmem>>, vector<1x16x16x36xf32>
    %23 = vector.shape_cast %22 : vector<1x16x16x36xf32> to vector<256x36xf32>
    %24 = arith.truncf %23 : vector<256x36xf32> to vector<256x36xbf16>
    %c3 = arith.constant 3 : index
    %c0_25 = arith.constant 0 : index
    %c0_26 = arith.constant 0 : index
    %25 = vector.load %arg3[%c3, %c0_25, %c0_26] : memref<9x36x384xbf16, #tpu.memory_space<vmem>>, vector<1x36x384xbf16>
    %26 = vector.shape_cast %25 : vector<1x36x384xbf16> to vector<36x384xbf16>
    %cst_27 = arith.constant dense<0.000000e+00> : vector<256x384xf32>
    %27 = tpu.matmul %24, %26, %cst_27 {dimension_numbers = #tpu.dot_dimension_numbers<[1], [0], [0], [1], [0, 0, 1, 1], [], []>} : vector<256x36xbf16>, vector<36x384xbf16>, vector<256x384xf32> -> vector<256x384xf32>
    %28 = arith.addf %21, %27 : vector<256x384xf32>
    %c0_28 = arith.constant 0 : index
    %c1_29 = arith.constant 1 : index
    %c1_30 = arith.constant 1 : index
    %c0_31 = arith.constant 0 : index
    %29 = vector.load %arg1[%c0_28, %c1_29, %c1_30, %c0_31] : memref<1x18x18x36xf32, #tpu.memory_space<vmem>>, vector<1x16x16x36xf32>
    %30 = vector.shape_cast %29 : vector<1x16x16x36xf32> to vector<256x36xf32>
    %31 = arith.truncf %30 : vector<256x36xf32> to vector<256x36xbf16>
    %c4 = arith.constant 4 : index
    %c0_32 = arith.constant 0 : index
    %c0_33 = arith.constant 0 : index
    %32 = vector.load %arg3[%c4, %c0_32, %c0_33] : memref<9x36x384xbf16, #tpu.memory_space<vmem>>, vector<1x36x384xbf16>
    %33 = vector.shape_cast %32 : vector<1x36x384xbf16> to vector<36x384xbf16>
    %cst_34 = arith.constant dense<0.000000e+00> : vector<256x384xf32>
    %34 = tpu.matmul %31, %33, %cst_34 {dimension_numbers = #tpu.dot_dimension_numbers<[1], [0], [0], [1], [0, 0, 1, 1], [], []>} : vector<256x36xbf16>, vector<36x384xbf16>, vector<256x384xf32> -> vector<256x384xf32>
    %35 = arith.addf %28, %34 : vector<256x384xf32>
    %c0_35 = arith.constant 0 : index
    %c1_36 = arith.constant 1 : index
    %c2_37 = arith.constant 2 : index
    %c0_38 = arith.constant 0 : index
    %36 = vector.load %arg1[%c0_35, %c1_36, %c2_37, %c0_38] : memref<1x18x18x36xf32, #tpu.memory_space<vmem>>, vector<1x16x16x36xf32>
    %37 = vector.shape_cast %36 : vector<1x16x16x36xf32> to vector<256x36xf32>
    %38 = arith.truncf %37 : vector<256x36xf32> to vector<256x36xbf16>
    %c5 = arith.constant 5 : index
    %c0_39 = arith.constant 0 : index
    %c0_40 = arith.constant 0 : index
    %39 = vector.load %arg3[%c5, %c0_39, %c0_40] : memref<9x36x384xbf16, #tpu.memory_space<vmem>>, vector<1x36x384xbf16>
    %40 = vector.shape_cast %39 : vector<1x36x384xbf16> to vector<36x384xbf16>
    %cst_41 = arith.constant dense<0.000000e+00> : vector<256x384xf32>
    %41 = tpu.matmul %38, %40, %cst_41 {dimension_numbers = #tpu.dot_dimension_numbers<[1], [0], [0], [1], [0, 0, 1, 1], [], []>} : vector<256x36xbf16>, vector<36x384xbf16>, vector<256x384xf32> -> vector<256x384xf32>
    %42 = arith.addf %35, %41 : vector<256x384xf32>
    %c0_42 = arith.constant 0 : index
    %c2_43 = arith.constant 2 : index
    %c0_44 = arith.constant 0 : index
    %c0_45 = arith.constant 0 : index
    %43 = vector.load %arg1[%c0_42, %c2_43, %c0_44, %c0_45] : memref<1x18x18x36xf32, #tpu.memory_space<vmem>>, vector<1x16x16x36xf32>
    %44 = vector.shape_cast %43 : vector<1x16x16x36xf32> to vector<256x36xf32>
    %45 = arith.truncf %44 : vector<256x36xf32> to vector<256x36xbf16>
    %c6 = arith.constant 6 : index
    %c0_46 = arith.constant 0 : index
    %c0_47 = arith.constant 0 : index
    %46 = vector.load %arg3[%c6, %c0_46, %c0_47] : memref<9x36x384xbf16, #tpu.memory_space<vmem>>, vector<1x36x384xbf16>
    %47 = vector.shape_cast %46 : vector<1x36x384xbf16> to vector<36x384xbf16>
    %cst_48 = arith.constant dense<0.000000e+00> : vector<256x384xf32>
    %48 = tpu.matmul %45, %47, %cst_48 {dimension_numbers = #tpu.dot_dimension_numbers<[1], [0], [0], [1], [0, 0, 1, 1], [], []>} : vector<256x36xbf16>, vector<36x384xbf16>, vector<256x384xf32> -> vector<256x384xf32>
    %49 = arith.addf %42, %48 : vector<256x384xf32>
    %c0_49 = arith.constant 0 : index
    %c2_50 = arith.constant 2 : index
    %c1_51 = arith.constant 1 : index
    %c0_52 = arith.constant 0 : index
    %50 = vector.load %arg1[%c0_49, %c2_50, %c1_51, %c0_52] : memref<1x18x18x36xf32, #tpu.memory_space<vmem>>, vector<1x16x16x36xf32>
    %51 = vector.shape_cast %50 : vector<1x16x16x36xf32> to vector<256x36xf32>
    %52 = arith.truncf %51 : vector<256x36xf32> to vector<256x36xbf16>
    %c7 = arith.constant 7 : index
    %c0_53 = arith.constant 0 : index
    %c0_54 = arith.constant 0 : index
    %53 = vector.load %arg3[%c7, %c0_53, %c0_54] : memref<9x36x384xbf16, #tpu.memory_space<vmem>>, vector<1x36x384xbf16>
    %54 = vector.shape_cast %53 : vector<1x36x384xbf16> to vector<36x384xbf16>
    %cst_55 = arith.constant dense<0.000000e+00> : vector<256x384xf32>
    %55 = tpu.matmul %52, %54, %cst_55 {dimension_numbers = #tpu.dot_dimension_numbers<[1], [0], [0], [1], [0, 0, 1, 1], [], []>} : vector<256x36xbf16>, vector<36x384xbf16>, vector<256x384xf32> -> vector<256x384xf32>
    %56 = arith.addf %49, %55 : vector<256x384xf32>
    %c0_56 = arith.constant 0 : index
    %c2_57 = arith.constant 2 : index
    %c2_58 = arith.constant 2 : index
    %c0_59 = arith.constant 0 : index
    %57 = vector.load %arg1[%c0_56, %c2_57, %c2_58, %c0_59] : memref<1x18x18x36xf32, #tpu.memory_space<vmem>>, vector<1x16x16x36xf32>
    %58 = vector.shape_cast %57 : vector<1x16x16x36xf32> to vector<256x36xf32>
    %59 = arith.truncf %58 : vector<256x36xf32> to vector<256x36xbf16>
    %c8 = arith.constant 8 : index
    %c0_60 = arith.constant 0 : index
    %c0_61 = arith.constant 0 : index
    %60 = vector.load %arg3[%c8, %c0_60, %c0_61] : memref<9x36x384xbf16, #tpu.memory_space<vmem>>, vector<1x36x384xbf16>
    %61 = vector.shape_cast %60 : vector<1x36x384xbf16> to vector<36x384xbf16>
    %cst_62 = arith.constant dense<0.000000e+00> : vector<256x384xf32>
    %62 = tpu.matmul %59, %61, %cst_62 {dimension_numbers = #tpu.dot_dimension_numbers<[1], [0], [0], [1], [0, 0, 1, 1], [], []>} : vector<256x36xbf16>, vector<36x384xbf16>, vector<256x384xf32> -> vector<256x384xf32>
    %63 = arith.addf %56, %62 : vector<256x384xf32>
    %c0_63 = arith.constant 0 : index
    %c0_64 = arith.constant 0 : index
    %64 = vector.load %arg5[%c0_63, %c0_64] : memref<1x384xf32, #tpu.memory_space<vmem>>, vector<1x384xf32>
    %65 = vector.broadcast %64 : vector<1x384xf32> to vector<256x384xf32>
    %66 = arith.addf %63, %65 : vector<256x384xf32>
    %c0_65 = arith.constant 0 : index
    %c0_66 = arith.constant 0 : index
    %67 = vector.load %arg2[%c0_65, %c0_66] : memref<256x128xf32, #tpu.memory_space<vmem>>, vector<256x128xf32>
    %68 = vector.extract_strided_slice %66 {offsets = [0, 0], sizes = [256, 256], strides = [1, 1]} : vector<256x384xf32> to vector<256x256xf32>
    %69 = arith.negf %68 : vector<256x256xf32>
    %70 = math.exp %69 : vector<256x256xf32>
    %cst_67 = arith.constant 1.000000e+00 : f32
    %71 = vector.broadcast %cst_67 : f32 to vector<256x256xf32>
    %72 = arith.addf %71, %70 : vector<256x256xf32>
    %73 = arith.divf %71, %72 : vector<256x256xf32>
    %74 = vector.extract_strided_slice %73 {offsets = [0, 0], sizes = [256, 128], strides = [1, 1]} : vector<256x256xf32> to vector<256x128xf32>
    %75 = vector.extract_strided_slice %73 {offsets = [0, 128], sizes = [256, 128], strides = [1, 1]} : vector<256x256xf32> to vector<256x128xf32>
    %cst_68 = arith.constant 0.000000e+00 : f32
    %76 = vector.broadcast %cst_68 : f32 to vector<1x1x18x128xf32>
    %c0_69 = arith.constant 0 : index
    %c0_70 = arith.constant 0 : index
    %c0_71 = arith.constant 0 : index
    %c0_72 = arith.constant 0 : index
    %77 = vector.load %arg7[%c0_69, %c0_70, %c0_71, %c0_72] : memref<1x18x18x128xf32, #tpu.memory_space<vmem>>, vector<1x1x18x128xf32>
    tpu.vector_store %arg7[%c0_69, %c0_70, %c0_71, %c0_72], %76 {strides = array<i32>} : memref<1x18x18x128xf32, #tpu.memory_space<vmem>>, vector<1x1x18x128xf32>,
    %c0_73 = arith.constant 0 : index
    %c17 = arith.constant 17 : index
    %c0_74 = arith.constant 0 : index
    %c0_75 = arith.constant 0 : index
    %78 = vector.load %arg7[%c0_73, %c17, %c0_74, %c0_75] : memref<1x18x18x128xf32, #tpu.memory_space<vmem>>, vector<1x1x18x128xf32>
    tpu.vector_store %arg7[%c0_73, %c17, %c0_74, %c0_75], %76 {strides = array<i32>} : memref<1x18x18x128xf32, #tpu.memory_space<vmem>>, vector<1x1x18x128xf32>,
    %cst_76 = arith.constant 0.000000e+00 : f32
    %79 = vector.broadcast %cst_76 : f32 to vector<1x18x1x128xf32>
    %c0_77 = arith.constant 0 : index
    %c0_78 = arith.constant 0 : index
    %c0_79 = arith.constant 0 : index
    %c0_80 = arith.constant 0 : index
    %80 = vector.load %arg7[%c0_77, %c0_78, %c0_79, %c0_80] : memref<1x18x18x128xf32, #tpu.memory_space<vmem>>, vector<1x18x1x128xf32>
    tpu.vector_store %arg7[%c0_77, %c0_78, %c0_79, %c0_80], %79 {strides = array<i32>} : memref<1x18x18x128xf32, #tpu.memory_space<vmem>>, vector<1x18x1x128xf32>,
    %c0_81 = arith.constant 0 : index
    %c0_82 = arith.constant 0 : index
    %c17_83 = arith.constant 17 : index
    %c0_84 = arith.constant 0 : index
    %81 = vector.load %arg7[%c0_81, %c0_82, %c17_83, %c0_84] : memref<1x18x18x128xf32, #tpu.memory_space<vmem>>, vector<1x18x1x128xf32>
    tpu.vector_store %arg7[%c0_81, %c0_82, %c17_83, %c0_84], %79 {strides = array<i32>} : memref<1x18x18x128xf32, #tpu.memory_space<vmem>>, vector<1x18x1x128xf32>,
    %82 = arith.mulf %74, %67 : vector<256x128xf32>
    %83 = vector.shape_cast %82 : vector<256x128xf32> to vector<1x16x16x128xf32>
    %c0_85 = arith.constant 0 : index
    %c1_86 = arith.constant 1 : index
    %c1_87 = arith.constant 1 : index
    %c0_88 = arith.constant 0 : index
    %84 = vector.load %arg7[%c0_85, %c1_86, %c1_87, %c0_88] : memref<1x18x18x128xf32, #tpu.memory_space<vmem>>, vector<1x16x16x128xf32>
    tpu.vector_store %arg7[%c0_85, %c1_86, %c1_87, %c0_88], %83 {strides = array<i32>} : memref<1x18x18x128xf32, #tpu.memory_space<vmem>>, vector<1x16x16x128xf32>,
    %85 = vector.extract_strided_slice %66 {offsets = [0, 256], sizes = [256, 128], strides = [1, 1]} : vector<256x384xf32> to vector<256x128xf32>
    %c0_89 = arith.constant 0 : index
    %c0_90 = arith.constant 0 : index
    %c0_91 = arith.constant 0 : index
    %c0_92 = arith.constant 0 : index
    %86 = vector.load %arg7[%c0_89, %c0_90, %c0_91, %c0_92] : memref<1x18x18x128xf32, #tpu.memory_space<vmem>>, vector<1x16x16x128xf32>
    %87 = vector.shape_cast %86 : vector<1x16x16x128xf32> to vector<256x128xf32>
    %88 = arith.truncf %87 : vector<256x128xf32> to vector<256x128xbf16>
    %c0_93 = arith.constant 0 : index
    %c0_94 = arith.constant 0 : index
    %c0_95 = arith.constant 0 : index
    %89 = vector.load %arg4[%c0_93, %c0_94, %c0_95] : memref<9x128x128xbf16, #tpu.memory_space<vmem>>, vector<1x128x128xbf16>
    %90 = vector.shape_cast %89 : vector<1x128x128xbf16> to vector<128x128xbf16>
    %cst_96 = arith.constant dense<0.000000e+00> : vector<256x128xf32>
    %91 = tpu.matmul %88, %90, %cst_96 {dimension_numbers = #tpu.dot_dimension_numbers<[1], [0], [0], [1], [0, 0, 1, 1], [], []>} : vector<256x128xbf16>, vector<128x128xbf16>, vector<256x128xf32> -> vector<256x128xf32>
    %92 = arith.addf %85, %91 : vector<256x128xf32>
    %c0_97 = arith.constant 0 : index
    %c0_98 = arith.constant 0 : index
    %c1_99 = arith.constant 1 : index
    %c0_100 = arith.constant 0 : index
    %93 = vector.load %arg7[%c0_97, %c0_98, %c1_99, %c0_100] : memref<1x18x18x128xf32, #tpu.memory_space<vmem>>, vector<1x16x16x128xf32>
    %94 = vector.shape_cast %93 : vector<1x16x16x128xf32> to vector<256x128xf32>
    %95 = arith.truncf %94 : vector<256x128xf32> to vector<256x128xbf16>
    %c1_101 = arith.constant 1 : index
    %c0_102 = arith.constant 0 : index
    %c0_103 = arith.constant 0 : index
    %96 = vector.load %arg4[%c1_101, %c0_102, %c0_103] : memref<9x128x128xbf16, #tpu.memory_space<vmem>>, vector<1x128x128xbf16>
    %97 = vector.shape_cast %96 : vector<1x128x128xbf16> to vector<128x128xbf16>
    %cst_104 = arith.constant dense<0.000000e+00> : vector<256x128xf32>
    %98 = tpu.matmul %95, %97, %cst_104 {dimension_numbers = #tpu.dot_dimension_numbers<[1], [0], [0], [1], [0, 0, 1, 1], [], []>} : vector<256x128xbf16>, vector<128x128xbf16>, vector<256x128xf32> -> vector<256x128xf32>
    %99 = arith.addf %92, %98 : vector<256x128xf32>
    %c0_105 = arith.constant 0 : index
    %c0_106 = arith.constant 0 : index
    %c2_107 = arith.constant 2 : index
    %c0_108 = arith.constant 0 : index
    %100 = vector.load %arg7[%c0_105, %c0_106, %c2_107, %c0_108] : memref<1x18x18x128xf32, #tpu.memory_space<vmem>>, vector<1x16x16x128xf32>
    %101 = vector.shape_cast %100 : vector<1x16x16x128xf32> to vector<256x128xf32>
    %102 = arith.truncf %101 : vector<256x128xf32> to vector<256x128xbf16>
    %c2_109 = arith.constant 2 : index
    %c0_110 = arith.constant 0 : index
    %c0_111 = arith.constant 0 : index
    %103 = vector.load %arg4[%c2_109, %c0_110, %c0_111] : memref<9x128x128xbf16, #tpu.memory_space<vmem>>, vector<1x128x128xbf16>
    %104 = vector.shape_cast %103 : vector<1x128x128xbf16> to vector<128x128xbf16>
    %cst_112 = arith.constant dense<0.000000e+00> : vector<256x128xf32>
    %105 = tpu.matmul %102, %104, %cst_112 {dimension_numbers = #tpu.dot_dimension_numbers<[1], [0], [0], [1], [0, 0, 1, 1], [], []>} : vector<256x128xbf16>, vector<128x128xbf16>, vector<256x128xf32> -> vector<256x128xf32>
    %106 = arith.addf %99, %105 : vector<256x128xf32>
    %c0_113 = arith.constant 0 : index
    %c1_114 = arith.constant 1 : index
    %c0_115 = arith.constant 0 : index
    %c0_116 = arith.constant 0 : index
    %107 = vector.load %arg7[%c0_113, %c1_114, %c0_115, %c0_116] : memref<1x18x18x128xf32, #tpu.memory_space<vmem>>, vector<1x16x16x128xf32>
    %108 = vector.shape_cast %107 : vector<1x16x16x128xf32> to vector<256x128xf32>
    %109 = arith.truncf %108 : vector<256x128xf32> to vector<256x128xbf16>
    %c3_117 = arith.constant 3 : index
    %c0_118 = arith.constant 0 : index
    %c0_119 = arith.constant 0 : index
    %110 = vector.load %arg4[%c3_117, %c0_118, %c0_119] : memref<9x128x128xbf16, #tpu.memory_space<vmem>>, vector<1x128x128xbf16>
    %111 = vector.shape_cast %110 : vector<1x128x128xbf16> to vector<128x128xbf16>
    %cst_120 = arith.constant dense<0.000000e+00> : vector<256x128xf32>
    %112 = tpu.matmul %109, %111, %cst_120 {dimension_numbers = #tpu.dot_dimension_numbers<[1], [0], [0], [1], [0, 0, 1, 1], [], []>} : vector<256x128xbf16>, vector<128x128xbf16>, vector<256x128xf32> -> vector<256x128xf32>
    %113 = arith.addf %106, %112 : vector<256x128xf32>
    %c0_121 = arith.constant 0 : index
    %c1_122 = arith.constant 1 : index
    %c1_123 = arith.constant 1 : index
    %c0_124 = arith.constant 0 : index
    %114 = vector.load %arg7[%c0_121, %c1_122, %c1_123, %c0_124] : memref<1x18x18x128xf32, #tpu.memory_space<vmem>>, vector<1x16x16x128xf32>
    %115 = vector.shape_cast %114 : vector<1x16x16x128xf32> to vector<256x128xf32>
    %116 = arith.truncf %115 : vector<256x128xf32> to vector<256x128xbf16>
    %c4_125 = arith.constant 4 : index
    %c0_126 = arith.constant 0 : index
    %c0_127 = arith.constant 0 : index
    %117 = vector.load %arg4[%c4_125, %c0_126, %c0_127] : memref<9x128x128xbf16, #tpu.memory_space<vmem>>, vector<1x128x128xbf16>
    %118 = vector.shape_cast %117 : vector<1x128x128xbf16> to vector<128x128xbf16>
    %cst_128 = arith.constant dense<0.000000e+00> : vector<256x128xf32>
    %119 = tpu.matmul %116, %118, %cst_128 {dimension_numbers = #tpu.dot_dimension_numbers<[1], [0], [0], [1], [0, 0, 1, 1], [], []>} : vector<256x128xbf16>, vector<128x128xbf16>, vector<256x128xf32> -> vector<256x128xf32>
    %120 = arith.addf %113, %119 : vector<256x128xf32>
    %c0_129 = arith.constant 0 : index
    %c1_130 = arith.constant 1 : index
    %c2_131 = arith.constant 2 : index
    %c0_132 = arith.constant 0 : index
    %121 = vector.load %arg7[%c0_129, %c1_130, %c2_131, %c0_132] : memref<1x18x18x128xf32, #tpu.memory_space<vmem>>, vector<1x16x16x128xf32>
    %122 = vector.shape_cast %121 : vector<1x16x16x128xf32> to vector<256x128xf32>
    %123 = arith.truncf %122 : vector<256x128xf32> to vector<256x128xbf16>
    %c5_133 = arith.constant 5 : index
    %c0_134 = arith.constant 0 : index
    %c0_135 = arith.constant 0 : index
    %124 = vector.load %arg4[%c5_133, %c0_134, %c0_135] : memref<9x128x128xbf16, #tpu.memory_space<vmem>>, vector<1x128x128xbf16>
    %125 = vector.shape_cast %124 : vector<1x128x128xbf16> to vector<128x128xbf16>
    %cst_136 = arith.constant dense<0.000000e+00> : vector<256x128xf32>
    %126 = tpu.matmul %123, %125, %cst_136 {dimension_numbers = #tpu.dot_dimension_numbers<[1], [0], [0], [1], [0, 0, 1, 1], [], []>} : vector<256x128xbf16>, vector<128x128xbf16>, vector<256x128xf32> -> vector<256x128xf32>
    %127 = arith.addf %120, %126 : vector<256x128xf32>
    %c0_137 = arith.constant 0 : index
    %c2_138 = arith.constant 2 : index
    %c0_139 = arith.constant 0 : index
    %c0_140 = arith.constant 0 : index
    %128 = vector.load %arg7[%c0_137, %c2_138, %c0_139, %c0_140] : memref<1x18x18x128xf32, #tpu.memory_space<vmem>>, vector<1x16x16x128xf32>
    %129 = vector.shape_cast %128 : vector<1x16x16x128xf32> to vector<256x128xf32>
    %130 = arith.truncf %129 : vector<256x128xf32> to vector<256x128xbf16>
    %c6_141 = arith.constant 6 : index
    %c0_142 = arith.constant 0 : index
    %c0_143 = arith.constant 0 : index
    %131 = vector.load %arg4[%c6_141, %c0_142, %c0_143] : memref<9x128x128xbf16, #tpu.memory_space<vmem>>, vector<1x128x128xbf16>
    %132 = vector.shape_cast %131 : vector<1x128x128xbf16> to vector<128x128xbf16>
    %cst_144 = arith.constant dense<0.000000e+00> : vector<256x128xf32>
    %133 = tpu.matmul %130, %132, %cst_144 {dimension_numbers = #tpu.dot_dimension_numbers<[1], [0], [0], [1], [0, 0, 1, 1], [], []>} : vector<256x128xbf16>, vector<128x128xbf16>, vector<256x128xf32> -> vector<256x128xf32>
    %134 = arith.addf %127, %133 : vector<256x128xf32>
    %c0_145 = arith.constant 0 : index
    %c2_146 = arith.constant 2 : index
    %c1_147 = arith.constant 1 : index
    %c0_148 = arith.constant 0 : index
    %135 = vector.load %arg7[%c0_145, %c2_146, %c1_147, %c0_148] : memref<1x18x18x128xf32, #tpu.memory_space<vmem>>, vector<1x16x16x128xf32>
    %136 = vector.shape_cast %135 : vector<1x16x16x128xf32> to vector<256x128xf32>
    %137 = arith.truncf %136 : vector<256x128xf32> to vector<256x128xbf16>
    %c7_149 = arith.constant 7 : index
    %c0_150 = arith.constant 0 : index
    %c0_151 = arith.constant 0 : index
    %138 = vector.load %arg4[%c7_149, %c0_150, %c0_151] : memref<9x128x128xbf16, #tpu.memory_space<vmem>>, vector<1x128x128xbf16>
    %139 = vector.shape_cast %138 : vector<1x128x128xbf16> to vector<128x128xbf16>
    %cst_152 = arith.constant dense<0.000000e+00> : vector<256x128xf32>
    %140 = tpu.matmul %137, %139, %cst_152 {dimension_numbers = #tpu.dot_dimension_numbers<[1], [0], [0], [1], [0, 0, 1, 1], [], []>} : vector<256x128xbf16>, vector<128x128xbf16>, vector<256x128xf32> -> vector<256x128xf32>
    %141 = arith.addf %134, %140 : vector<256x128xf32>
    %c0_153 = arith.constant 0 : index
    %c2_154 = arith.constant 2 : index
    %c2_155 = arith.constant 2 : index
    %c0_156 = arith.constant 0 : index
    %142 = vector.load %arg7[%c0_153, %c2_154, %c2_155, %c0_156] : memref<1x18x18x128xf32, #tpu.memory_space<vmem>>, vector<1x16x16x128xf32>
    %143 = vector.shape_cast %142 : vector<1x16x16x128xf32> to vector<256x128xf32>
    %144 = arith.truncf %143 : vector<256x128xf32> to vector<256x128xbf16>
    %c8_157 = arith.constant 8 : index
    %c0_158 = arith.constant 0 : index
    %c0_159 = arith.constant 0 : index
    %145 = vector.load %arg4[%c8_157, %c0_158, %c0_159] : memref<9x128x128xbf16, #tpu.memory_space<vmem>>, vector<1x128x128xbf16>
    %146 = vector.shape_cast %145 : vector<1x128x128xbf16> to vector<128x128xbf16>
    %cst_160 = arith.constant dense<0.000000e+00> : vector<256x128xf32>
    %147 = tpu.matmul %144, %146, %cst_160 {dimension_numbers = #tpu.dot_dimension_numbers<[1], [0], [0], [1], [0, 0, 1, 1], [], []>} : vector<256x128xbf16>, vector<128x128xbf16>, vector<256x128xf32> -> vector<256x128xf32>
    %148 = arith.addf %141, %147 : vector<256x128xf32>
    %cst_161 = arith.constant 0.000000e+00 : f32
    %149 = vector.broadcast %cst_161 : f32 to vector<256x128xf32>
    %150 = arith.maximumf %148, %149 : vector<256x128xf32>
    %151 = arith.mulf %75, %67 : vector<256x128xf32>
    %cst_162 = arith.constant 1.000000e+00 : f32
    %152 = vector.broadcast %cst_162 : f32 to vector<256x128xf32>
    %153 = arith.subf %152, %75 : vector<256x128xf32>
    %154 = arith.mulf %153, %150 : vector<256x128xf32>
    %155 = arith.addf %151, %154 : vector<256x128xf32>
    %c0_163 = arith.constant 0 : index
    %c0_164 = arith.constant 0 : index
    %156 = vector.load %arg6[%c0_163, %c0_164] : memref<256x128xf32, #tpu.memory_space<vmem>>, vector<256x128xf32>
    tpu.vector_store %arg6[%c0_163, %c0_164], %155 {strides = array<i32>} : memref<256x128xf32, #tpu.memory_space<vmem>>, vector<256x128xf32>,
    return
  }
  func.func @transform_0(%arg0: i32) -> (i32, i32, i32, i32) {
    %c0_i32 = arith.constant 0 : i32
    %c0_i32_0 = arith.constant 0 : i32
    %c0_i32_1 = arith.constant 0 : i32
    %c0_i32_2 = arith.constant 0 : i32
    return %arg0, %c0_i32, %c0_i32_0, %c0_i32_1 : i32, i32, i32, i32
  }
  func.func @transform_1(%arg0: i32) -> (i32, i32) {
    %c0_i32 = arith.constant 0 : i32
    %c0_i32_0 = arith.constant 0 : i32
    return %arg0, %c0_i32 : i32, i32
  }
  func.func @transform_2(%arg0: i32) -> (i32, i32, i32) {
    %c0_i32 = arith.constant 0 : i32
    %c0_i32_0 = arith.constant 0 : i32
    %c0_i32_1 = arith.constant 0 : i32
    %c0_i32_2 = arith.constant 0 : i32
    return %c0_i32, %c0_i32_0, %c0_i32_1 : i32, i32, i32
  }
  func.func @transform_3(%arg0: i32) -> (i32, i32, i32) {
    %c0_i32 = arith.constant 0 : i32
    %c0_i32_0 = arith.constant 0 : i32
    %c0_i32_1 = arith.constant 0 : i32
    %c0_i32_2 = arith.constant 0 : i32
    return %c0_i32, %c0_i32_0, %c0_i32_1 : i32, i32, i32
  }
  func.func @transform_4(%arg0: i32) -> (i32, i32) {
    %c0_i32 = arith.constant 0 : i32
    %c0_i32_0 = arith.constant 0 : i32
    %c0_i32_1 = arith.constant 0 : i32
    return %c0_i32, %c0_i32_0 : i32, i32
  }
  func.func @transform_5(%arg0: i32) -> (i32, i32) {
    %c0_i32 = arith.constant 0 : i32
    %c0_i32_0 = arith.constant 0 : i32
    return %arg0, %c0_i32 : i32, i32
  }
}

</mosaic_0001>

<bundles_post_ra>
// kernel: conv_gru_cell.1
= control target key start
LH: loop header
LB: loop body
LE: loop exit
PB: predicated region body
PF: predicated region fallthrough
CT: control target
= control target key end

     0   :  { %s12829_s18 = smov 0   ;;  %s15078_s0 = inlined_call_operand.vmem [shape: f32[2,18,18,36], index: 0, kind: input, shape index: {}]   ;;  %s15079_s1 = inlined_call_operand.vmem [shape: f32[512,128], index: 1, kind: input, shape index: {}]   ;;  %s15080_s2 = inlined_call_operand.vmem [shape: bf16[9,36,384], index: 2, kind: input, shape index: {}]   ;;  %s15081_s3 = inlined_call_operand.vmem [shape: bf16[9,128,128], index: 3, kind: input, shape index: {}]   ;;  %s15082_s4 = inlined_call_operand.vmem [shape: f32[1,384], index: 4, kind: input, shape index: {}]   ;;  %s15083_s5 = inlined_call_operand.vmem [shape: f32[512,128], index: 5, kind: output, shape index: {}]  }
   0x1 LB: > { %s12835_s19 = sadd.s32 4294967295, %s12795_s18   ;;  %p9169_p0 = scmp.ge.s32.totalorder %s12795_s18, 1  ;;  %s12795_s18 = sphi %s12829_s18, %s15_s18  }
   0x2   : > { %p198_p1 = scmp.lt.s32.totalorder %s12795_s18, 3 }
   0x4   : > { %p199_p2 = pnand %p9169_p0, %p198_p1 }
   0x6   : > { %202 = sbr.rel (%p199_p2) target bundleno = 2158 (0x86e), region = 40 }
   0xd   : > { %v12360_v0 = vld [vmem:[%s15080_s2 + $0x40] ss:$12 sps:$4 sm:$0xff]   ;;  %v12362_v1 = vld [vmem:[%s15080_s2 + $0x3c] ss:$12 sps:$4 sm:$0xff]   ;;  %v12797_v2 = vmov 0   ;;  %p231_p3 = scmp.lt.s32.totalorder %s12835_s19, 1 }
   0xe   : > { %497 = vmatprep.mubr.bf16.mxu0 %v12797_v2  ;;  %465 = vmatprep.subr.bf16.mxu0 %v12360_v0  ;;  %v12363_v3 = vld [vmem:[%s15080_s2 + $0x58] ss:$12 sps:$4 sm:$0xff]   ;;  %v9183_v4 = vld [vmem:[%s15080_s2 + $0x6c] sm:$0x33]  ;;  %v12365_v5 = vld [vmem:[%s15080_s2 + $0x54] ss:$12 sps:$4 sm:$0xff]  }
   0xf   : > { %466 = vmatpush1.bf16.msra.mxu0 %v12362_v1  ;;  %s232_s30 = scalar_select %p231_p3, %s12835_s19, 1  ;;  %v9192_v6 = vcombine.high %v9183_v4, %v9183_v4  ;;  %v9191_v7 = vcombine.low %v9183_v4, %v9183_v4  ;;  %vm455_vm0 = vcmask 1041408   ;;  %v12370_v11 = vld [vmem:[%s15080_s2 + $0x4] ss:$12 sps:$4 sm:$0xff]   ;;  %vm406_vm1 = vcmask 293888  }
  0x10   : > { %467 = vmatprep.subr.bf16.mxu0 %v12363_v3  ;;  %v12368_v13 = vld [vmem:[%s15080_s2] ss:$12 sps:$4 sm:$0xff]   ;;  %v12373_v14 = vld [vmem:[%s15080_s2 + $0x1c] ss:$12 sps:$4 sm:$0xff]   ;;  %v305_v15 = vld [vmem:[%s15080_s2 + $0x30] sm:$0x33] }
  0x11   : > { %s12349_s6 = smul.u32 432, %s232_s30  ;;  %v457_v8 = vsel %vm455_vm0, %v9191_v7, 0  ;;  %v12371_v18 = vld [vmem:[%s15080_s2 + $0x18] ss:$12 sps:$4 sm:$0xff]   ;;  %v9234_v19 = vcombine.high %v305_v15, %v305_v15  ;;  %v9233_v20 = vcombine.low %v305_v15, %v305_v15  ;;  %v12378_v23 = vld [vmem:[%s15080_s2 + $0x7c] ss:$12 sps:$4 sm:$0xff]  }
  0x12   : > { %v12381_v7 = vld [vmem:[%s15080_s2 + $0x94] ss:$12 sps:$4 sm:$0xff]   ;;  %s9171_s8 = sshll.u32 %s12835_s19, 5 }
  0x13   : > { %468 = vmatpush1.bf16.msra.mxu0 %v12365_v5  ;;  %s12860_s9 = scalar_lea.vmem %s15078_s0, %s12349_s6  ;;  %v908_v22 = vsel %vm455_vm0, %v9233_v20, 0  ;;  %p237_p4 = scmp.lt.s32.totalorder %s9171_s8, 63 }
  0x14   : > { %9194 = vmatprep.subr.msk.bf16.mxu0 %vm455_vm0, %v9192_v6  ;;  %v307_v9 = vld [vmem:[%s12860_s9 + $0x1] sm:$0xff]  ;;  %v308_v10 = vld [vmem:[%s12860_s9 + $0x9] sm:$0xff]  ;;  %v309_v16 = vld [vmem:[%s12860_s9 + $0x19] sm:$0xff] }
  0x15   : > { %v339_v12 = vpack.c.bf16 %v308_v10, %v307_v9  ;;  %v310_v17 = vld [vmem:[%s12860_s9 + $0x21] sm:$0xff]  ;;  %v311_v24 = vld [vmem:[%s12860_s9 + $0x31] sm:$0xff]  ;;  %v312_v25 = vld [vmem:[%s12860_s9 + $0x39] sm:$0xff]  ;;  %s15215_s8 = smov (!%p237_p4, %s9171_s8), 63 }
  0x16   : > { %v12886_v21 = vpack.c.bf16 %v310_v17, %v309_v16  ;;  %v12898_v26 = vpack.c.bf16 %v312_v25, %v311_v24  ;;  %v313_v27 = vld [vmem:[%s12860_s9 + $0x49] sm:$0xff]  ;;  %v314_v28 = vld [vmem:[%s12860_s9 + $0x51] sm:$0xff]  ;;  %v315_v30 = vld [vmem:[%s12860_s9 + $0x61] sm:$0xff]  ;;  %s9172_s19 = sshll.u32 %s15215_s8, 3 }
  0x17   : > { %470 = vmatpush1.bf16.msra.mxu0 %v457_v8  ;;  %10484 = vmatprep.mubr.msk.bf16.mxu1 %vm406_vm1, %v339_v12  ;;  %v12905_v29 = vpack.c.bf16 %v314_v28, %v313_v27  ;;  %v316_v31 = vld [vmem:[%s12860_s9 + $0x69] sm:$0xff]  ;;  %v317_v33 = vld [vmem:[%s12860_s9 + $0x79] sm:$0xff]  ;;  %v318_v34 = vld [vmem:[%s12860_s9 + $0x81] sm:$0xff]  ;;  %s14200_s12 = scalar_lea.vmem %s15079_s1, %s9172_s19  ;;  %s14952_s11 = scalar_lea.vmem %s15083_s5, %s9172_s19 }
  0x18   : > { %916 = vmatprep.subr.bf16.mxu0 %v12370_v11  ;;  %v12912_v32 = vpack.c.bf16 %v316_v31, %v315_v30  ;;  %v12919_v35 = vpack.c.bf16 %v318_v34, %v317_v33  ;;  %v319_v36 = vld [vmem:[%s12860_s9 + $0x91] sm:$0xff]  ;;  %v320_v37 = vld [vmem:[%s12860_s9 + $0x99] sm:$0xff]  ;;  %v321_v39 = vld [vmem:[%s12860_s9 + $0xa9] sm:$0xff] }
  0x19   : > { %v12926_v38 = vpack.c.bf16 %v320_v37, %v319_v36  ;;  %v322_v40 = vld [vmem:[%s12860_s9 + $0xb1] sm:$0xff]  ;;  %v323_v42 = vld [vmem:[%s12860_s9 + $0xc1] sm:$0xff]  ;;  %v324_v43 = vld [vmem:[%s12860_s9 + $0xc9] sm:$0xff] }
  0x1a   : > { %9195 = vmatmul.mubr.msk.bf16.vlgmr.msra.gmra.mrb[0].mxu0 %vm406_vm1, %v339_v12  ;;  %v12933_v41 = vpack.c.bf16 %v322_v40, %v321_v39  ;;  %v12940_v44 = vpack.c.bf16 %v324_v43, %v323_v42  ;;  %v325_v45 = vld [vmem:[%s12860_s9 + $0xd9] sm:$0xff]  ;;  %v326_v46 = vld [vmem:[%s12860_s9 + $0xe1] sm:$0xff]  ;;  %v327_v48 = vld [vmem:[%s12860_s9 + $0xf1] sm:$0xff] }
  0x1b   : > { %917 = vmatpush1.bf16.msra.mxu0 %v12368_v13  ;;  %507 = vmatprep.mubr.bf16.mxu0 %v12797_v2  ;;  %v12947_v47 = vpack.c.bf16 %v326_v46, %v325_v45  ;;  %v328_v49 = vld [vmem:[%s12860_s9 + $0xf9] sm:$0xff]  ;;  %v329_v51 = vld [vmem:[%s12860_s9 + $0x109] sm:$0xff]  ;;  %v330_v52 = vld [vmem:[%s12860_s9 + $0x111] sm:$0xff] }
  0x1c   : > { %918 = vmatprep.subr.bf16.mxu0 %v12373_v14  ;;  %v12954_v50 = vpack.c.bf16 %v328_v49, %v327_v48  ;;  %v12961_v53 = vpack.c.bf16 %v330_v52, %v329_v51  ;;  %v331_v54 = vld [vmem:[%s12860_s9 + $0x121] sm:$0xff]  ;;  %v332_v55 = vld [vmem:[%s12860_s9 + $0x129] sm:$0xff]  ;;  %v333_v57 = vld [vmem:[%s12860_s9 + $0x139] sm:$0xff] }
  0x1d   : > { %v12968_v56 = vpack.c.bf16 %v332_v55, %v331_v54  ;;  %v334_v58 = vld [vmem:[%s12860_s9 + $0x141] sm:$0xff]  ;;  %v335_v60 = vld [vmem:[%s12860_s9 + $0x151] sm:$0xff]  ;;  %v336_v61 = vld [vmem:[%s12860_s9 + $0x159] sm:$0xff] }
  0x1e   : > { %v12975_v59 = vpack.c.bf16 %v334_v58, %v333_v57  ;;  %v12982_v62 = vpack.c.bf16 %v336_v61, %v335_v60  ;;  %v337_v63 = vld [vmem:[%s12860_s9 + $0x169] sm:$0xff]  ;;  %v338_v0 = vld [vmem:[%s12860_s9 + $0x171] sm:$0xff]  ;;  %v249_v3 = vld [vmem:[%s12860_s9] sm:$0xff] }
  0x1f   : > { %919 = vmatpush1.bf16.msra.mxu0 %v12371_v18  ;;  %v12989_v1 = vpack.c.bf16 %v338_v0, %v337_v63  ;;  %v250_v4 = vld [vmem:[%s12860_s9 + $0x8] sm:$0xff]  ;;  %v12376_v6 = vld [vmem:[%s15080_s2 + $0x78] ss:$12 sps:$4 sm:$0xff]   ;;  %v12379_v11 = vld [vmem:[%s15080_s2 + $0x90] ss:$12 sps:$4 sm:$0xff]  }
  0x20   : > { %9236 = vmatprep.subr.msk.bf16.mxu0 %vm455_vm0, %v9234_v19  ;;  %v12996_v5 = vpack.c.bf16 %v250_v4, %v249_v3  ;;  %v9277_v8 = vld [vmem:[%s15080_s2 + $0xa8] sm:$0x33]  ;;  %v251_v9 = vld [vmem:[%s12860_s9 + $0x18] sm:$0xff]  ;;  %v252_v10 = vld [vmem:[%s12860_s9 + $0x20] sm:$0xff] }
  0x21   : > { %v9286_v12 = vcombine.high %v9277_v8, %v9277_v8  ;;  %v9285_v13 = vcombine.low %v9277_v8, %v9277_v8  ;;  %v13015_v14 = vpack.c.bf16 %v252_v10, %v251_v9  ;;  %v12386_v16 = vld [vmem:[%s15080_s2 + $0xb8] ss:$12 sps:$4 sm:$0xff]   ;;  %v253_v17 = vld [vmem:[%s12860_s9 + $0x30] sm:$0xff]  ;;  %v255_v20 = vld [vmem:[%s12860_s9 + $0x48] sm:$0xff] }
  0x22   : > { %9196 = vmatmul.mubr.msk.bf16.gmra.mrb[4].mxu0 %vm406_vm1, %v12886_v21  ;;  %v254_v18 = vld [vmem:[%s12860_s9 + $0x38] sm:$0xff]  ;;  %v257_v24 = vld [vmem:[%s12860_s9 + $0x60] sm:$0xff]  ;;  %v258_v25 = vld [vmem:[%s12860_s9 + $0x68] sm:$0xff] }
  0x23   : > { %517 = vmatprep.mubr.bf16.mxu0 %v12797_v2  ;;  %921 = vmatpush1.bf16.msra.mxu0 %v908_v22  ;;  %v1418_v15 = vsel %vm455_vm0, %v9285_v13, 0  ;;  %v13027_v19 = vpack.c.bf16 %v254_v18, %v253_v17  ;;  %v256_v22 = vld [vmem:[%s12860_s9 + $0x50] sm:$0xff]  ;;  %v13041_v27 = vpack.c.bf16 %v258_v25, %v257_v24  ;;  %v259_v28 = vld [vmem:[%s12860_s9 + $0x78] sm:$0xff]  ;;  %v260_v30 = vld [vmem:[%s12860_s9 + $0x80] sm:$0xff] }
  0x24   : > { %1426 = vmatprep.subr.bf16.mxu0 %v12378_v23  ;;  %v13034_v23 = vpack.c.bf16 %v256_v22, %v255_v20  ;;  %v13048_v31 = vpack.c.bf16 %v260_v30, %v259_v28  ;;  %v261_v33 = vld [vmem:[%s12860_s9 + $0x90] sm:$0xff]  ;;  %v262_v34 = vld [vmem:[%s12860_s9 + $0x98] sm:$0xff]  ;;  %v263_v37 = vld [vmem:[%s12860_s9 + $0xa8] sm:$0xff] }
  0x25   : > { %v13055_v36 = vpack.c.bf16 %v262_v34, %v261_v33  ;;  %v264_v39 = vld [vmem:[%s12860_s9 + $0xb0] sm:$0xff]  ;;  %v265_v42 = vld [vmem:[%s12860_s9 + $0xc0] sm:$0xff]  ;;  %v266_v43 = vld [vmem:[%s12860_s9 + $0xc8] sm:$0xff] }
  0x26   : > { %v13062_v40 = vpack.c.bf16 %v264_v39, %v263_v37  ;;  %v13069_v45 = vpack.c.bf16 %v266_v43, %v265_v42  ;;  %v267_v46 = vld [vmem:[%s12860_s9 + $0xd8] sm:$0xff]  ;;  %v268_v48 = vld [vmem:[%s12860_s9 + $0xe0] sm:$0xff]  ;;  %v269_v51 = vld [vmem:[%s12860_s9 + $0xf0] sm:$0xff] }
  0x27   : > { %v13076_v49 = vpack.c.bf16 %v268_v48, %v267_v46  ;;  %v270_v52 = vld [vmem:[%s12860_s9 + $0xf8] sm:$0xff]  ;;  %v271_v55 = vld [vmem:[%s12860_s9 + $0x108] sm:$0xff]  ;;  %v272_v57 = vld [vmem:[%s12860_s9 + $0x110] sm:$0xff] }
  0x28   : > { %v13083_v54 = vpack.c.bf16 %v270_v52, %v269_v51  ;;  %v13090_v58 = vpack.c.bf16 %v272_v57, %v271_v55  ;;  %v273_v60 = vld [vmem:[%s12860_s9 + $0x120] sm:$0xff]  ;;  %v274_v61 = vld [vmem:[%s12860_s9 + $0x128] sm:$0xff]  ;;  %v275_v0 = vld [vmem:[%s12860_s9 + $0x138] sm:$0xff] }
  0x29   : > { %v13097_v63 = vpack.c.bf16 %v274_v61, %v273_v60  ;;  %v276_v3 = vld [vmem:[%s12860_s9 + $0x140] sm:$0xff]  ;;  %v279_v9 = vld [vmem:[%s12860_s9 + $0x168] sm:$0xff]  ;;  %v280_v10 = vld [vmem:[%s12860_s9 + $0x170] sm:$0xff] }
  0x2a   : > { %9197 = vmatmul.mubr.msk.bf16.gmra.mrb[8].mxu0 %vm406_vm1, %v12898_v26  ;;  %v13104_v4 = vpack.c.bf16 %v276_v3, %v275_v0  ;;  %v1271_v13 = vld [vmem:[%s12860_s9 + $0xa] sm:$0xff]  ;;  %v9361_v18 = vld [vmem:[%s15080_s2 + $0xe4] sm:$0x33]  ;;  %v1272_v20 = vld [vmem:[%s12860_s9 + $0x1a] sm:$0xff] }
  0x2b   : > { %527 = vmatprep.mubr.bf16.mxu0 %v12797_v2  ;;  %v12389_v17 = vld [vmem:[%s15080_s2 + $0xd0] ss:$12 sps:$4 sm:$0xff]   ;;  %v1273_v22 = vld [vmem:[%s12860_s9 + $0x22] sm:$0xff]  ;;  %v12387_v24 = vld [vmem:[%s15080_s2 + $0xcc] ss:$12 sps:$4 sm:$0xff]   ;;  %v9370_v25 = vcombine.high %v9361_v18, %v9361_v18  ;;  %v9369_v28 = vcombine.low %v9361_v18, %v9361_v18 }
  0x2c   : > { %v13144_v30 = vpack.c.bf16 %v1273_v22, %v1272_v20  ;;  %v12394_v34 = vld [vmem:[%s15080_s2 + $0xf4] ss:$12 sps:$4 sm:$0xff]   ;;  %v1276_v43 = vld [vmem:[%s12860_s9 + $0x4a] sm:$0xff] }
  0x2d   : > { %v2025_v33 = vsel %vm455_vm0, %v9369_v28, 0  ;;  %v1274_v37 = vld [vmem:[%s12860_s9 + $0x32] sm:$0xff]  ;;  %v1275_v39 = vld [vmem:[%s12860_s9 + $0x3a] sm:$0xff]  ;;  %v1278_v51 = vld [vmem:[%s12860_s9 + $0x62] sm:$0xff] }
  0x2e   : > { %v13156_v42 = vpack.c.bf16 %v1275_v39, %v1274_v37  ;;  %v1277_v46 = vld [vmem:[%s12860_s9 + $0x52] sm:$0xff]  ;;  %v1279_v52 = vld [vmem:[%s12860_s9 + $0x6a] sm:$0xff]  ;;  %v1280_v57 = vld [vmem:[%s12860_s9 + $0x7a] sm:$0xff] }
  0x2f   : > { %v13163_v48 = vpack.c.bf16 %v1277_v46, %v1276_v43  ;;  %v13170_v55 = vpack.c.bf16 %v1279_v52, %v1278_v51  ;;  %v1281_v60 = vld [vmem:[%s12860_s9 + $0x82] sm:$0xff]  ;;  %v1282_v0 = vld [vmem:[%s12860_s9 + $0x92] sm:$0xff]  ;;  %v1283_v3 = vld [vmem:[%s12860_s9 + $0x9a] sm:$0xff] }
  0x30   : > { %v13177_v61 = vpack.c.bf16 %v1281_v60, %v1280_v57  ;;  %v1289_v18 = vld [vmem:[%s12860_s9 + $0xe2] sm:$0xff]  ;;  %v1290_v22 = vld [vmem:[%s12860_s9 + $0xf2] sm:$0xff]  ;;  %v1292_v28 = vld [vmem:[%s12860_s9 + $0x10a] sm:$0xff] }
  0x31   : > { %v1294_v37 = vld [vmem:[%s12860_s9 + $0x122] sm:$0xff]  ;;  %v1295_v39 = vld [vmem:[%s12860_s9 + $0x12a] sm:$0xff]  ;;  %v1296_v46 = vld [vmem:[%s12860_s9 + $0x13a] sm:$0xff] }
  0x32   : > { %9198 = vmatmul.mubr.msk.bf16.gmra.mrb[12].mxu0 %vm406_vm1, %v12905_v29  ;;  %v13226_v43 = vpack.c.bf16 %v1295_v39, %v1294_v37  ;;  %v1297_v51 = vld [vmem:[%s12860_s9 + $0x142] sm:$0xff]  ;;  %v1298_v57 = vld [vmem:[%s12860_s9 + $0x152] sm:$0xff]  ;;  %v1299_v60 = vld [vmem:[%s12860_s9 + $0x15a] sm:$0xff] }
  0x33   : > { %537 = vmatprep.mubr.bf16.mxu0 %v12797_v2  ;;  %v13233_v52 = vpack.c.bf16 %v1297_v51, %v1296_v46  ;;  %v9351_v37 = vld [vmem:[%s12860_s9 + $0x180] sm:$0xff]  ;;  %v9352_v39 = vld [vmem:[%s12860_s9 + $0x188] sm:$0xff] }
  0x34   : > { %v13316_v46 = vpack.c.bf16 %v9352_v39, %v9351_v37  ;;  %v12400_v51 = vld [vmem:[%s15080_s2 + $0x12c] ss:$12 sps:$4 sm:$0xff]   ;;  %v9435_v39 = vld [vmem:[%s12860_s9 + $0x181] sm:$0xff] }
  0x35   : > { %v12420_v37 = vld [vmem:[%s15080_s2 + $0x20] ss:$12 sps:$4 sm:$0xff]  }
  0x3a   : > { %9199 = vmatmul.mubr.msk.bf16.gmra.mrb[16].mxu0 %vm406_vm1, %v12912_v32 }
  0x3b   : > { %547 = vmatprep.mubr.bf16.mxu0 %v12797_v2 }
  0x42   : > { %9200 = vmatmul.mubr.msk.bf16.gmra.mrb[20].mxu0 %vm406_vm1, %v12919_v35 }
  0x43   : > { %557 = vmatprep.mubr.bf16.mxu0 %v12797_v2 }
  0x4a   : > { %9201 = vmatmul.mubr.msk.bf16.gmra.mrb[24].mxu0 %vm406_vm1, %v12926_v38 }
  0x4b   : > { %567 = vmatprep.mubr.bf16.mxu0 %v12797_v2 }
  0x52   : > { %9202 = vmatmul.mubr.msk.bf16.gmra.mrb[28].mxu0 %vm406_vm1, %v12933_v41 }
  0x53   : > { %577 = vmatprep.mubr.bf16.mxu0 %v12797_v2 }
  0x5a   : > { %9203 = vmatmul.mubr.msk.bf16.gmra.mrb[32].mxu0 %vm406_vm1, %v12940_v44 }
  0x5b   : > { %587 = vmatprep.mubr.bf16.mxu0 %v12797_v2 }
  0x62   : > { %9204 = vmatmul.mubr.msk.bf16.gmra.mrb[36].mxu0 %vm406_vm1, %v12947_v47 }
  0x63   : > { %597 = vmatprep.mubr.bf16.mxu0 %v12797_v2 }
  0x6a   : > { %9205 = vmatmul.mubr.msk.bf16.gmra.mrb[40].mxu0 %vm406_vm1, %v12954_v50 }
  0x6b   : > { %607 = vmatprep.mubr.bf16.mxu0 %v12797_v2 }
  0x72   : > { %9206 = vmatmul.mubr.msk.bf16.gmra.mrb[44].mxu0 %vm406_vm1, %v12961_v53 }
  0x73   : > { %617 = vmatprep.mubr.bf16.mxu0 %v12797_v2 }
  0x7a   : > { %9207 = vmatmul.mubr.msk.bf16.gmra.mrb[48].mxu0 %vm406_vm1, %v12968_v56 }
  0x7b   : > { %627 = vmatprep.mubr.bf16.mxu0 %v12797_v2 }
  0x82   : > { %9208 = vmatmul.mubr.msk.bf16.gmra.mrb[52].mxu0 %vm406_vm1, %v12975_v59 }
  0x83   : > { %637 = vmatprep.mubr.bf16.mxu0 %v12797_v2 }
  0x8a   : > { %9209 = vmatmul.mubr.msk.bf16.gmra.mrb[56].mxu0 %vm406_vm1, %v12982_v62 }
  0x8b   : > { %647 = vmatprep.mubr.bf16.mxu0 %v12797_v2 }
  0x92   : > { %9210 = vmatmul.mubr.msk.bf16.gmra.mrb[60].mxu0 %vm406_vm1, %v12989_v1 }
  0x93   : > { %948 = vmatprep.mubr.bf16.mxu0 %v12797_v2 }
  0x9a   : > { %9237 = vmatmul.mubr.msk.bf16.vlgmr.msra.gmra.mrb[0].mxu0 %vm406_vm1, %v12996_v5 }
  0x9b   : > { %1427 = vmatpush1.bf16.msra.mxu0 %v12376_v6  ;;  %958 = vmatprep.mubr.bf16.mxu0 %v12797_v2  ;;  %v277_v6 = vld [vmem:[%s12860_s9 + $0x150] sm:$0xff] }
  0x9c   : > { %1428 = vmatprep.subr.bf16.mxu0 %v12381_v7  ;;  %v278_v7 = vld [vmem:[%s12860_s9 + $0x158] sm:$0xff] }
  0x9d   : > { %v13111_v8 = vpack.c.bf16 %v278_v7, %v277_v6  ;;  %v13184_v6 = vpack.c.bf16 %v1283_v3, %v1282_v0  ;;  %v1284_v7 = vld [vmem:[%s12860_s9 + $0xaa] sm:$0xff]  ;;  %v13240_v0 = vpack.c.bf16 %v1299_v60, %v1298_v57  ;;  %v9529_v60 = vld [vmem:[%s15080_s2 + $0x15c] sm:$0x33] }
  0x9e   : > { %v1300_v3 = vld [vmem:[%s12860_s9 + $0x16a] sm:$0xff] }
  0x9f   : > { %1429 = vmatpush1.bf16.msra.mxu0 %v12379_v11  ;;  %v13118_v11 = vpack.c.bf16 %v280_v10, %v279_v9  ;;  %v1285_v9 = vld [vmem:[%s12860_s9 + $0xb2] sm:$0xff] }
  0xa0   : > { %9288 = vmatprep.subr.msk.bf16.mxu0 %vm455_vm0, %v9286_v12  ;;  %v1270_v12 = vld [vmem:[%s12860_s9 + $0x2] sm:$0xff]  ;;  %v13191_v10 = vpack.c.bf16 %v1285_v9, %v1284_v7  ;;  %v1301_v7 = vld [vmem:[%s12860_s9 + $0x172] sm:$0xff] }
  0xa1   : > { %v13247_v9 = vpack.c.bf16 %v1301_v7, %v1300_v3  ;;  %v12405_v57 = vld [vmem:[%s15080_s2 + $0x148] ss:$12 sps:$4 sm:$0xff]   ;;  %v12403_v3 = vld [vmem:[%s15080_s2 + $0x144] ss:$12 sps:$4 sm:$0xff]   ;;  %v9538_v7 = vcombine.high %v9529_v60, %v9529_v60 }
  0xa2   : > { %9238 = vmatmul.mubr.msk.bf16.gmra.mrb[4].mxu0 %vm406_vm1, %v13015_v14 }
  0xa3   : > { %968 = vmatprep.mubr.bf16.mxu0 %v12797_v2  ;;  %1431 = vmatpush1.bf16.msra.mxu0 %v1418_v15  ;;  %v13125_v15 = vpack.c.bf16 %v1271_v13, %v1270_v12  ;;  %v1286_v12 = vld [vmem:[%s12860_s9 + $0xc2] sm:$0xff]  ;;  %v1287_v13 = vld [vmem:[%s12860_s9 + $0xca] sm:$0xff] }
  0xa4   : > { %2033 = vmatprep.subr.bf16.mxu0 %v12386_v16  ;;  %v12384_v16 = vld [vmem:[%s15080_s2 + $0xb4] ss:$12 sps:$4 sm:$0xff]  }
  0xaa   : > { %9239 = vmatmul.mubr.msk.bf16.gmra.mrb[8].mxu0 %vm406_vm1, %v13027_v19 }
  0xab   : > { %978 = vmatprep.mubr.bf16.mxu0 %v12797_v2 }
  0xb2   : > { %9240 = vmatmul.mubr.msk.bf16.gmra.mrb[12].mxu0 %vm406_vm1, %v13034_v23 }
  0xb3   : > { %988 = vmatprep.mubr.bf16.mxu0 %v12797_v2 }
  0xba   : > { %9241 = vmatmul.mubr.msk.bf16.gmra.mrb[16].mxu0 %vm406_vm1, %v13041_v27 }
  0xbb   : > { %998 = vmatprep.mubr.bf16.mxu0 %v12797_v2 }
  0xc2   : > { %9242 = vmatmul.mubr.msk.bf16.gmra.mrb[20].mxu0 %vm406_vm1, %v13048_v31 }
  0xc3   : > { %1008 = vmatprep.mubr.bf16.mxu0 %v12797_v2 }
  0xca   : > { %9243 = vmatmul.mubr.msk.bf16.gmra.mrb[24].mxu0 %vm406_vm1, %v13055_v36 }
  0xcb   : > { %1018 = vmatprep.mubr.bf16.mxu0 %v12797_v2 }
  0xd2   : > { %9244 = vmatmul.mubr.msk.bf16.gmra.mrb[28].mxu0 %vm406_vm1, %v13062_v40 }
  0xd3   : > { %1028 = vmatprep.mubr.bf16.mxu0 %v12797_v2 }
  0xda   : > { %9245 = vmatmul.mubr.msk.bf16.gmra.mrb[32].mxu0 %vm406_vm1, %v13069_v45 }
  0xdb   : > { %1038 = vmatprep.mubr.bf16.mxu0 %v12797_v2 }
  0xe2   : > { %9246 = vmatmul.mubr.msk.bf16.gmra.mrb[36].mxu0 %vm406_vm1, %v13076_v49 }
  0xe3   : > { %1048 = vmatprep.mubr.bf16.mxu0 %v12797_v2 }
  0xea   : > { %9247 = vmatmul.mubr.msk.bf16.gmra.mrb[40].mxu0 %vm406_vm1, %v13083_v54 }
  0xeb   : > { %1058 = vmatprep.mubr.bf16.mxu0 %v12797_v2 }
  0xf2   : > { %9248 = vmatmul.mubr.msk.bf16.gmra.mrb[44].mxu0 %vm406_vm1, %v13090_v58 }
  0xf3   : > { %1068 = vmatprep.mubr.bf16.mxu0 %v12797_v2 }
  0xfa   : > { %9249 = vmatmul.mubr.msk.bf16.gmra.mrb[48].mxu0 %vm406_vm1, %v13097_v63 }
  0xfb   : > { %1078 = vmatprep.mubr.bf16.mxu0 %v12797_v2 }
 0x102   : > { %9250 = vmatmul.mubr.msk.bf16.gmra.mrb[52].mxu0 %vm406_vm1, %v13104_v4 }
 0x103   : > { %1088 = vmatprep.mubr.bf16.mxu0 %v12797_v2 }
 0x10a   : > { %9251 = vmatmul.mubr.msk.bf16.gmra.mrb[56].mxu0 %vm406_vm1, %v13111_v8 }
 0x10b   : > { %1098 = vmatprep.mubr.bf16.mxu0 %v12797_v2 }
 0x112   : > { %9252 = vmatmul.mubr.msk.bf16.gmra.mrb[60].mxu0 %vm406_vm1, %v13118_v11 }
 0x113   : > { %1458 = vmatprep.mubr.bf16.mxu0 %v12797_v2 }
 0x11a   : > { %9289 = vmatmul.mubr.msk.bf16.vlgmr.msra.gmra.mrb[0].mxu0 %vm406_vm1, %v13125_v15 }
 0x11b   : > { %2034 = vmatpush1.bf16.msra.mxu0 %v12384_v16  ;;  %1468 = vmatprep.mubr.bf16.mxu0 %v12797_v2  ;;  %v13198_v16 = vpack.c.bf16 %v1287_v13, %v1286_v12  ;;  %v12392_v12 = vld [vmem:[%s15080_s2 + $0xf0] ss:$12 sps:$4 sm:$0xff]   ;;  %v12397_v13 = vld [vmem:[%s15080_s2 + $0x10c] ss:$12 sps:$4 sm:$0xff]  }
 0x11c   : > { %2035 = vmatprep.subr.bf16.mxu0 %v12389_v17  ;;  %v1288_v17 = vld [vmem:[%s12860_s9 + $0xda] sm:$0xff] }
 0x11d   : > { %v13205_v20 = vpack.c.bf16 %v1289_v18, %v1288_v17  ;;  %v9445_v17 = vld [vmem:[%s15080_s2 + $0x120] sm:$0x33]  ;;  %v12395_v18 = vld [vmem:[%s15080_s2 + $0x108] ss:$12 sps:$4 sm:$0xff]  }
 0x11f   : > { %2036 = vmatpush1.bf16.msra.mxu0 %v12387_v24  ;;  %v1291_v24 = vld [vmem:[%s12860_s9 + $0xfa] sm:$0xff] }
 0x120   : > { %9372 = vmatprep.subr.msk.bf16.mxu0 %vm455_vm0, %v9370_v25  ;;  %v13212_v25 = vpack.c.bf16 %v1291_v24, %v1290_v22  ;;  %v9454_v22 = vcombine.high %v9445_v17, %v9445_v17  ;;  %v9453_v24 = vcombine.low %v9445_v17, %v9445_v17  ;;  %v12410_v17 = vld [vmem:[%s15080_s2 + $0x16c] ss:$12 sps:$4 sm:$0xff]  }
 0x122   : > { %9290 = vmatmul.mubr.msk.bf16.gmra.mrb[4].mxu0 %vm406_vm1, %v13144_v30 }
 0x123   : > { %1478 = vmatprep.mubr.bf16.mxu0 %v12797_v2  ;;  %2038 = vmatpush1.bf16.msra.mxu0 %v2025_v33  ;;  %v1293_v33 = vld [vmem:[%s12860_s9 + $0x112] sm:$0xff] }
 0x124   : > { %2639 = vmatprep.subr.bf16.mxu0 %v12394_v34  ;;  %v13219_v34 = vpack.c.bf16 %v1293_v33, %v1292_v28  ;;  %v2631_v28 = vsel %vm455_vm0, %v9453_v24, 0  ;;  %v12402_v33 = vld [vmem:[%s15080_s2 + $0x130] ss:$12 sps:$4 sm:$0xff]   ;;  %v12416_v24 = vld [vmem:[%s15080_s2 + $0x74] ss:$0 sps:$4 sm:$0x33]  }
 0x12a   : > { %9291 = vmatmul.mubr.msk.bf16.gmra.mrb[8].mxu0 %vm406_vm1, %v13156_v42 }
 0x12b   : > { %1488 = vmatprep.mubr.bf16.mxu0 %v12797_v2 }
 0x132   : > { %9292 = vmatmul.mubr.msk.bf16.gmra.mrb[12].mxu0 %vm406_vm1, %v13163_v48 }
 0x133   : > { %1498 = vmatprep.mubr.bf16.mxu0 %v12797_v2 }
 0x13a   : > { %9293 = vmatmul.mubr.msk.bf16.gmra.mrb[16].mxu0 %vm406_vm1, %v13170_v55 }
 0x13b   : > { %1508 = vmatprep.mubr.bf16.mxu0 %v12797_v2 }
 0x142   : > { %9294 = vmatmul.mubr.msk.bf16.gmra.mrb[20].mxu0 %vm406_vm1, %v13177_v61 }
 0x143   : > { %1518 = vmatprep.mubr.bf16.mxu0 %v12797_v2 }
 0x14a   : > { %9295 = vmatmul.mubr.msk.bf16.gmra.mrb[24].mxu0 %vm406_vm1, %v13184_v6 }
 0x14b   : > { %1528 = vmatprep.mubr.bf16.mxu0 %v12797_v2 }
 0x152   : > { %9296 = vmatmul.mubr.msk.bf16.gmra.mrb[28].mxu0 %vm406_vm1, %v13191_v10 }
 0x153   : > { %1538 = vmatprep.mubr.bf16.mxu0 %v12797_v2 }
 0x15a   : > { %9297 = vmatmul.mubr.msk.bf16.gmra.mrb[32].mxu0 %vm406_vm1, %v13198_v16 }
 0x15b   : > { %1548 = vmatprep.mubr.bf16.mxu0 %v12797_v2 }
 0x162   : > { %9298 = vmatmul.mubr.msk.bf16.gmra.mrb[36].mxu0 %vm406_vm1, %v13205_v20 }
 0x163   : > { %1558 = vmatprep.mubr.bf16.mxu0 %v12797_v2 }
 0x16a   : > { %9299 = vmatmul.mubr.msk.bf16.gmra.mrb[40].mxu0 %vm406_vm1, %v13212_v25 }
 0x16b   : > { %1568 = vmatprep.mubr.bf16.mxu0 %v12797_v2 }
 0x172   : > { %9300 = vmatmul.mubr.msk.bf16.gmra.mrb[44].mxu0 %vm406_vm1, %v13219_v34 }
 0x173   : > { %1578 = vmatprep.mubr.bf16.mxu0 %v12797_v2 }
 0x17a   : > { %9301 = vmatmul.mubr.msk.bf16.gmra.mrb[48].mxu0 %vm406_vm1, %v13226_v43 }
 0x17b   : > { %1588 = vmatprep.mubr.bf16.mxu0 %v12797_v2 }
 0x182   : > { %9302 = vmatmul.mubr.msk.bf16.gmra.mrb[52].mxu0 %vm406_vm1, %v13233_v52 }
 0x183   : > { %1598 = vmatprep.mubr.bf16.mxu0 %v12797_v2 }
 0x18a   : > { %9303 = vmatmul.mubr.msk.bf16.gmra.mrb[56].mxu0 %vm406_vm1, %v13240_v0 }
 0x18b   : > { %1608 = vmatprep.mubr.bf16.mxu0 %v12797_v2 }
 0x192   : > { %9304 = vmatmul.mubr.msk.bf16.gmra.mrb[60].mxu0 %vm406_vm1, %v13247_v9 }
 0x193   : > { %2065 = vmatprep.mubr.bf16.mxu0 %v12797_v2 }
 0x19a   : > { %9373 = vmatmul.mubr.msk.bf16.vlgmr.msra.gmra.mrb[0].mxu0 %vm406_vm1, %v13015_v14 }
 0x19b   : > { %2640 = vmatpush1.bf16.msra.mxu0 %v12392_v12  ;;  %2075 = vmatprep.mubr.bf16.mxu0 %v12797_v2  ;;  %v9537_v12 = vcombine.low %v9529_v60, %v9529_v60  ;;  %v12421_v60 = vld [vmem:[%s15080_s2 + $0x38] ss:$0 sps:$4 sm:$0x33]  }
 0x19c   : > { %2641 = vmatprep.subr.bf16.mxu0 %v12397_v13 }
 0x19d   : > { %v3237_v13 = vsel %vm455_vm0, %v9537_v12, 0  ;;  %v9613_v12 = vld [vmem:[%s15080_s2 + $0x198] sm:$0x33] }
 0x19f   : > { %2642 = vmatpush1.bf16.msra.mxu0 %v12395_v18  ;;  %v12414_v18 = vld [vmem:[%s15080_s2 + $0x44] ss:$12 sps:$4 sm:$0xff]  }
 0x1a0   : > { %9456 = vmatprep.subr.msk.bf16.mxu0 %vm455_vm0, %v9454_v22  ;;  %v12415_v22 = vld [vmem:[%s15080_s2 + $0x5c] ss:$12 sps:$4 sm:$0xff]   ;;  %10478 = vmatprep.subr.bf16.mxu1 %v12414_v18 }
 0x1a1   : > { %10479 = vmatpush3.bf16.msra.mxu1 %v12414_v18  ;;  %v9621_v18 = vcombine.low %v9613_v12, %v9613_v12 }
 0x1a2   : > { %9374 = vmatmul.mubr.msk.bf16.gmra.mrb[4].mxu0 %vm406_vm1, %v13027_v19  ;;  %10480 = vmatprep.subr.bf16.mxu1 %v12415_v22 }
 0x1a3   : > { %2085 = vmatprep.mubr.bf16.mxu0 %v12797_v2  ;;  %2644 = vmatpush1.bf16.msra.mxu0 %v2631_v28  ;;  %v463_v28 = vsel %vm455_vm0, %v12416_v24, 0 }
 0x1a4   : > { %3245 = vmatprep.subr.bf16.mxu0 %v12402_v33  ;;  %v12419_v33 = vld [vmem:[%s15080_s2 + $0x8] ss:$12 sps:$4 sm:$0xff]  }
 0x1a5   : > { %10481 = vmatpush3.bf16.msra.mxu1 %v12415_v22  ;;  %v3844_v22 = vsel %vm455_vm0, %v9621_v18, 0 }
 0x1a6   : > { %12340 = vmatprep.subr.msk.bf16.mxu1 %vm455_vm0, %v12416_v24  ;;  %v12424_v24 = vld [vmem:[%s15080_s2 + $0x1a8] ss:$12 sps:$4 sm:$0xff]  }
 0x1a9   : > { %10483 = vmatpush3.bf16.msra.mxu1 %v463_v28  ;;  %v12428_v28 = vld [vmem:[%s15080_s2 + $0x80] ss:$12 sps:$4 sm:$0xff]  }
 0x1aa   : > { %9375 = vmatmul.mubr.msk.bf16.gmra.mrb[8].mxu0 %vm406_vm1, %v13034_v23  ;;  %10516 = vmatprep.subr.bf16.mxu1 %v12419_v33 }
 0x1ab   : > { %2095 = vmatprep.mubr.bf16.mxu0 %v12797_v2 }
 0x1ac   : > { %10485 = vmatmul.mubr.msk.bf16.vlgmr.msra.gmra.mrb[0].mxu1 %vm406_vm1, %v12886_v21 }
 0x1ad   : > { %10488 = vmatprep.mubr.msk.bf16.mxu1 %vm406_vm1, %v12898_v26  ;;  %10517 = vmatpush3.bf16.msra.mxu1 %v12419_v33  ;;  %v12429_v33 = vld [vmem:[%s15080_s2 + $0x98] ss:$12 sps:$4 sm:$0xff]  }
 0x1ae   : > { %10518 = vmatprep.subr.bf16.mxu1 %v12420_v37 }
 0x1b1   : > { %10519 = vmatpush3.bf16.msra.mxu1 %v12420_v37  ;;  %v12430_v37 = vld [vmem:[%s15080_s2 + $0xb0] ss:$0 sps:$4 sm:$0x33]  }
 0x1b2   : > { %9376 = vmatmul.mubr.msk.bf16.gmra.mrb[12].mxu0 %vm406_vm1, %v13041_v27  ;;  %12341 = vmatprep.subr.msk.bf16.mxu1 %vm455_vm0, %v12421_v60 }
 0x1b3   : > { %2105 = vmatprep.mubr.bf16.mxu0 %v12797_v2 }
 0x1b4   : > { %10489 = vmatmul.mubr.msk.bf16.gmra.mrb[4].mxu1 %vm406_vm1, %v12905_v29 }
 0x1b5   : > { %10492 = vmatprep.mubr.msk.bf16.mxu1 %vm406_vm1, %v12912_v32 }
 0x1ba   : > { %9377 = vmatmul.mubr.msk.bf16.gmra.mrb[16].mxu0 %vm406_vm1, %v13048_v31 }
 0x1bb   : > { %2115 = vmatprep.mubr.bf16.mxu0 %v12797_v2 }
 0x1bc   : > { %10493 = vmatmul.mubr.msk.bf16.gmra.mrb[8].mxu1 %vm406_vm1, %v12919_v35 }
 0x1bd   : > { %10496 = vmatprep.mubr.msk.bf16.mxu1 %vm406_vm1, %v12926_v38 }
 0x1c2   : > { %9378 = vmatmul.mubr.msk.bf16.gmra.mrb[20].mxu0 %vm406_vm1, %v13055_v36 }
 0x1c3   : > { %2125 = vmatprep.mubr.bf16.mxu0 %v12797_v2 }
 0x1c4   : > { %10497 = vmatmul.mubr.msk.bf16.gmra.mrb[12].mxu1 %vm406_vm1, %v12933_v41 }
 0x1c5   : > { %10500 = vmatprep.mubr.msk.bf16.mxu1 %vm406_vm1, %v12940_v44 }
 0x1ca   : > { %9379 = vmatmul.mubr.msk.bf16.gmra.mrb[24].mxu0 %vm406_vm1, %v13062_v40 }
 0x1cb   : > { %2135 = vmatprep.mubr.bf16.mxu0 %v12797_v2 }
 0x1cc   : > { %10501 = vmatmul.mubr.msk.bf16.gmra.mrb[16].mxu1 %vm406_vm1, %v12947_v47 }
 0x1cd   : > { %10504 = vmatprep.mubr.msk.bf16.mxu1 %vm406_vm1, %v12954_v50 }
 0x1d2   : > { %9380 = vmatmul.mubr.msk.bf16.gmra.mrb[28].mxu0 %vm406_vm1, %v13069_v45 }
 0x1d3   : > { %2145 = vmatprep.mubr.bf16.mxu0 %v12797_v2 }
 0x1d4   : > { %10505 = vmatmul.mubr.msk.bf16.gmra.mrb[20].mxu1 %vm406_vm1, %v12961_v53 }
 0x1d5   : > { %10508 = vmatprep.mubr.msk.bf16.mxu1 %vm406_vm1, %v12968_v56 }
 0x1da   : > { %9381 = vmatmul.mubr.msk.bf16.gmra.mrb[32].mxu0 %vm406_vm1, %v13076_v49 }
 0x1db   : > { %2155 = vmatprep.mubr.bf16.mxu0 %v12797_v2 }
 0x1dc   : > { %10509 = vmatmul.mubr.msk.bf16.gmra.mrb[24].mxu1 %vm406_vm1, %v12975_v59 }
 0x1dd   : > { %10512 = vmatprep.mubr.msk.bf16.mxu1 %vm406_vm1, %v12982_v62 }
 0x1e2   : > { %9382 = vmatmul.mubr.msk.bf16.gmra.mrb[36].mxu0 %vm406_vm1, %v13083_v54 }
 0x1e3   : > { %2165 = vmatprep.mubr.bf16.mxu0 %v12797_v2 }
 0x1e4   : > { %10513 = vmatmul.mubr.msk.bf16.gmra.mrb[28].mxu1 %vm406_vm1, %v12989_v1 }
 0x1e5   : > { %10522 = vmatprep.mubr.msk.bf16.mxu1 %vm406_vm1, %v12996_v5  ;;  %v12413_v5 = vld [vmem:[%s15080_s2 + $0x184] ss:$12 sps:$4 sm:$0xff]  }
 0x1ea   : > { %9383 = vmatmul.mubr.msk.bf16.gmra.mrb[40].mxu0 %vm406_vm1, %v13090_v58 }
 0x1eb   : > { %2175 = vmatprep.mubr.bf16.mxu0 %v12797_v2 }
 0x1f2   : > { %9384 = vmatmul.mubr.msk.bf16.gmra.mrb[44].mxu0 %vm406_vm1, %v13097_v63 }
 0x1f3   : > { %2185 = vmatprep.mubr.bf16.mxu0 %v12797_v2 }
 0x1fa   : > { %9385 = vmatmul.mubr.msk.bf16.gmra.mrb[48].mxu0 %vm406_vm1, %v13104_v4 }
 0x1fb   : > { %2195 = vmatprep.mubr.bf16.mxu0 %v12797_v2 }
 0x202   : > { %9386 = vmatmul.mubr.msk.bf16.gmra.mrb[52].mxu0 %vm406_vm1, %v13111_v8 }
 0x203   : > { %2205 = vmatprep.mubr.bf16.mxu0 %v12797_v2 }
 0x20a   : > { %9387 = vmatmul.mubr.msk.bf16.gmra.mrb[56].mxu0 %vm406_vm1, %v13118_v11 }
 0x20b   : > { %2215 = vmatprep.mubr.bf16.mxu0 %v12797_v2 }
 0x212   : > { %9388 = vmatmul.mubr.msk.bf16.gmra.mrb[60].mxu0 %vm406_vm1, %v13316_v46 }
 0x213   : > { %2671 = vmatprep.mubr.bf16.mxu0 %v12797_v2 }
 0x21a   : > { %9457 = vmatmul.mubr.msk.bf16.vlgmr.msra.gmra.mrb[0].mxu0 %vm406_vm1, %v12886_v21 }
 0x21b   : > { %3246 = vmatpush1.bf16.msra.mxu0 %v12400_v51  ;;  %2681 = vmatprep.mubr.bf16.mxu0 %v12797_v2  ;;  %v9436_v51 = vld [vmem:[%s12860_s9 + $0x189] sm:$0xff] }
 0x21c   : > { %3247 = vmatprep.subr.bf16.mxu0 %v12405_v57  ;;  %v13430_v57 = vpack.c.bf16 %v9436_v51, %v9435_v39  ;;  %v1424_v39 = vsel %vm455_vm0, %v12430_v37, 0  ;;  %v12434_v51 = vld [vmem:[%s15080_s2 + $0xd4] ss:$12 sps:$4 sm:$0xff]  }
 0x21f   : > { %3248 = vmatpush1.bf16.msra.mxu0 %v12403_v3  ;;  %v914_v3 = vsel %vm455_vm0, %v12421_v60, 0  ;;  %v9519_v60 = vld [vmem:[%s12860_s9 + $0x182] sm:$0xff] }
 0x220   : > { %9540 = vmatprep.subr.msk.bf16.mxu0 %vm455_vm0, %v9538_v7  ;;  %10521 = vmatpush3.bf16.msra.mxu1 %v914_v3  ;;  %v12408_v7 = vld [vmem:[%s15080_s2 + $0x168] ss:$12 sps:$4 sm:$0xff]  }
 0x221   : > { %10554 = vmatprep.subr.bf16.mxu1 %v12428_v28  ;;  %v9520_v3 = vld [vmem:[%s12860_s9 + $0x18a] sm:$0xff] }
 0x222   : > { %9458 = vmatmul.mubr.msk.bf16.gmra.mrb[4].mxu0 %vm406_vm1, %v12898_v26 }
 0x223   : > { %2691 = vmatprep.mubr.bf16.mxu0 %v12797_v2  ;;  %3250 = vmatpush1.bf16.msra.mxu0 %v3237_v13  ;;  %v12411_v13 = vld [vmem:[%s15080_s2 + $0x180] ss:$12 sps:$4 sm:$0xff]  }
 0x224   : > { %3852 = vmatprep.subr.bf16.mxu0 %v12410_v17  ;;  %10523 = vmatmul.mubr.msk.bf16.vlgmr.msra.gmra.mrb[0].mxu1 %vm406_vm1, %v13015_v14  ;;  %v9622_v17 = vcombine.high %v9613_v12, %v9613_v12  ;;  %v9573_v12 = vld [vmem:[%s12860_s9 + $0x30] sm:$0xff] }
 0x225   : > { %10526 = vmatprep.mubr.msk.bf16.mxu1 %vm406_vm1, %v13027_v19  ;;  %10555 = vmatpush3.bf16.msra.mxu1 %v12428_v28  ;;  %v9575_v28 = vld [vmem:[%s12860_s9 + $0x48] sm:$0xff] }
 0x226   : > { %10556 = vmatprep.subr.bf16.mxu1 %v12429_v33 }
 0x229   : > { %10557 = vmatpush3.bf16.msra.mxu1 %v12429_v33  ;;  %v9576_v33 = vld [vmem:[%s12860_s9 + $0x50] sm:$0xff] }
 0x22a   : > { %9459 = vmatmul.mubr.msk.bf16.gmra.mrb[8].mxu0 %vm406_vm1, %v12905_v29  ;;  %12342 = vmatprep.subr.msk.bf16.mxu1 %vm455_vm0, %v12430_v37 }
 0x22b   : > { %2701 = vmatprep.mubr.bf16.mxu0 %v12797_v2 }
 0x22c   : > { %10527 = vmatmul.mubr.msk.bf16.gmra.mrb[4].mxu1 %vm406_vm1, %v13034_v23 }
 0x22d   : > { %10530 = vmatprep.mubr.msk.bf16.mxu1 %vm406_vm1, %v13041_v27  ;;  %10559 = vmatpush3.bf16.msra.mxu1 %v1424_v39 }
 0x232   : > { %9460 = vmatmul.mubr.msk.bf16.gmra.mrb[12].mxu0 %vm406_vm1, %v12912_v32 }
 0x233   : > { %2711 = vmatprep.mubr.bf16.mxu0 %v12797_v2 }
 0x234   : > { %10531 = vmatmul.mubr.msk.bf16.gmra.mrb[8].mxu1 %vm406_vm1, %v13048_v31 }
 0x235   : > { %10534 = vmatprep.mubr.msk.bf16.mxu1 %vm406_vm1, %v13055_v36 }
 0x23a   : > { %9461 = vmatmul.mubr.msk.bf16.gmra.mrb[16].mxu0 %vm406_vm1, %v12919_v35 }
 0x23b   : > { %2721 = vmatprep.mubr.bf16.mxu0 %v12797_v2 }
 0x23c   : > { %10535 = vmatmul.mubr.msk.bf16.gmra.mrb[12].mxu1 %vm406_vm1, %v13062_v40 }
 0x23d   : > { %10538 = vmatprep.mubr.msk.bf16.mxu1 %vm406_vm1, %v13069_v45 }
 0x242   : > { %9462 = vmatmul.mubr.msk.bf16.gmra.mrb[20].mxu0 %vm406_vm1, %v12926_v38 }
 0x243   : > { %2731 = vmatprep.mubr.bf16.mxu0 %v12797_v2 }
 0x244   : > { %10539 = vmatmul.mubr.msk.bf16.gmra.mrb[16].mxu1 %vm406_vm1, %v13076_v49 }
 0x245   : > { %10542 = vmatprep.mubr.msk.bf16.mxu1 %vm406_vm1, %v13083_v54 }
 0x24a   : > { %9463 = vmatmul.mubr.msk.bf16.gmra.mrb[24].mxu0 %vm406_vm1, %v12933_v41 }
 0x24b   : > { %2741 = vmatprep.mubr.bf16.mxu0 %v12797_v2 }
 0x24c   : > { %10543 = vmatmul.mubr.msk.bf16.gmra.mrb[20].mxu1 %vm406_vm1, %v13090_v58 }
 0x24d   : > { %10546 = vmatprep.mubr.msk.bf16.mxu1 %vm406_vm1, %v13097_v63 }
 0x252   : > { %9464 = vmatmul.mubr.msk.bf16.gmra.mrb[28].mxu0 %vm406_vm1, %v12940_v44 }
 0x253   : > { %2751 = vmatprep.mubr.bf16.mxu0 %v12797_v2 }
 0x254   : > { %10547 = vmatmul.mubr.msk.bf16.gmra.mrb[24].mxu1 %vm406_vm1, %v13104_v4 }
 0x255   : > { %10550 = vmatprep.mubr.msk.bf16.mxu1 %vm406_vm1, %v13111_v8 }
 0x25a   : > { %9465 = vmatmul.mubr.msk.bf16.gmra.mrb[32].mxu0 %vm406_vm1, %v12947_v47 }
 0x25b   : > { %2761 = vmatprep.mubr.bf16.mxu0 %v12797_v2 }
 0x25c   : > { %10551 = vmatmul.mubr.msk.bf16.gmra.mrb[28].mxu1 %vm406_vm1, %v13118_v11 }
 0x25d   : > { %10560 = vmatprep.mubr.msk.bf16.mxu1 %vm406_vm1, %v13125_v15  ;;  %v12433_v15 = vld [vmem:[%s15080_s2 + $0xbc] ss:$12 sps:$4 sm:$0xff]  }
 0x25e   : > { %10592 = vmatprep.subr.bf16.mxu1 %v12433_v15 }
 0x262   : > { %9466 = vmatmul.mubr.msk.bf16.gmra.mrb[36].mxu0 %vm406_vm1, %v12954_v50 }
 0x263   : > { %2771 = vmatprep.mubr.bf16.mxu0 %v12797_v2 }
 0x264   : > { %10561 = vmatmul.mubr.msk.bf16.vlgmr.msra.gmra.mrb[0].mxu1 %vm406_vm1, %v13144_v30 }
 0x265   : > { %10564 = vmatprep.mubr.msk.bf16.mxu1 %vm406_vm1, %v13156_v42  ;;  %10593 = vmatpush3.bf16.msra.mxu1 %v12433_v15  ;;  %v13624_v15 = vpack.c.bf16 %v9576_v33, %v9575_v28  ;;  %v9589_v28 = vld [vmem:[%s12860_s9 + $0xf0] sm:$0xff]  ;;  %v9590_v33 = vld [vmem:[%s12860_s9 + $0xf8] sm:$0xff] }
 0x266   : > { %10594 = vmatprep.subr.bf16.mxu1 %v12434_v51 }
 0x269   : > { %10595 = vmatpush3.bf16.msra.mxu1 %v12434_v51  ;;  %v12438_v51 = vld [vmem:[%s15080_s2 + $0x1e4] ss:$12 sps:$4 sm:$0xff]  }
 0x26a   : > { %9467 = vmatmul.mubr.msk.bf16.gmra.mrb[40].mxu0 %vm406_vm1, %v12961_v53 }
 0x26b   : > { %2781 = vmatprep.mubr.bf16.mxu0 %v12797_v2 }
 0x26c   : > { %10565 = vmatmul.mubr.msk.bf16.gmra.mrb[4].mxu1 %vm406_vm1, %v13163_v48 }
 0x26d   : > { %10568 = vmatprep.mubr.msk.bf16.mxu1 %vm406_vm1, %v13170_v55 }
 0x272   : > { %9468 = vmatmul.mubr.msk.bf16.gmra.mrb[44].mxu0 %vm406_vm1, %v12968_v56 }
 0x273   : > { %2791 = vmatprep.mubr.bf16.mxu0 %v12797_v2 }
 0x274   : > { %10569 = vmatmul.mubr.msk.bf16.gmra.mrb[8].mxu1 %vm406_vm1, %v13177_v61 }
 0x275   : > { %10572 = vmatprep.mubr.msk.bf16.mxu1 %vm406_vm1, %v13184_v6 }
 0x27a   : > { %9469 = vmatmul.mubr.msk.bf16.gmra.mrb[48].mxu0 %vm406_vm1, %v12975_v59 }
 0x27b   : > { %2801 = vmatprep.mubr.bf16.mxu0 %v12797_v2 }
 0x27c   : > { %10573 = vmatmul.mubr.msk.bf16.gmra.mrb[12].mxu1 %vm406_vm1, %v13191_v10 }
 0x27d   : > { %10576 = vmatprep.mubr.msk.bf16.mxu1 %vm406_vm1, %v13198_v16 }
 0x282   : > { %9470 = vmatmul.mubr.msk.bf16.gmra.mrb[52].mxu0 %vm406_vm1, %v12982_v62 }
 0x283   : > { %2811 = vmatprep.mubr.bf16.mxu0 %v12797_v2 }
 0x284   : > { %10577 = vmatmul.mubr.msk.bf16.gmra.mrb[16].mxu1 %vm406_vm1, %v13205_v20 }
 0x285   : > { %10580 = vmatprep.mubr.msk.bf16.mxu1 %vm406_vm1, %v13212_v25 }
 0x28a   : > { %9471 = vmatmul.mubr.msk.bf16.gmra.mrb[56].mxu0 %vm406_vm1, %v12989_v1 }
 0x28b   : > { %2821 = vmatprep.mubr.bf16.mxu0 %v12797_v2 }
 0x28c   : > { %10581 = vmatmul.mubr.msk.bf16.gmra.mrb[20].mxu1 %vm406_vm1, %v13219_v34 }
 0x28d   : > { %10584 = vmatprep.mubr.msk.bf16.mxu1 %vm406_vm1, %v13226_v43 }
 0x292   : > { %9472 = vmatmul.mubr.msk.bf16.gmra.mrb[60].mxu0 %vm406_vm1, %v13430_v57 }
 0x293   : > { %3277 = vmatprep.mubr.bf16.mxu0 %v12797_v2 }
 0x294   : > { %10585 = vmatmul.mubr.msk.bf16.gmra.mrb[24].mxu1 %vm406_vm1, %v13233_v52 }
 0x295   : > { %10588 = vmatprep.mubr.msk.bf16.mxu1 %vm406_vm1, %v13240_v0 }
 0x29a   : > { %9541 = vmatmul.mubr.msk.bf16.vlgmr.msra.gmra.mrb[0].mxu0 %vm406_vm1, %v13144_v30 }
 0x29b   : > { %3853 = vmatpush1.bf16.msra.mxu0 %v12408_v7  ;;  %3287 = vmatprep.mubr.bf16.mxu0 %v12797_v2  ;;  %v13585_v7 = vpack.c.bf16 %v9520_v3, %v9519_v60  ;;  %v9577_v60 = vld [vmem:[%s12860_s9 + $0x60] sm:$0xff]  ;;  %v9578_v3 = vld [vmem:[%s12860_s9 + $0x68] sm:$0xff] }
 0x29c   : > { %3854 = vmatprep.subr.bf16.mxu0 %v12413_v5  ;;  %10589 = vmatmul.mubr.msk.bf16.gmra.mrb[28].mxu1 %vm406_vm1, %v13247_v9  ;;  %v12435_v5 = vld [vmem:[%s15080_s2 + $0xec] ss:$0 sps:$4 sm:$0x33]  }
 0x29d   : > { %10598 = vmatprep.mubr.msk.bf16.mxu1 %vm406_vm1, %v13015_v14  ;;  %12343 = vmatprep.subr.msk.bf16.mxu1 %vm455_vm0, %v12435_v5  ;;  %v12422_v14 = vld [vmem:[%s15080_s2 + $0x1a4] ss:$12 sps:$4 sm:$0xff]  }
 0x29f   : > { %3855 = vmatpush1.bf16.msra.mxu0 %v12411_v13  ;;  %v9574_v13 = vld [vmem:[%s12860_s9 + $0x38] sm:$0xff] }
 0x2a0   : > { %9624 = vmatprep.subr.msk.bf16.mxu0 %vm455_vm0, %v9622_v17  ;;  %v2031_v17 = vsel %vm455_vm0, %v12435_v5, 0  ;;  %v13601_v18 = vpack.c.bf16 %v9574_v13, %v9573_v12  ;;  %v13640_v5 = vpack.c.bf16 %v9578_v3, %v9577_v60 }
 0x2a1   : > { %10597 = vmatpush3.bf16.msra.mxu1 %v2031_v17 }
 0x2a2   : > { %9542 = vmatmul.mubr.msk.bf16.gmra.mrb[4].mxu0 %vm406_vm1, %v13156_v42 }
 0x2a3   : > { %3297 = vmatprep.mubr.bf16.mxu0 %v12797_v2  ;;  %3857 = vmatpush1.bf16.msra.mxu0 %v3844_v22  ;;  %v12427_v22 = vld [vmem:[%s15080_s2 + $0x1c0] ss:$12 sps:$4 sm:$0xff]  }
 0x2a4   : > { %4458 = vmatprep.subr.bf16.mxu0 %v12424_v24  ;;  %10599 = vmatmul.mubr.msk.bf16.vlgmr.msra.gmra.mrb[0].mxu1 %vm406_vm1, %v13027_v19  ;;  %v9697_v24 = vld [vmem:[%s15080_s2 + $0x1d4] sm:$0x33]  ;;  %v12425_v19 = vld [vmem:[%s15080_s2 + $0x1bc] ss:$12 sps:$4 sm:$0xff]  }
 0x2a5   : > { %10602 = vmatprep.mubr.msk.bf16.mxu1 %vm406_vm1, %v13034_v23  ;;  %v9706_v37 = vcombine.high %v9697_v24, %v9697_v24  ;;  %v9705_v39 = vcombine.low %v9697_v24, %v9697_v24  ;;  %v12444_v24 = vld [vmem:[%s15080_s2 + $0x128] ss:$0 sps:$4 sm:$0x33]  }
 0x2a7   : > { %v4450_v23 = vsel %vm455_vm0, %v9705_v39, 0  ;;  %v9592_v39 = vld [vmem:[%s12860_s9 + $0x110] sm:$0xff] }
 0x2aa   : > { %9543 = vmatmul.mubr.msk.bf16.gmra.mrb[8].mxu0 %vm406_vm1, %v13163_v48 }
 0x2ab   : > { %3307 = vmatprep.mubr.bf16.mxu0 %v12797_v2 }
 0x2ac   : > { %10603 = vmatmul.mubr.msk.bf16.gmra.mrb[4].mxu1 %vm406_vm1, %v13041_v27  ;;  %v9579_v27 = vld [vmem:[%s12860_s9 + $0x78] sm:$0xff] }
 0x2ad   : > { %10606 = vmatprep.mubr.msk.bf16.mxu1 %vm406_vm1, %v13048_v31  ;;  %v9580_v31 = vld [vmem:[%s12860_s9 + $0x80] sm:$0xff] }
 0x2ae   : > { %v13651_v12 = vpack.c.bf16 %v9580_v31, %v9579_v27  ;;  %v9657_v31 = vld [vmem:[%s12860_s9 + $0x31] sm:$0xff] }
 0x2b2   : > { %9544 = vmatmul.mubr.msk.bf16.gmra.mrb[12].mxu0 %vm406_vm1, %v13170_v55 }
 0x2b3   : > { %3317 = vmatprep.mubr.bf16.mxu0 %v12797_v2 }
 0x2b4   : > { %10607 = vmatmul.mubr.msk.bf16.gmra.mrb[8].mxu1 %vm406_vm1, %v13055_v36  ;;  %v9581_v36 = vld [vmem:[%s12860_s9 + $0x90] sm:$0xff] }
 0x2b5   : > { %10610 = vmatprep.mubr.msk.bf16.mxu1 %vm406_vm1, %v13062_v40  ;;  %v9582_v40 = vld [vmem:[%s12860_s9 + $0x98] sm:$0xff] }
 0x2b6   : > { %v13662_v13 = vpack.c.bf16 %v9582_v40, %v9581_v36  ;;  %v9658_v36 = vld [vmem:[%s12860_s9 + $0x39] sm:$0xff] }
 0x2ba   : > { %9545 = vmatmul.mubr.msk.bf16.gmra.mrb[16].mxu0 %vm406_vm1, %v13177_v61 }
 0x2bb   : > { %3327 = vmatprep.mubr.bf16.mxu0 %v12797_v2 }
 0x2bc   : > { %10611 = vmatmul.mubr.msk.bf16.gmra.mrb[12].mxu1 %vm406_vm1, %v13069_v45  ;;  %v9583_v45 = vld [vmem:[%s12860_s9 + $0xa8] sm:$0xff] }
 0x2bd   : > { %10614 = vmatprep.mubr.msk.bf16.mxu1 %vm406_vm1, %v13076_v49  ;;  %v9584_v49 = vld [vmem:[%s12860_s9 + $0xb0] sm:$0xff] }
 0x2be   : > { %v13673_v17 = vpack.c.bf16 %v9584_v49, %v9583_v45  ;;  %v13812_v45 = vpack.c.bf16 %v9658_v36, %v9657_v31  ;;  %v12441_v49 = vld [vmem:[%s15080_s2 + $0x1fc] ss:$12 sps:$4 sm:$0xff]   ;;  %v9741_v36 = vld [vmem:[%s12860_s9 + $0x32] sm:$0xff] }
 0x2bf   : > { %v12456_v31 = vld [vmem:[%s15080_s2 + $0x1e8] ss:$12 sps:$4 sm:$0xff]  }
 0x2c2   : > { %9546 = vmatmul.mubr.msk.bf16.gmra.mrb[20].mxu0 %vm406_vm1, %v13184_v6 }
 0x2c3   : > { %3337 = vmatprep.mubr.bf16.mxu0 %v12797_v2 }
 0x2c4   : > { %10615 = vmatmul.mubr.msk.bf16.gmra.mrb[16].mxu1 %vm406_vm1, %v13083_v54  ;;  %v9585_v54 = vld [vmem:[%s12860_s9 + $0xc0] sm:$0xff] }
 0x2c5   : > { %10618 = vmatprep.mubr.msk.bf16.mxu1 %vm406_vm1, %v13090_v58  ;;  %v9586_v58 = vld [vmem:[%s12860_s9 + $0xc8] sm:$0xff] }
 0x2ca   : > { %9547 = vmatmul.mubr.msk.bf16.gmra.mrb[24].mxu0 %vm406_vm1, %v13191_v10 }
 0x2cb   : > { %3347 = vmatprep.mubr.bf16.mxu0 %v12797_v2 }
 0x2cc   : > { %10619 = vmatmul.mubr.msk.bf16.gmra.mrb[20].mxu1 %vm406_vm1, %v13097_v63  ;;  %v12442_v63 = vld [vmem:[%s15080_s2 + $0xf8] ss:$12 sps:$4 sm:$0xff]  }
 0x2cd   : > { %10622 = vmatprep.mubr.msk.bf16.mxu1 %vm406_vm1, %v13104_v4  ;;  %v12443_v4 = vld [vmem:[%s15080_s2 + $0x110] ss:$12 sps:$4 sm:$0xff]   ;;  %10630 = vmatprep.subr.bf16.mxu1 %v12442_v63 }
 0x2ce   : > { %10631 = vmatpush3.bf16.msra.mxu1 %v12442_v63  ;;  %v9660_v63 = vld [vmem:[%s12860_s9 + $0x51] sm:$0xff] }
 0x2cf   : > { %10632 = vmatprep.subr.bf16.mxu1 %v12443_v4 }
 0x2d2   : > { %9548 = vmatmul.mubr.msk.bf16.gmra.mrb[28].mxu0 %vm406_vm1, %v13198_v16  ;;  %10633 = vmatpush3.bf16.msra.mxu1 %v12443_v4 }
 0x2d3   : > { %3357 = vmatprep.mubr.bf16.mxu0 %v12797_v2  ;;  %12344 = vmatprep.subr.msk.bf16.mxu1 %vm455_vm0, %v12444_v24 }
 0x2d4   : > { %10623 = vmatmul.mubr.msk.bf16.gmra.mrb[24].mxu1 %vm406_vm1, %v13111_v8  ;;  %v9588_v8 = vld [vmem:[%s12860_s9 + $0xe0] sm:$0xff] }
 0x2d5   : > { %10626 = vmatprep.mubr.msk.bf16.mxu1 %vm406_vm1, %v13118_v11 }
 0x2da   : > { %9549 = vmatmul.mubr.msk.bf16.gmra.mrb[32].mxu0 %vm406_vm1, %v13205_v20 }
 0x2db   : > { %3367 = vmatprep.mubr.bf16.mxu0 %v12797_v2 }
 0x2dc   : > { %10627 = vmatmul.mubr.msk.bf16.gmra.mrb[28].mxu1 %vm406_vm1, %v13316_v46 }
 0x2dd   : > { %10636 = vmatprep.mubr.msk.bf16.mxu1 %vm406_vm1, %v12886_v21  ;;  %v9591_v21 = vld [vmem:[%s12860_s9 + $0x108] sm:$0xff] }
 0x2e2   : > { %9550 = vmatmul.mubr.msk.bf16.gmra.mrb[36].mxu0 %vm406_vm1, %v13212_v25 }
 0x2e3   : > { %3377 = vmatprep.mubr.bf16.mxu0 %v12797_v2 }
 0x2ea   : > { %9551 = vmatmul.mubr.msk.bf16.gmra.mrb[40].mxu0 %vm406_vm1, %v13219_v34 }
 0x2eb   : > { %3387 = vmatprep.mubr.bf16.mxu0 %v12797_v2 }
 0x2f2   : > { %9552 = vmatmul.mubr.msk.bf16.gmra.mrb[44].mxu0 %vm406_vm1, %v13226_v43 }
 0x2f3   : > { %3397 = vmatprep.mubr.bf16.mxu0 %v12797_v2 }
 0x2fa   : > { %9553 = vmatmul.mubr.msk.bf16.gmra.mrb[48].mxu0 %vm406_vm1, %v13233_v52 }
 0x2fb   : > { %3407 = vmatprep.mubr.bf16.mxu0 %v12797_v2 }
 0x302   : > { %9554 = vmatmul.mubr.msk.bf16.gmra.mrb[52].mxu0 %vm406_vm1, %v13240_v0 }
 0x303   : > { %3417 = vmatprep.mubr.bf16.mxu0 %v12797_v2 }
 0x30a   : > { %9555 = vmatmul.mubr.msk.bf16.gmra.mrb[56].mxu0 %vm406_vm1, %v13247_v9 }
 0x30b   : > { %3427 = vmatprep.mubr.bf16.mxu0 %v12797_v2 }
 0x312   : > { %9556 = vmatmul.mubr.msk.bf16.gmra.mrb[60].mxu0 %vm406_vm1, %v13585_v7 }
 0x313   : > { %3884 = vmatprep.mubr.bf16.mxu0 %v12797_v2 }
 0x31a   : > { %9625 = vmatmul.mubr.msk.bf16.vlgmr.msra.gmra.mrb[0].mxu0 %vm406_vm1, %v13601_v18 }
 0x31b   : > { %4459 = vmatpush1.bf16.msra.mxu0 %v12422_v14  ;;  %3894 = vmatprep.mubr.bf16.mxu0 %v12797_v2  ;;  %v13684_v14 = vpack.c.bf16 %v9586_v58, %v9585_v54  ;;  %v9781_v54 = vld [vmem:[%s15080_s2 + $0x210] sm:$0x33] }
 0x31c   : > { %4460 = vmatprep.subr.bf16.mxu0 %v12427_v22  ;;  %v9587_v22 = vld [vmem:[%s12860_s9 + $0xd8] sm:$0xff]  ;;  %v9659_v58 = vld [vmem:[%s12860_s9 + $0x49] sm:$0xff]  ;;  %v9790_v4 = vcombine.high %v9781_v54, %v9781_v54 }
 0x31d   : > { %v13701_v11 = vpack.c.bf16 %v9588_v8, %v9587_v22  ;;  %v9789_v22 = vcombine.low %v9781_v54, %v9781_v54  ;;  %v13835_v8 = vpack.c.bf16 %v9660_v63, %v9659_v58  ;;  %v9743_v54 = vld [vmem:[%s12860_s9 + $0x4a] sm:$0xff]  ;;  %v9744_v58 = vld [vmem:[%s12860_s9 + $0x52] sm:$0xff] }
 0x31e   : > { %v4941_v63 = vpack.c.bf16 %v9744_v58, %v9743_v54 }
 0x31f   : > { %4461 = vmatpush1.bf16.msra.mxu0 %v12425_v19  ;;  %v2637_v19 = vsel %vm455_vm0, %v12444_v24, 0  ;;  %v9661_v24 = vld [vmem:[%s12860_s9 + $0x61] sm:$0xff] }
 0x320   : > { %9708 = vmatprep.subr.msk.bf16.mxu0 %vm455_vm0, %v9706_v37  ;;  %10635 = vmatpush3.bf16.msra.mxu1 %v2637_v19  ;;  %v13717_v37 = vpack.c.bf16 %v9590_v33, %v9589_v28  ;;  %v9662_v28 = vld [vmem:[%s12860_s9 + $0x69] sm:$0xff] }
 0x321   : > { %v13848_v33 = vpack.c.bf16 %v9662_v28, %v9661_v24  ;;  %v9748_v24 = vld [vmem:[%s12860_s9 + $0x82] sm:$0xff] }
 0x322   : > { %9626 = vmatmul.mubr.msk.bf16.gmra.mrb[4].mxu0 %vm406_vm1, %v13624_v15 }
 0x323   : > { %3904 = vmatprep.mubr.bf16.mxu0 %v12797_v2  ;;  %4463 = vmatpush1.bf16.msra.mxu0 %v4450_v23  ;;  %v13728_v23 = vpack.c.bf16 %v9592_v39, %v9591_v21 }
 0x324   : > { %5064 = vmatprep.subr.bf16.mxu0 %v12438_v51  ;;  %10637 = vmatmul.mubr.msk.bf16.vlgmr.msra.gmra.mrb[0].mxu1 %vm406_vm1, %v12898_v26  ;;  %v9593_v26 = vld [vmem:[%s12860_s9 + $0x120] sm:$0xff] }
 0x325   : > { %10640 = vmatprep.mubr.msk.bf16.mxu1 %vm406_vm1, %v12905_v29  ;;  %v9594_v29 = vld [vmem:[%s12860_s9 + $0x128] sm:$0xff] }
 0x326   : > { %v13739_v51 = vpack.c.bf16 %v9594_v29, %v9593_v26  ;;  %v9671_v29 = vld [vmem:[%s12860_s9 + $0xd9] sm:$0xff] }
 0x32a   : > { %9627 = vmatmul.mubr.msk.bf16.gmra.mrb[8].mxu0 %vm406_vm1, %v13640_v5 }
 0x32b   : > { %3914 = vmatprep.mubr.bf16.mxu0 %v12797_v2 }
 0x32c   : > { %10641 = vmatmul.mubr.msk.bf16.gmra.mrb[4].mxu1 %vm406_vm1, %v12912_v32  ;;  %v9595_v32 = vld [vmem:[%s12860_s9 + $0x138] sm:$0xff] }
 0x32d   : > { %10644 = vmatprep.mubr.msk.bf16.mxu1 %vm406_vm1, %v12919_v35  ;;  %v9596_v35 = vld [vmem:[%s12860_s9 + $0x140] sm:$0xff] }
 0x32e   : > { %v13750_v60 = vpack.c.bf16 %v9596_v35, %v9595_v32  ;;  %v12452_v32 = vld [vmem:[%s15080_s2 + $0x1a0] ss:$0 sps:$4 sm:$0x33]   ;;  %v9673_v35 = vld [vmem:[%s12860_s9 + $0xf1] sm:$0xff] }
 0x332   : > { %9628 = vmatmul.mubr.msk.bf16.gmra.mrb[12].mxu0 %vm406_vm1, %v13651_v12 }
 0x333   : > { %3924 = vmatprep.mubr.bf16.mxu0 %v12797_v2 }
 0x334   : > { %10645 = vmatmul.mubr.msk.bf16.gmra.mrb[8].mxu1 %vm406_vm1, %v12926_v38  ;;  %v9597_v38 = vld [vmem:[%s12860_s9 + $0x150] sm:$0xff] }
 0x335   : > { %10648 = vmatprep.mubr.msk.bf16.mxu1 %vm406_vm1, %v12933_v41  ;;  %v9598_v41 = vld [vmem:[%s12860_s9 + $0x158] sm:$0xff] }
 0x336   : > { %v13761_v3 = vpack.c.bf16 %v9598_v41, %v9597_v38  ;;  %v9674_v38 = vld [vmem:[%s12860_s9 + $0xf9] sm:$0xff]  ;;  %v3850_v41 = vsel %vm455_vm0, %v12452_v32, 0 }
 0x33a   : > { %9629 = vmatmul.mubr.msk.bf16.gmra.mrb[16].mxu0 %vm406_vm1, %v13662_v13 }
 0x33b   : > { %3934 = vmatprep.mubr.bf16.mxu0 %v12797_v2 }
 0x33c   : > { %10649 = vmatmul.mubr.msk.bf16.gmra.mrb[12].mxu1 %vm406_vm1, %v12940_v44  ;;  %v9599_v44 = vld [vmem:[%s12860_s9 + $0x168] sm:$0xff] }
 0x33d   : > { %10652 = vmatprep.mubr.msk.bf16.mxu1 %vm406_vm1, %v12947_v47  ;;  %v9600_v47 = vld [vmem:[%s12860_s9 + $0x170] sm:$0xff] }
 0x33e   : > { %v13772_v27 = vpack.c.bf16 %v9600_v47, %v9599_v44  ;;  %v13925_v44 = vpack.c.bf16 %v9674_v38, %v9673_v35  ;;  %v9676_v47 = vld [vmem:[%s12860_s9 + $0x111] sm:$0xff]  ;;  %v9763_v38 = vld [vmem:[%s12860_s9 + $0x13a] sm:$0xff] }
 0x342   : > { %9630 = vmatmul.mubr.msk.bf16.gmra.mrb[20].mxu0 %vm406_vm1, %v13673_v17 }
 0x343   : > { %3944 = vmatprep.mubr.bf16.mxu0 %v12797_v2 }
 0x344   : > { %10653 = vmatmul.mubr.msk.bf16.gmra.mrb[16].mxu1 %vm406_vm1, %v12954_v50  ;;  %v12447_v50 = vld [vmem:[%s15080_s2 + $0x134] ss:$12 sps:$4 sm:$0xff]  }
 0x345   : > { %10656 = vmatprep.mubr.msk.bf16.mxu1 %vm406_vm1, %v12961_v53  ;;  %v12448_v53 = vld [vmem:[%s15080_s2 + $0x14c] ss:$12 sps:$4 sm:$0xff]   ;;  %10668 = vmatprep.subr.bf16.mxu1 %v12447_v50 }
 0x346   : > { %10669 = vmatpush3.bf16.msra.mxu1 %v12447_v50 }
 0x347   : > { %10670 = vmatprep.subr.bf16.mxu1 %v12448_v53 }
 0x34a   : > { %9631 = vmatmul.mubr.msk.bf16.gmra.mrb[24].mxu0 %vm406_vm1, %v13684_v14  ;;  %10671 = vmatpush3.bf16.msra.mxu1 %v12448_v53 }
 0x34b   : > { %3954 = vmatprep.mubr.bf16.mxu0 %v12797_v2 }
 0x34c   : > { %10657 = vmatmul.mubr.msk.bf16.gmra.mrb[20].mxu1 %vm406_vm1, %v12968_v56  ;;  %v9603_v56 = vld [vmem:[%s12860_s9 + $0x198] sm:$0xff] }
 0x34d   : > { %10660 = vmatprep.mubr.msk.bf16.mxu1 %vm406_vm1, %v12975_v59  ;;  %v9604_v59 = vld [vmem:[%s12860_s9 + $0x1a0] sm:$0xff] }
 0x352   : > { %9632 = vmatmul.mubr.msk.bf16.gmra.mrb[28].mxu0 %vm406_vm1, %v13701_v11 }
 0x353   : > { %3964 = vmatprep.mubr.bf16.mxu0 %v12797_v2 }
 0x354   : > { %10661 = vmatmul.mubr.msk.bf16.gmra.mrb[24].mxu1 %vm406_vm1, %v12982_v62  ;;  %v13796_v62 = vpack.c.bf16 %v9604_v59, %v9603_v56 }
 0x355   : > { %10664 = vmatprep.mubr.msk.bf16.mxu1 %vm406_vm1, %v12989_v1  ;;  %v12449_v1 = vld [vmem:[%s15080_s2 + $0x164] ss:$0 sps:$4 sm:$0x33]  }
 0x356   : > { %12345 = vmatprep.subr.msk.bf16.mxu1 %vm455_vm0, %v12449_v1  ;;  %v3243_v40 = vsel %vm455_vm0, %v12449_v1, 0 }
 0x357   : > { %10673 = vmatpush3.bf16.msra.mxu1 %v3243_v40 }
 0x35a   : > { %9633 = vmatmul.mubr.msk.bf16.gmra.mrb[32].mxu0 %vm406_vm1, %v13717_v37 }
 0x35b   : > { %3974 = vmatprep.mubr.bf16.mxu0 %v12797_v2 }
 0x35c   : > { %10665 = vmatmul.mubr.msk.bf16.gmra.mrb[28].mxu1 %vm406_vm1, %v13430_v57 }
 0x35d   : > { %10674 = vmatprep.mubr.msk.bf16.mxu1 %vm406_vm1, %v13144_v30  ;;  %v12436_v30 = vld [vmem:[%s15080_s2 + $0x1e0] ss:$12 sps:$4 sm:$0xff]  }
 0x362   : > { %9634 = vmatmul.mubr.msk.bf16.gmra.mrb[36].mxu0 %vm406_vm1, %v13728_v23 }
 0x363   : > { %3984 = vmatprep.mubr.bf16.mxu0 %v12797_v2 }
 0x364   : > { %10675 = vmatmul.mubr.msk.bf16.vlgmr.msra.gmra.mrb[0].mxu1 %vm406_vm1, %v13156_v42  ;;  %v12439_v42 = vld [vmem:[%s15080_s2 + $0x1f8] ss:$12 sps:$4 sm:$0xff]  }
 0x365   : > { %10678 = vmatprep.mubr.msk.bf16.mxu1 %vm406_vm1, %v13163_v48  ;;  %v5056_v48 = vsel %vm455_vm0, %v9789_v22, 0  ;;  %v9746_v22 = vld [vmem:[%s12860_s9 + $0x6a] sm:$0xff] }
 0x36a   : > { %9635 = vmatmul.mubr.msk.bf16.gmra.mrb[40].mxu0 %vm406_vm1, %v13739_v51 }
 0x36b   : > { %3994 = vmatprep.mubr.bf16.mxu0 %v12797_v2 }
 0x36c   : > { %10679 = vmatmul.mubr.msk.bf16.gmra.mrb[4].mxu1 %vm406_vm1, %v13170_v55  ;;  %v9663_v55 = vld [vmem:[%s12860_s9 + $0x79] sm:$0xff] }
 0x36d   : > { %10682 = vmatprep.mubr.msk.bf16.mxu1 %vm406_vm1, %v13177_v61  ;;  %v9664_v61 = vld [vmem:[%s12860_s9 + $0x81] sm:$0xff] }
 0x36e   : > { %v13859_v19 = vpack.c.bf16 %v9664_v61, %v9663_v55  ;;  %v9750_v55 = vld [vmem:[%s12860_s9 + $0x9a] sm:$0xff] }
 0x372   : > { %9636 = vmatmul.mubr.msk.bf16.gmra.mrb[44].mxu0 %vm406_vm1, %v13750_v60 }
 0x373   : > { %4004 = vmatprep.mubr.bf16.mxu0 %v12797_v2 }
 0x374   : > { %10683 = vmatmul.mubr.msk.bf16.gmra.mrb[8].mxu1 %vm406_vm1, %v13184_v6  ;;  %v9665_v6 = vld [vmem:[%s12860_s9 + $0x91] sm:$0xff] }
 0x375   : > { %10686 = vmatprep.mubr.msk.bf16.mxu1 %vm406_vm1, %v13191_v10  ;;  %v9666_v10 = vld [vmem:[%s12860_s9 + $0x99] sm:$0xff] }
 0x376   : > { %v13870_v21 = vpack.c.bf16 %v9666_v10, %v9665_v6  ;;  %v9752_v6 = vld [vmem:[%s12860_s9 + $0xb2] sm:$0xff] }
 0x37a   : > { %9637 = vmatmul.mubr.msk.bf16.gmra.mrb[48].mxu0 %vm406_vm1, %v13761_v3 }
 0x37b   : > { %4014 = vmatprep.mubr.bf16.mxu0 %v12797_v2 }
 0x37c   : > { %10687 = vmatmul.mubr.msk.bf16.gmra.mrb[12].mxu1 %vm406_vm1, %v13198_v16  ;;  %v9667_v16 = vld [vmem:[%s12860_s9 + $0xa9] sm:$0xff] }
 0x37d   : > { %10690 = vmatprep.mubr.msk.bf16.mxu1 %vm406_vm1, %v13205_v20  ;;  %v9668_v20 = vld [vmem:[%s12860_s9 + $0xb1] sm:$0xff] }
 0x37e   : > { %v13881_v39 = vpack.c.bf16 %v9668_v20, %v9667_v16  ;;  %v9754_v16 = vld [vmem:[%s12860_s9 + $0xca] sm:$0xff] }
 0x382   : > { %9638 = vmatmul.mubr.msk.bf16.gmra.mrb[52].mxu0 %vm406_vm1, %v13772_v27 }
 0x383   : > { %4024 = vmatprep.mubr.bf16.mxu0 %v12797_v2 }
 0x384   : > { %10691 = vmatmul.mubr.msk.bf16.gmra.mrb[16].mxu1 %vm406_vm1, %v13212_v25  ;;  %v9669_v25 = vld [vmem:[%s12860_s9 + $0xc1] sm:$0xff] }
 0x385   : > { %10694 = vmatprep.mubr.msk.bf16.mxu1 %vm406_vm1, %v13219_v34  ;;  %v9670_v34 = vld [vmem:[%s12860_s9 + $0xc9] sm:$0xff] }
 0x386   : > { %v13892_v26 = vpack.c.bf16 %v9670_v34, %v9669_v25  ;;  %v9756_v25 = vld [vmem:[%s12860_s9 + $0xe2] sm:$0xff] }
 0x38a   : > { %9639 = vmatmul.mubr.msk.bf16.gmra.mrb[56].mxu0 %vm406_vm1, %v13316_v46 }
 0x38b   : > { %4034 = vmatprep.mubr.bf16.mxu0 %v12797_v2 }
 0x38c   : > { %10695 = vmatmul.mubr.msk.bf16.gmra.mrb[20].mxu1 %vm406_vm1, %v13226_v43  ;;  %v12450_v43 = vld [vmem:[%s15080_s2 + $0x170] ss:$12 sps:$4 sm:$0xff]  }
 0x38d   : > { %10698 = vmatprep.mubr.msk.bf16.mxu1 %vm406_vm1, %v13233_v52  ;;  %v12451_v52 = vld [vmem:[%s15080_s2 + $0x188] ss:$12 sps:$4 sm:$0xff]   ;;  %10706 = vmatprep.subr.bf16.mxu1 %v12450_v43 }
 0x38e   : > { %10707 = vmatpush3.bf16.msra.mxu1 %v12450_v43 }
 0x38f   : > { %10708 = vmatprep.subr.bf16.mxu1 %v12451_v52 }
 0x392   : > { %9640 = vmatmul.mubr.msk.bf16.gmra.mrb[60].mxu0 %vm406_vm1, %v13796_v62  ;;  %10709 = vmatpush3.bf16.msra.mxu1 %v12451_v52  ;;  %v9759_v52 = vld [vmem:[%s12860_s9 + $0x10a] sm:$0xff] }
 0x393   : > { %4490 = vmatprep.mubr.bf16.mxu0 %v12797_v2  ;;  %12346 = vmatprep.subr.msk.bf16.mxu1 %vm455_vm0, %v12452_v32  ;;  %v9762_v32 = vld [vmem:[%s12860_s9 + $0x12a] sm:$0xff] }
 0x394   : > { %10699 = vmatmul.mubr.msk.bf16.gmra.mrb[24].mxu1 %vm406_vm1, %v13240_v0  ;;  %v9672_v0 = vld [vmem:[%s12860_s9 + $0xe1] sm:$0xff] }
 0x395   : > { %10702 = vmatprep.mubr.msk.bf16.mxu1 %vm406_vm1, %v13247_v9  ;;  %v13909_v9 = vpack.c.bf16 %v9672_v0, %v9671_v29  ;;  %v9760_v29 = vld [vmem:[%s12860_s9 + $0x112] sm:$0xff] }
 0x396   : > { %10711 = vmatpush3.bf16.msra.mxu1 %v3850_v41  ;;  %v4949_v0 = vpack.c.bf16 %v9760_v29, %v9759_v52  ;;  %v9764_v41 = vld [vmem:[%s12860_s9 + $0x142] sm:$0xff] }
 0x39a   : > { %9709 = vmatmul.mubr.msk.bf16.vlgmr.msra.gmra.mrb[0].mxu0 %vm406_vm1, %v13812_v45 }
 0x39b   : > { %5065 = vmatpush1.bf16.msra.mxu0 %v12436_v30  ;;  %4500 = vmatprep.mubr.bf16.mxu0 %v12797_v2  ;;  %v12457_v30 = vld [vmem:[%s15080_s2 + $0x200] ss:$12 sps:$4 sm:$0xff]  }
 0x39c   : > { %5066 = vmatprep.subr.bf16.mxu0 %v12441_v49  ;;  %10703 = vmatmul.mubr.msk.bf16.gmra.mrb[28].mxu1 %vm406_vm1, %v13585_v7  ;;  %v12458_v49 = vld [vmem:[%s15080_s2 + $0x218] ss:$0 sps:$4 sm:$0x33]  }
 0x39d   : > { %10712 = vmatprep.mubr.msk.bf16.mxu1 %vm406_vm1, %v13601_v18  ;;  %v9675_v18 = vld [vmem:[%s12860_s9 + $0x109] sm:$0xff] }
 0x39e   : > { %v13936_v50 = vpack.c.bf16 %v9676_v47, %v9675_v18  ;;  %v9765_v18 = vld [vmem:[%s12860_s9 + $0x152] sm:$0xff]  ;;  %v9766_v47 = vld [vmem:[%s12860_s9 + $0x15a] sm:$0xff] }
 0x39f   : > { %5067 = vmatpush1.bf16.msra.mxu0 %v12439_v42  ;;  %v5062_v42 = vsel %vm455_vm0, %v12458_v49, 0 }
 0x3a0   : > { %9792 = vmatprep.subr.msk.bf16.mxu0 %vm455_vm0, %v9790_v4  ;;  %v9745_v4 = vld [vmem:[%s12860_s9 + $0x62] sm:$0xff] }
 0x3a2   : > { %9710 = vmatmul.mubr.msk.bf16.gmra.mrb[4].mxu0 %vm406_vm1, %v13835_v8 }
 0x3a3   : > { %4510 = vmatprep.mubr.bf16.mxu0 %v12797_v2  ;;  %5069 = vmatpush1.bf16.msra.mxu0 %v5056_v48  ;;  %v9747_v48 = vld [vmem:[%s12860_s9 + $0x7a] sm:$0xff] }
 0x3a4   : > { %10713 = vmatmul.mubr.msk.bf16.vlgmr.msra.gmra.mrb[0].mxu1 %vm406_vm1, %v13624_v15  ;;  %v9677_v15 = vld [vmem:[%s12860_s9 + $0x121] sm:$0xff]  ;;  %v4943_v28 = vpack.c.bf16 %v9748_v24, %v9747_v48 }
 0x3a5   : > { %10716 = vmatprep.mubr.msk.bf16.mxu1 %vm406_vm1, %v13640_v5  ;;  %v9678_v5 = vld [vmem:[%s12860_s9 + $0x129] sm:$0xff] }
 0x3a6   : > { %v13947_v53 = vpack.c.bf16 %v9678_v5, %v9677_v15  ;;  %v12459_v15 = vld [vmem:[%s15081_s3] sm:$0xff]   ;;  %v12460_v5 = vld [vmem:[%s15081_s3 + $0x8] sm:$0xff]  }
 0x3aa   : > { %9711 = vmatmul.mubr.msk.bf16.gmra.mrb[8].mxu0 %vm406_vm1, %v13848_v33 }
 0x3ab   : > { %4520 = vmatprep.mubr.bf16.mxu0 %v12797_v2 }
 0x3ac   : > { %10717 = vmatmul.mubr.msk.bf16.gmra.mrb[4].mxu1 %vm406_vm1, %v13651_v12  ;;  %v9679_v12 = vld [vmem:[%s12860_s9 + $0x139] sm:$0xff] }
 0x3ad   : > { %10720 = vmatprep.mubr.msk.bf16.mxu1 %vm406_vm1, %v13662_v13  ;;  %v9680_v13 = vld [vmem:[%s12860_s9 + $0x141] sm:$0xff] }
 0x3ae   : > { %v13958_v56 = vpack.c.bf16 %v9680_v13, %v9679_v12  ;;  %v9768_v12 = vld [vmem:[%s12860_s9 + $0x172] sm:$0xff] }
 0x3b2   : > { %9712 = vmatmul.mubr.msk.bf16.gmra.mrb[12].mxu0 %vm406_vm1, %v13859_v19 }
 0x3b3   : > { %4530 = vmatprep.mubr.bf16.mxu0 %v12797_v2 }
 0x3b4   : > { %10721 = vmatmul.mubr.msk.bf16.gmra.mrb[8].mxu1 %vm406_vm1, %v13673_v17  ;;  %v9681_v17 = vld [vmem:[%s12860_s9 + $0x151] sm:$0xff] }
 0x3b5   : > { %10724 = vmatprep.mubr.msk.bf16.mxu1 %vm406_vm1, %v13684_v14  ;;  %v9682_v14 = vld [vmem:[%s12860_s9 + $0x159] sm:$0xff] }
 0x3b6   : > { %v13969_v59 = vpack.c.bf16 %v9682_v14, %v9681_v17  ;;  %v12462_v17 = vld [vmem:[%s15081_s3 + $0x18] sm:$0xff]   ;;  %v12463_v14 = vld [vmem:[%s15081_s3 + $0x20] sm:$0xff]  }
 0x3ba   : > { %9713 = vmatmul.mubr.msk.bf16.gmra.mrb[16].mxu0 %vm406_vm1, %v13870_v21 }
 0x3bb   : > { %4540 = vmatprep.mubr.bf16.mxu0 %v12797_v2 }
 0x3bc   : > { %10725 = vmatmul.mubr.msk.bf16.gmra.mrb[12].mxu1 %vm406_vm1, %v13701_v11  ;;  %v9683_v11 = vld [vmem:[%s12860_s9 + $0x169] sm:$0xff] }
 0x3bd   : > { %10728 = vmatprep.mubr.msk.bf16.mxu1 %vm406_vm1, %v13717_v37  ;;  %v9684_v37 = vld [vmem:[%s12860_s9 + $0x171] sm:$0xff] }
 0x3be   : > { %v13980_v1 = vpack.c.bf16 %v9684_v37, %v9683_v11  ;;  %v9772_v11 = vld [vmem:[%s12860_s9 + $0x1a2] sm:$0xff] }
 0x3bf   : > { %v12464_v37 = vld [vmem:[%s15081_s3 + $0x28] sm:$0xff]  }
 0x3c2   : > { %9714 = vmatmul.mubr.msk.bf16.gmra.mrb[20].mxu0 %vm406_vm1, %v13881_v39 }
 0x3c3   : > { %4550 = vmatprep.mubr.bf16.mxu0 %v12797_v2 }
 0x3c4   : > { %10729 = vmatmul.mubr.msk.bf16.gmra.mrb[16].mxu1 %vm406_vm1, %v13728_v23  ;;  %v12453_v23 = vld [vmem:[%s15080_s2 + $0x1ac] ss:$12 sps:$4 sm:$0xff]  }
 0x3c5   : > { %10732 = vmatprep.mubr.msk.bf16.mxu1 %vm406_vm1, %v13739_v51  ;;  %v12454_v51 = vld [vmem:[%s15080_s2 + $0x1c4] ss:$12 sps:$4 sm:$0xff]   ;;  %10744 = vmatprep.subr.bf16.mxu1 %v12453_v23 }
 0x3c6   : > { %10745 = vmatpush3.bf16.msra.mxu1 %v12453_v23  ;;  %v12798_v23 = vmov 0.0  }
 0x3c7   : > { %10746 = vmatprep.subr.bf16.mxu1 %v12454_v51  ;;  %6043 = vst [vmem:[#allocation2] sm:$0xff] %v12798_v23  ;;  %6044 = vst [vmem:[#allocation2 + $0x8] sm:$0xff] %v12798_v23 }
 0x3c8   : > { %6045 = vst [vmem:[#allocation2 + $0x10] sm:$0x3] %v12798_v23  ;;  %6047 = vst [vmem:[#allocation2 + $0x198] sm:$0xff] %v12798_v23 }
 0x3c9   : > { %6048 = vst [vmem:[#allocation2 + $0x1a0] sm:$0xff] %v12798_v23  ;;  %6049 = vst [vmem:[#allocation2 + $0x1a8] sm:$0x3] %v12798_v23 }
 0x3ca   : > { %9715 = vmatmul.mubr.msk.bf16.gmra.mrb[24].mxu0 %vm406_vm1, %v13892_v26  ;;  %10747 = vmatpush3.bf16.msra.mxu1 %v12454_v51  ;;  %6051 = vst [vmem:[#allocation2 + $0x18] sm:$0x1] %v12798_v23  ;;  %6052 = vst [vmem:[#allocation2 + $0x30] sm:$0x1] %v12798_v23 }
 0x3cb   : > { %4560 = vmatprep.mubr.bf16.mxu0 %v12797_v2  ;;  %6053 = vst [vmem:[#allocation2 + $0x48] sm:$0x1] %v12798_v23  ;;  %6054 = vst [vmem:[#allocation2 + $0x60] sm:$0x1] %v12798_v23 }
 0x3cc   : > { %10733 = vmatmul.mubr.msk.bf16.gmra.mrb[20].mxu1 %vm406_vm1, %v13750_v60  ;;  %v9687_v60 = vld [vmem:[%s12860_s9 + $0x199] sm:$0xff]  ;;  %6055 = vst [vmem:[#allocation2 + $0x78] sm:$0x1] %v12798_v23  ;;  %6056 = vst [vmem:[#allocation2 + $0x90] sm:$0x1] %v12798_v23 }
 0x3cd   : > { %10736 = vmatprep.mubr.msk.bf16.mxu1 %vm406_vm1, %v13761_v3  ;;  %v9688_v3 = vld [vmem:[%s12860_s9 + $0x1a1] sm:$0xff]  ;;  %6057 = vst [vmem:[#allocation2 + $0xa8] sm:$0x1] %v12798_v23  ;;  %6058 = vst [vmem:[#allocation2 + $0xc0] sm:$0x1] %v12798_v23 }
 0x3ce   : > { %6059 = vst [vmem:[#allocation2 + $0xd8] sm:$0x1] %v12798_v23  ;;  %6060 = vst [vmem:[#allocation2 + $0xf0] sm:$0x1] %v12798_v23 }
 0x3cf   : > { %6061 = vst [vmem:[#allocation2 + $0x108] sm:$0x1] %v12798_v23  ;;  %6062 = vst [vmem:[#allocation2 + $0x120] sm:$0x1] %v12798_v23 }
 0x3d0   : > { %6063 = vst [vmem:[#allocation2 + $0x138] sm:$0x1] %v12798_v23  ;;  %6064 = vst [vmem:[#allocation2 + $0x150] sm:$0x1] %v12798_v23 }
 0x3d1   : > { %6065 = vst [vmem:[#allocation2 + $0x168] sm:$0x1] %v12798_v23  ;;  %6066 = vst [vmem:[#allocation2 + $0x180] sm:$0x1] %v12798_v23 }
 0x3d2   : > { %9716 = vmatmul.mubr.msk.bf16.gmra.mrb[28].mxu0 %vm406_vm1, %v13909_v9  ;;  %6069 = vst [vmem:[#allocation2 + $0x29] sm:$0x1] %v12798_v23  ;;  %6070 = vst [vmem:[#allocation2 + $0x41] sm:$0x1] %v12798_v23 }
 0x3d3   : > { %4570 = vmatprep.mubr.bf16.mxu0 %v12797_v2  ;;  %6071 = vst [vmem:[#allocation2 + $0x59] sm:$0x1] %v12798_v23  ;;  %6072 = vst [vmem:[#allocation2 + $0x71] sm:$0x1] %v12798_v23 }
 0x3d4   : > { %10737 = vmatmul.mubr.msk.bf16.gmra.mrb[24].mxu1 %vm406_vm1, %v13772_v27  ;;  %v12455_v27 = vld [vmem:[%s15080_s2 + $0x1dc] ss:$0 sps:$4 sm:$0x33]   ;;  %6073 = vst [vmem:[#allocation2 + $0x89] sm:$0x1] %v12798_v23 }
 0x3d5   : > { %10740 = vmatprep.mubr.msk.bf16.mxu1 %vm406_vm1, %v13316_v46  ;;  %v14004_v46 = vpack.c.bf16 %v9688_v3, %v9687_v60  ;;  %12347 = vmatprep.subr.msk.bf16.mxu1 %vm455_vm0, %v12455_v27  ;;  %v4456_v40 = vsel %vm455_vm0, %v12455_v27, 0  ;;  %6074 = vst [vmem:[#allocation2 + $0xa1] sm:$0x1] %v12798_v23  ;;  %6075 = vst [vmem:[#allocation2 + $0xb9] sm:$0x1] %v12798_v23  ;;  %v5516_v3 = vlaneseq }
 0x3d6   : > { %10749 = vmatpush3.bf16.msra.mxu1 %v4456_v40  ;;  %6076 = vst [vmem:[#allocation2 + $0xd1] sm:$0x1] %v12798_v23  ;;  %6077 = vst [vmem:[#allocation2 + $0xe9] sm:$0x1] %v12798_v23 }
 0x3d7   : > { %10782 = vmatprep.subr.bf16.mxu1 %v12456_v31  ;;  %6078 = vst [vmem:[#allocation2 + $0x101] sm:$0x1] %v12798_v23  ;;  %6079 = vst [vmem:[#allocation2 + $0x119] sm:$0x1] %v12798_v23 }
 0x3d8   : > { %6080 = vst [vmem:[#allocation2 + $0x131] sm:$0x1] %v12798_v23  ;;  %6081 = vst [vmem:[#allocation2 + $0x149] sm:$0x1] %v12798_v23 }
 0x3d9   : > { %6082 = vst [vmem:[#allocation2 + $0x161] sm:$0x1] %v12798_v23  ;;  %6083 = vst [vmem:[#allocation2 + $0x179] sm:$0x1] %v12798_v23 }
 0x3da   : > { %9717 = vmatmul.mubr.msk.bf16.gmra.mrb[32].mxu0 %vm406_vm1, %v13925_v44  ;;  %6084 = vst [vmem:[#allocation2 + $0x191] sm:$0x1] %v12798_v23  ;;  %6050 = vst [vmem:[#allocation2] sm:$0x1] %v12798_v23 }
 0x3db   : > { %4580 = vmatprep.mubr.bf16.mxu0 %v12797_v2  ;;  %6067 = vst [vmem:[#allocation2 + $0x198] sm:$0x1] %v12798_v23  ;;  %6068 = vst [vmem:[#allocation2 + $0x11] sm:$0x1] %v12798_v23 }
 0x3dc   : > { %10741 = vmatmul.mubr.msk.bf16.gmra.mrb[28].mxu1 %vm406_vm1, %v13796_v62  ;;  %v9742_v62 = vld [vmem:[%s12860_s9 + $0x3a] sm:$0xff]  ;;  %6085 = vst [vmem:[#allocation2 + $0x1a9] sm:$0x1] %v12798_v23 }
 0x3dd   : > { %10750 = vmatprep.mubr.msk.bf16.mxu1 %vm406_vm1, %v13812_v45  ;;  %v4940_v45 = vpack.c.bf16 %v9742_v62, %v9741_v36 }
 0x3e1   : > { %v6151_v51 = vld [vmem:[#allocation2] sm:$0xff] }
 0x3e2   : > { %9718 = vmatmul.mubr.msk.bf16.gmra.mrb[36].mxu0 %vm406_vm1, %v13936_v50  ;;  %v6183_v60 = vpack.c.bf16 %v12798_v23, %v6151_v51 }
 0x3e3   : > { %4590 = vmatprep.mubr.bf16.mxu0 %v12797_v2 }
 0x3e4   : > { %10751 = vmatmul.mubr.msk.bf16.vlgmr.msra.gmra.mrb[0].mxu1 %vm406_vm1, %v13835_v8  ;;  %v4942_v8 = vpack.c.bf16 %v9746_v22, %v9745_v4 }
 0x3e5   : > { %10754 = vmatprep.mubr.msk.bf16.mxu1 %vm406_vm1, %v13848_v33  ;;  %10783 = vmatpush3.bf16.msra.mxu1 %v12456_v31  ;;  %v9749_v33 = vld [vmem:[%s12860_s9 + $0x92] sm:$0xff]  ;;  %v5514_v31 = vld [vmem:[%s15082_s4] sm:$0x7] }
 0x3e6   : > { %10784 = vmatprep.subr.bf16.mxu1 %v12457_v30  ;;  %v4944_v61 = vpack.c.bf16 %v9750_v55, %v9749_v33 }
 0x3e9   : > { %10785 = vmatpush3.bf16.msra.mxu1 %v12457_v30 }
 0x3ea   : > { %9719 = vmatmul.mubr.msk.bf16.gmra.mrb[40].mxu0 %vm406_vm1, %v13947_v53  ;;  %12348 = vmatprep.subr.msk.bf16.mxu1 %vm455_vm0, %v12458_v49 }
 0x3eb   : > { %4600 = vmatprep.mubr.bf16.mxu0 %v12797_v2 }
 0x3ec   : > { %10755 = vmatmul.mubr.msk.bf16.gmra.mrb[4].mxu1 %vm406_vm1, %v13859_v19  ;;  %v9751_v19 = vld [vmem:[%s12860_s9 + $0xaa] sm:$0xff] }
 0x3ed   : > { %10758 = vmatprep.mubr.msk.bf16.mxu1 %vm406_vm1, %v13870_v21  ;;  %10787 = vmatpush3.bf16.msra.mxu1 %v5062_v42  ;;  %v4945_v10 = vpack.c.bf16 %v9752_v6, %v9751_v19  ;;  %v9753_v21 = vld [vmem:[%s12860_s9 + $0xc2] sm:$0xff] }
 0x3ee   : > { %v4946_v20 = vpack.c.bf16 %v9754_v16, %v9753_v21  ;;  %10820 = vmatprep.subr.bf16.mxu1 %v12459_v15 }
 0x3f2   : > { %9720 = vmatmul.mubr.msk.bf16.gmra.mrb[44].mxu0 %vm406_vm1, %v13958_v56 }
 0x3f3   : > { %4610 = vmatprep.mubr.bf16.mxu0 %v12797_v2 }
 0x3f4   : > { %10759 = vmatmul.mubr.msk.bf16.gmra.mrb[8].mxu1 %vm406_vm1, %v13881_v39  ;;  %v9755_v39 = vld [vmem:[%s12860_s9 + $0xda] sm:$0xff] }
 0x3f5   : > { %10762 = vmatprep.mubr.msk.bf16.mxu1 %vm406_vm1, %v13892_v26  ;;  %v4947_v34 = vpack.c.bf16 %v9756_v25, %v9755_v39  ;;  %v9758_v26 = vld [vmem:[%s12860_s9 + $0xfa] sm:$0xff] }
 0x3fa   : > { %9721 = vmatmul.mubr.msk.bf16.gmra.mrb[48].mxu0 %vm406_vm1, %v13969_v59 }
 0x3fb   : > { %4620 = vmatprep.mubr.bf16.mxu0 %v12797_v2 }
 0x3fc   : > { %10763 = vmatmul.mubr.msk.bf16.gmra.mrb[12].mxu1 %vm406_vm1, %v13909_v9  ;;  %v9761_v9 = vld [vmem:[%s12860_s9 + $0x122] sm:$0xff] }
 0x3fd   : > { %10766 = vmatprep.mubr.msk.bf16.mxu1 %vm406_vm1, %v13925_v44  ;;  %v4950_v35 = vpack.c.bf16 %v9762_v32, %v9761_v9  ;;  %v4951_v44 = vpack.c.bf16 %v9764_v41, %v9763_v38 }
 0x402   : > { %9722 = vmatmul.mubr.msk.bf16.gmra.mrb[52].mxu0 %vm406_vm1, %v13980_v1 }
 0x403   : > { %4630 = vmatprep.mubr.bf16.mxu0 %v12797_v2 }
 0x404   : > { %10767 = vmatmul.mubr.msk.bf16.gmra.mrb[16].mxu1 %vm406_vm1, %v13936_v50  ;;  %v4952_v50 = vpack.c.bf16 %v9766_v47, %v9765_v18 }
 0x405   : > { %10770 = vmatprep.mubr.msk.bf16.mxu1 %vm406_vm1, %v13947_v53  ;;  %v9767_v53 = vld [vmem:[%s12860_s9 + $0x16a] sm:$0xff] }
 0x406   : > { %v4953_v13 = vpack.c.bf16 %v9768_v12, %v9767_v53 }
 0x40a   : > { %9723 = vmatmul.mubr.msk.bf16.gmra.mrb[56].mxu0 %vm406_vm1, %v13430_v57 }
 0x40b   : > { %4640 = vmatprep.mubr.bf16.mxu0 %v12797_v2 }
 0x40c   : > { %10771 = vmatmul.mubr.msk.bf16.gmra.mrb[20].mxu1 %vm406_vm1, %v13958_v56  ;;  %v12461_v56 = vld [vmem:[%s15081_s3 + $0x10] sm:$0xff]  }
 0x40d   : > { %10774 = vmatprep.mubr.msk.bf16.mxu1 %vm406_vm1, %v13969_v59  ;;  %v9771_v59 = vld [vmem:[%s12860_s9 + $0x19a] sm:$0xff] }
 0x412   : > { %9724 = vmatmul.mubr.msk.bf16.gmra.mrb[60].mxu0 %vm406_vm1, %v14004_v46 }
 0x413   : > { %5096 = vmatprep.mubr.bf16.mxu0 %v12797_v2 }
 0x414   : > { %10775 = vmatmul.mubr.msk.bf16.gmra.mrb[24].mxu1 %vm406_vm1, %v13980_v1  ;;  %v4955_v1 = vpack.c.bf16 %v9772_v11, %v9771_v59 }
 0x415   : > { %10778 = vmatprep.mubr.msk.bf16.mxu1 %vm406_vm1, %v13430_v57  ;;  %v9757_v57 = vld [vmem:[%s12860_s9 + $0xf2] sm:$0xff] }
 0x416   : > { %v4948_v43 = vpack.c.bf16 %v9758_v26, %v9757_v57 }
 0x41a   : > { %9793 = vmatmul.mubr.msk.bf16.vlgmr.msra.gmra.mrb[0].mxu0 %vm406_vm1, %v4940_v45 }
 0x41b   : > { %5106 = vmatprep.mubr.bf16.mxu0 %v12797_v2 }
 0x41c   : > { %10779 = vmatmul.mubr.msk.bf16.gmra.mrb[28].mxu1 %vm406_vm1, %v14004_v46  ;;  %v14162_v46 = vshrl.u32 %v5516_v3, 7 }
 0x41d   : > { %10788 = vmatprep.mubr.msk.bf16.mxu1 %vm406_vm1, %v4940_v45 }
 0x41e   : > { %v5518_v27 = vsub.s32 0, %v14162_v46  ;;  %v5522_v36 = vsub.s32 1, %v14162_v46 }
 0x420   : > { %v14169_v62 = vrot.slane %v5514_v31, %v5518_v27  ;;  %v14171_v40 = vrot.slane %v5514_v31, %v5522_v36 }
 0x422   : > { %9794 = vmatmul.mubr.msk.bf16.gmra.mrb[4].mxu0 %vm406_vm1, %v4941_v63 }
 0x423   : > { %5116 = vmatprep.mubr.bf16.mxu0 %v12797_v2 }
 0x424   : > { %10789 = vmatmul.mubr.msk.bf16.vlgmr.msra.gmra.mrb[0].mxu1 %vm406_vm1, %v4941_v63 }
 0x425   : > { %10792 = vmatprep.mubr.msk.bf16.mxu1 %vm406_vm1, %v4942_v8  ;;  %10821 = vmatpush3.bf16.msra.mxu1 %v12459_v15 }
 0x426   : > { %10822 = vmatprep.subr.bf16.mxu1 %v12460_v5 }
 0x429   : > { %10823 = vmatpush3.bf16.msra.mxu1 %v12460_v5 }
 0x42a   : > { %9795 = vmatmul.mubr.msk.bf16.gmra.mrb[8].mxu0 %vm406_vm1, %v4942_v8  ;;  %10824 = vmatprep.subr.bf16.mxu1 %v12461_v56 }
 0x42b   : > { %5126 = vmatprep.mubr.bf16.mxu0 %v12797_v2 }
 0x42c   : > { %10793 = vmatmul.mubr.msk.bf16.gmra.mrb[4].mxu1 %vm406_vm1, %v4943_v28 }
 0x42d   : > { %10796 = vmatprep.mubr.msk.bf16.mxu1 %vm406_vm1, %v4944_v61  ;;  %10825 = vmatpush3.bf16.msra.mxu1 %v12461_v56 }
 0x42e   : > { %10826 = vmatprep.subr.bf16.mxu1 %v12462_v17 }
 0x431   : > { %10827 = vmatpush3.bf16.msra.mxu1 %v12462_v17 }
 0x432   : > { %9796 = vmatmul.mubr.msk.bf16.gmra.mrb[12].mxu0 %vm406_vm1, %v4943_v28  ;;  %10828 = vmatprep.subr.bf16.mxu1 %v12463_v14  ;;  %v14180_v28 = vld [vmem:[%s15081_s3 + $0x40] sm:$0xff]  }
 0x433   : > { %5136 = vmatprep.mubr.bf16.mxu0 %v12797_v2 }
 0x434   : > { %10797 = vmatmul.mubr.msk.bf16.gmra.mrb[8].mxu1 %vm406_vm1, %v4945_v10 }
 0x435   : > { %10800 = vmatprep.mubr.msk.bf16.mxu1 %vm406_vm1, %v4946_v20  ;;  %10829 = vmatpush3.bf16.msra.mxu1 %v12463_v14 }
 0x436   : > { %10830 = vmatprep.subr.bf16.mxu1 %v12464_v37 }
 0x439   : > { %10831 = vmatpush3.bf16.msra.mxu1 %v12464_v37 }
 0x43a   : > { %9797 = vmatmul.mubr.msk.bf16.gmra.mrb[16].mxu0 %vm406_vm1, %v4944_v61 }
 0x43b   : > { %5146 = vmatprep.mubr.bf16.mxu0 %v12797_v2 }
 0x43c   : > { %10801 = vmatmul.mubr.msk.bf16.gmra.mrb[12].mxu1 %vm406_vm1, %v4947_v34 }
 0x43d   : > { %10804 = vmatprep.mubr.msk.bf16.mxu1 %vm406_vm1, %v4948_v43 }
 0x442   : > { %9798 = vmatmul.mubr.msk.bf16.gmra.mrb[20].mxu0 %vm406_vm1, %v4945_v10 }
 0x443   : > { %5156 = vmatprep.mubr.bf16.mxu0 %v12797_v2 }
 0x444   : > { %10805 = vmatmul.mubr.msk.bf16.gmra.mrb[16].mxu1 %vm406_vm1, %v4949_v0 }
 0x445   : > { %10808 = vmatprep.mubr.msk.bf16.mxu1 %vm406_vm1, %v4950_v35 }
 0x44a   : > { %9799 = vmatmul.mubr.msk.bf16.gmra.mrb[24].mxu0 %vm406_vm1, %v4946_v20 }
 0x44b   : > { %5166 = vmatprep.mubr.bf16.mxu0 %v12797_v2 }
 0x44c   : > { %10809 = vmatmul.mubr.msk.bf16.gmra.mrb[20].mxu1 %vm406_vm1, %v4951_v44 }
 0x44d   : > { %10812 = vmatprep.mubr.msk.bf16.mxu1 %vm406_vm1, %v4952_v50 }
 0x452   : > { %9800 = vmatmul.mubr.msk.bf16.gmra.mrb[28].mxu0 %vm406_vm1, %v4947_v34 }
 0x453   : > { %5176 = vmatprep.mubr.bf16.mxu0 %v12797_v2 }
 0x454   : > { %10813 = vmatmul.mubr.msk.bf16.gmra.mrb[24].mxu1 %vm406_vm1, %v4953_v13 }
 0x455   : > { %10816 = vmatprep.mubr.msk.bf16.mxu1 %vm406_vm1, %v13585_v7 }
 0x45a   : > { %9801 = vmatmul.mubr.msk.bf16.gmra.mrb[32].mxu0 %vm406_vm1, %v4948_v43 }
 0x45b   : > { %5186 = vmatprep.mubr.bf16.mxu0 %v12797_v2 }
 0x45c   : > { %10817 = vmatmul.mubr.msk.bf16.gmra.mrb[28].mxu1 %vm406_vm1, %v4955_v1 }
 0x45d   : > { %10836 = vmatprep.mubr.bf16.mxu1 %v6183_v60 }
 0x462   : > { %9802 = vmatmul.mubr.msk.bf16.gmra.mrb[36].mxu0 %vm406_vm1, %v4949_v0 }
 0x463   : > { %5196 = vmatprep.mubr.bf16.mxu0 %v12797_v2 }
 0x46a   : > { %9803 = vmatmul.mubr.msk.bf16.gmra.mrb[40].mxu0 %vm406_vm1, %v4950_v35 }
 0x46b   : > { %5206 = vmatprep.mubr.bf16.mxu0 %v12797_v2 }
 0x472   : > { %9804 = vmatmul.mubr.msk.bf16.gmra.mrb[44].mxu0 %vm406_vm1, %v4951_v44 }
 0x473   : > { %5216 = vmatprep.mubr.bf16.mxu0 %v12797_v2 }
 0x47a   : > { %9805 = vmatmul.mubr.msk.bf16.gmra.mrb[48].mxu0 %vm406_vm1, %v4952_v50 }
 0x47b   : > { %5226 = vmatprep.mubr.bf16.mxu0 %v12797_v2 }
 0x482   : > { %9806 = vmatmul.mubr.msk.bf16.gmra.mrb[52].mxu0 %vm406_vm1, %v4953_v13 }
 0x483   : > { %5236 = vmatprep.mubr.bf16.mxu0 %v12797_v2 }
 0x48a   : > { %9807 = vmatmul.mubr.msk.bf16.gmra.mrb[56].mxu0 %vm406_vm1, %v13585_v7  ;;  %v12466_v7 = vld [vmem:[%s15081_s3 + $0x38] sm:$0xff]  }
 0x48b   : > { %5246 = vmatprep.mubr.bf16.mxu0 %v12797_v2  ;;  %v12465_v2 = vld [vmem:[%s15081_s3 + $0x30] sm:$0xff]  }
 0x48c   : > { %10832 = vmatprep.subr.bf16.mxu1 %v12465_v2 }
 0x48d   : > { %10833 = vmatpush3.bf16.msra.mxu1 %v12465_v2 }
 0x48e   : > { %10834 = vmatprep.subr.bf16.mxu1 %v12466_v7 }
 0x491   : > { %10835 = vmatpush3.bf16.msra.mxu1 %v12466_v7  ;;  %v5627_v7 = vld [vmem:[%s14200_s12] sm:$0xff] }
 0x492   : > { %9808 = vmatmul.mubr.msk.bf16.gmra.mrb[60].mxu0 %vm406_vm1, %v4955_v1  ;;  %10868 = vmatprep.subr.bf16.mxu1 %v14180_v28 }
 0x4ed   : > { %v5098_v45 = vpop.f32.mrb[0].mxu0 }
 0x4ee   : > { %v5531_v30 = vadd.f32 %v14169_v62, %v5098_v45  ;;  %v5100_v49 = vpop.f32.mrb[1].mxu0 }
 0x4ef   : > { %v5532_v54 = vadd.f32 %v14171_v40, %v5100_v49  ;;  %v5102_v58 = vpop.f32.mrb[2].mxu0  ;;  %v5628_v49 = vld [vmem:[%s14200_s12 + $0x8] sm:$0xff] }
 0x4f0   : > { %v9825_v63 = vmul.f32 -1.442695, %v5531_v30  ;;  %v5534_v42 = vadd.f32 %v14169_v62, %v5102_v58  ;;  %v5104_v4 = vpop.f32.mrb[3].mxu0 }
 0x4f1   : > { %v9826_v22 = vmul.f32 -1.442695, %v5532_v54  ;;  %v5535_v8 = vadd.f32 %v14171_v40, %v5104_v4 }
 0x4f2   : > { %12531 = vpow2.f32 %v9825_v63  ;;  %v9827_v48 = vmul.f32 -1.442695, %v5534_v42 }
 0x4f3   : > { %12533 = vpow2.f32 %v9826_v22  ;;  %v9828_v24 = vmul.f32 -1.442695, %v5535_v8 }
 0x4f4   : > { %12535 = vpow2.f32 %v9827_v48 }
 0x4f5   : > { %12537 = vpow2.f32 %v9828_v24  ;;  %v5108_v33 = vpop.f32.mrb[4].mxu0 }
 0x4f6   : > { %v5537_v55 = vadd.f32 %v14169_v62, %v5108_v33  ;;  %v5110_v61 = vpop.f32.mrb[5].mxu0 }
 0x4f7   : > { %v5538_v19 = vadd.f32 %v14171_v40, %v5110_v61  ;;  %v5112_v6 = vpop.f32.mrb[6].mxu0 }
 0x4f8   : > { %v9829_v10 = vmul.f32 -1.442695, %v5537_v55  ;;  %v5540_v21 = vadd.f32 %v14169_v62, %v5112_v6  ;;  %v5114_v16 = vpop.f32.mrb[7].mxu0 }
 0x4f9   : > { %v9830_v20 = vmul.f32 -1.442695, %v5538_v19  ;;  %v5541_v39 = vadd.f32 %v14171_v40, %v5114_v16 }
 0x4fa   : > { %12539 = vpow2.f32 %v9829_v10  ;;  %v9831_v25 = vmul.f32 -1.442695, %v5540_v21 }
 0x4fb   : > { %12541 = vpow2.f32 %v9830_v20  ;;  %v9832_v34 = vmul.f32 -1.442695, %v5541_v39  ;;  %v5629_v39 = vld [vmem:[%s14200_s12 + $0x10] sm:$0xff] }
 0x4fc   : > { %v12532_v57 = vpop.eup %12531  ;;  %12543 = vpow2.f32 %v9831_v25 }
 0x4fd   : > { %v12534_v26 = vpop.eup %12533  ;;  %v5851_v43 = vadd.f32 1.0, %v12532_v57  ;;  %12545 = vpow2.f32 %v9832_v34  ;;  %v5118_v52 = vpop.f32.mrb[8].mxu0 }
 0x4fe   : > { %v12536_v29 = vpop.eup %12535  ;;  %v5852_v0 = vadd.f32 1.0, %v12534_v26  ;;  %v5543_v9 = vadd.f32 %v14169_v62, %v5118_v52  ;;  %v5120_v32 = vpop.f32.mrb[9].mxu0 }
 0x4ff   : > { %v12538_v35 = vpop.eup %12537  ;;  %12547 = vrcp.f32 %v5851_v43  ;;  %v5853_v38 = vadd.f32 1.0, %v12536_v29  ;;  %v5544_v41 = vadd.f32 %v14171_v40, %v5120_v32  ;;  %v5122_v44 = vpop.f32.mrb[10].mxu0  ;;  %v5630_v32 = vld [vmem:[%s14200_s12 + $0x18] sm:$0xff] }
 0x500   : > { %12549 = vrcp.f32 %v5852_v0  ;;  %v5854_v18 = vadd.f32 1.0, %v12538_v35  ;;  %v9833_v47 = vmul.f32 -1.442695, %v5543_v9  ;;  %v5546_v50 = vadd.f32 %v14169_v62, %v5122_v44  ;;  %v5124_v15 = vpop.f32.mrb[11].mxu0 }
 0x501   : > { %12551 = vrcp.f32 %v5853_v38  ;;  %v9834_v5 = vmul.f32 -1.442695, %v5544_v41  ;;  %v5547_v53 = vadd.f32 %v14171_v40, %v5124_v15 }
 0x502   : > { %12553 = vrcp.f32 %v5854_v18  ;;  %v9835_v12 = vmul.f32 -1.442695, %v5546_v50 }
 0x503   : > { %12555 = vpow2.f32 %v9833_v47  ;;  %v9836_v13 = vmul.f32 -1.442695, %v5547_v53 }
 0x504   : > { %v12540_v56 = vpop.eup %12539  ;;  %12557 = vpow2.f32 %v9834_v5 }
 0x505   : > { %v12542_v17 = vpop.eup %12541  ;;  %v5855_v14 = vadd.f32 1.0, %v12540_v56  ;;  %12559 = vpow2.f32 %v9835_v12  ;;  %v5128_v59 = vpop.f32.mrb[12].mxu0 }
 0x506   : > { %v12544_v11 = vpop.eup %12543  ;;  %v5856_v37 = vadd.f32 1.0, %v12542_v17  ;;  %12561 = vpow2.f32 %v9836_v13  ;;  %v5549_v1 = vadd.f32 %v14169_v62, %v5128_v59  ;;  %v5130_v23 = vpop.f32.mrb[13].mxu0 }
 0x507   : > { %v12546_v2 = vpop.eup %12545  ;;  %12563 = vrcp.f32 %v5855_v14  ;;  %v5857_v51 = vadd.f32 1.0, %v12544_v11  ;;  %v5550_v60 = vadd.f32 %v14171_v40, %v5130_v23  ;;  %v5132_v3 = vpop.f32.mrb[14].mxu0 }
 0x508   : > { %12565 = vrcp.f32 %v5856_v37  ;;  %v5858_v27 = vadd.f32 1.0, %v12546_v2  ;;  %v9837_v31 = vmul.f32 -1.442695, %v5549_v1  ;;  %v5552_v36 = vadd.f32 %v14169_v62, %v5132_v3  ;;  %v5134_v45 = vpop.f32.mrb[15].mxu0 }
 0x509   : > { %v12548_v30 = vpop.eup %12547  ;;  %12567 = vrcp.f32 %v5857_v51  ;;  %v9838_v54 = vmul.f32 -1.442695, %v5550_v60  ;;  %v5553_v58 = vadd.f32 %v14171_v40, %v5134_v45 }
 0x50a   : > { %v14208_v63 = vpop.eup %12549  ;;  %v6086_v42 = vmul.f32 %v12548_v30, %v5627_v7  ;;  %12569 = vrcp.f32 %v5858_v27  ;;  %v9839_v4 = vmul.f32 -1.442695, %v5552_v36  ;;  %v5631_v36 = vld [vmem:[%s14200_s12 + $0x20] sm:$0xff] }
 0x50b   : > { %v12552_v22 = vpop.eup %12551  ;;  %12571 = vpow2.f32 %v9837_v31  ;;  %v9840_v8 = vmul.f32 -1.442695, %v5553_v58  ;;  %v14211_v48 = vmul.f32 %v14208_v63, %v5627_v7  ;;  %v12468_v7 = vld [vmem:[%s15081_s3 + $0x48] sm:$0xff]  }
 0x50c   : > { %v14213_v24 = vpop.eup %12553  ;;  %6119 = vst [vmem:[#allocation2 + $0x19] sm:$0xff] %v6086_v42  ;;  %v6087_v33 = vmul.f32 %v12552_v22, %v5628_v49  ;;  %12573 = vpow2.f32 %v9838_v54 }
 0x50d   : > { %v12556_v55 = vpop.eup %12555  ;;  %12575 = vpow2.f32 %v9839_v4  ;;  %v5138_v61 = vpop.f32.mrb[16].mxu0  ;;  %v14216_v19 = vmul.f32 %v14213_v24, %v5628_v49 }
 0x50e   : > { %v12558_v6 = vpop.eup %12557  ;;  %6120 = vst [vmem:[#allocation2 + $0x21] sm:$0xff] %v6087_v33  ;;  %v5859_v10 = vadd.f32 1.0, %v12556_v55  ;;  %12577 = vpow2.f32 %v9840_v8  ;;  %v5555_v21 = vadd.f32 %v14169_v62, %v5138_v61  ;;  %v5140_v16 = vpop.f32.mrb[17].mxu0  ;;  %v5632_v8 = vld [vmem:[%s14200_s12 + $0x28] sm:$0xff]  ;;  %v12469_v55 = vld [vmem:[%s15081_s3 + $0x50] sm:$0xff]  }
 0x50f   : > { %v12560_v20 = vpop.eup %12559  ;;  %v5860_v25 = vadd.f32 1.0, %v12558_v6  ;;  %v5556_v34 = vadd.f32 %v14171_v40, %v5140_v16  ;;  %v5142_v57 = vpop.f32.mrb[18].mxu0 }
 0x510   : > { %v12562_v26 = vpop.eup %12561  ;;  %12579 = vrcp.f32 %v5859_v10  ;;  %v5861_v43 = vadd.f32 1.0, %v12560_v20  ;;  %v9841_v52 = vmul.f32 -1.442695, %v5555_v21  ;;  %v5558_v29 = vadd.f32 %v14169_v62, %v5142_v57  ;;  %v5144_v0 = vpop.f32.mrb[19].mxu0 }
 0x511   : > { %v12564_v9 = vpop.eup %12563  ;;  %12581 = vrcp.f32 %v5860_v25  ;;  %v5862_v35 = vadd.f32 1.0, %v12562_v26  ;;  %v9842_v38 = vmul.f32 -1.442695, %v5556_v34  ;;  %v5559_v41 = vadd.f32 %v14171_v40, %v5144_v0 }
 0x512   : > { %v14224_v44 = vpop.eup %12565  ;;  %v6088_v18 = vmul.f32 %v12564_v9, %v5629_v39  ;;  %12583 = vrcp.f32 %v5861_v43  ;;  %v9843_v47 = vmul.f32 -1.442695, %v5558_v29  ;;  %v12470_v29 = vld [vmem:[%s15081_s3 + $0x58] sm:$0xff]  }
 0x513   : > { %v12568_v50 = vpop.eup %12567  ;;  %12585 = vrcp.f32 %v5862_v35  ;;  %v9844_v15 = vmul.f32 -1.442695, %v5559_v41  ;;  %v14227_v5 = vmul.f32 %v14224_v44, %v5629_v39  ;;  %v6153_v17 = vld [vmem:[#allocation2 + $0x18] sm:$0xff]  ;;  %v5633_v41 = vld [vmem:[%s14200_s12 + $0x30] sm:$0xff] }
 0x514   : > { %v14229_v53 = vpop.eup %12569  ;;  %6121 = vst [vmem:[#allocation2 + $0x31] sm:$0xff] %v6088_v18  ;;  %v6089_v12 = vmul.f32 %v12568_v50, %v5630_v32  ;;  %12587 = vpow2.f32 %v9841_v52 }
 0x515   : > { %v12572_v13 = vpop.eup %12571  ;;  %12589 = vpow2.f32 %v9842_v38  ;;  %v5148_v56 = vpop.f32.mrb[20].mxu0  ;;  %v6154_v14 = vld [vmem:[#allocation2 + $0x20] sm:$0xff]  ;;  %v14232_v59 = vmul.f32 %v14229_v53, %v5630_v32 }
 0x516   : > { %v12574_v11 = vpop.eup %12573  ;;  %6122 = vst [vmem:[#allocation2 + $0x39] sm:$0xff] %v6089_v12  ;;  %v5863_v37 = vadd.f32 1.0, %v12572_v13  ;;  %12591 = vpow2.f32 %v9843_v47  ;;  %v5561_v1 = vadd.f32 %v14169_v62, %v5148_v56  ;;  %v5150_v23 = vpop.f32.mrb[21].mxu0  ;;  %v6184_v2 = vpack.c.bf16 %v6154_v14, %v6153_v17  ;;  %v5634_v14 = vld [vmem:[%s14200_s12 + $0x38] sm:$0xff] }
 0x517   : > { %v12576_v51 = vpop.eup %12575  ;;  %v5864_v60 = vadd.f32 1.0, %v12574_v11  ;;  %12593 = vpow2.f32 %v9844_v15  ;;  %v5562_v3 = vadd.f32 %v14171_v40, %v5150_v23  ;;  %v5152_v27 = vpop.f32.mrb[22].mxu0 }
 0x518   : > { %v12578_v31 = vpop.eup %12577  ;;  %12595 = vrcp.f32 %v5863_v37  ;;  %v5865_v45 = vadd.f32 1.0, %v12576_v51  ;;  %v9845_v30 = vmul.f32 -1.442695, %v5561_v1  ;;  %v5564_v49 = vadd.f32 %v14169_v62, %v5152_v27  ;;  %v5154_v54 = vpop.f32.mrb[23].mxu0  ;;  %10837 = vmatmul.mubr.bf16.vlgmr.msra.gmra.mrb[0].mxu1 %v6184_v2  ;;  %v12471_v1 = vld [vmem:[%s15081_s3 + $0x60] sm:$0xff]  }
 0x519   : > { %12597 = vrcp.f32 %v5864_v60  ;;  %v5866_v58 = vadd.f32 1.0, %v12578_v31  ;;  %v9846_v42 = vmul.f32 -1.442695, %v5562_v3  ;;  %v5565_v4 = vadd.f32 %v14171_v40, %v5154_v54  ;;  %10869 = vmatpush3.bf16.msra.mxu1 %v14180_v28 }
 0x51a   : > { %v12580_v22 = vpop.eup %12579  ;;  %12599 = vrcp.f32 %v5865_v45  ;;  %v9847_v33 = vmul.f32 -1.442695, %v5564_v49  ;;  %10870 = vmatprep.subr.bf16.mxu1 %v12468_v7 }
 0x51b   : > { %v14247_v61 = vpop.eup %12581  ;;  %v6090_v6 = vmul.f32 %v12580_v22, %v5631_v36  ;;  %12601 = vrcp.f32 %v5866_v58  ;;  %v9848_v10 = vmul.f32 -1.442695, %v5565_v4  ;;  %v6155_v25 = vld [vmem:[#allocation2 + $0x30] sm:$0xff] }
 0x51c   : > { %v12584_v21 = vpop.eup %12583  ;;  %12603 = vpow2.f32 %v9845_v30  ;;  %v14250_v16 = vmul.f32 %v14247_v61, %v5631_v36 }
 0x51d   : > { %v14252_v28 = vpop.eup %12585  ;;  %6123 = vst [vmem:[#allocation2 + $0x49] sm:$0xff] %v6090_v6  ;;  %v6091_v20 = vmul.f32 %v12584_v21, %v5632_v8  ;;  %12605 = vpow2.f32 %v9846_v42  ;;  %v5158_v39 = vpop.f32.mrb[24].mxu0  ;;  %v6156_v34 = vld [vmem:[#allocation2 + $0x38] sm:$0xff]  ;;  %10871 = vmatpush3.bf16.msra.mxu1 %v12468_v7 }
 0x51e   : > { %v12588_v57 = vpop.eup %12587  ;;  %12607 = vpow2.f32 %v9847_v33  ;;  %v5567_v26 = vadd.f32 %v14169_v62, %v5158_v39  ;;  %v5160_v43 = vpop.f32.mrb[25].mxu0  ;;  %v6185_v52 = vpack.c.bf16 %v6156_v34, %v6155_v25  ;;  %10872 = vmatprep.subr.bf16.mxu1 %v12469_v55  ;;  %v14272_v27 = vmul.f32 %v14252_v28, %v5632_v8 }
 0x51f   : > { %v12590_v0 = vpop.eup %12589  ;;  %6124 = vst [vmem:[#allocation2 + $0x51] sm:$0xff] %v6091_v20  ;;  %v5867_v9 = vadd.f32 1.0, %v12588_v57  ;;  %12609 = vpow2.f32 %v9848_v10  ;;  %v5568_v32 = vadd.f32 %v14171_v40, %v5160_v43  ;;  %v5162_v35 = vpop.f32.mrb[26].mxu0  ;;  %v12472_v10 = vld [vmem:[%s15081_s3 + $0x68] sm:$0xff]   ;;  %v5635_v57 = vld [vmem:[%s14200_s12 + $0x40] sm:$0xff] }
 0x520   : > { %v12592_v38 = vpop.eup %12591  ;;  %v5868_v18 = vadd.f32 1.0, %v12590_v0  ;;  %v5570_v47 = vadd.f32 %v14169_v62, %v5162_v35  ;;  %v5164_v50 = vpop.f32.mrb[27].mxu0  ;;  %10840 = vmatprep.mubr.bf16.mxu1 %v6185_v52  ;;  %v9849_v13 = vmul.f32 -1.442695, %v5567_v26 }
 0x521   : > { %v12594_v15 = vpop.eup %12593  ;;  %12611 = vrcp.f32 %v5867_v9  ;;  %v5869_v12 = vadd.f32 1.0, %v12592_v38  ;;  %v5571_v56 = vadd.f32 %v14171_v40, %v5164_v50  ;;  %10873 = vmatpush3.bf16.msra.mxu1 %v12469_v55  ;;  %v9850_v37 = vmul.f32 -1.442695, %v5568_v32  ;;  %v5636_v32 = vld [vmem:[%s14200_s12 + $0x48] sm:$0xff]  ;;  %v12473_v38 = vld [vmem:[%s15081_s3 + $0x70] sm:$0xff]  }
 0x522   : > { %v12596_v17 = vpop.eup %12595  ;;  %12613 = vrcp.f32 %v5868_v18  ;;  %v5870_v11 = vadd.f32 1.0, %v12594_v15  ;;  %10874 = vmatprep.subr.bf16.mxu1 %v12470_v29  ;;  %v9851_v7 = vmul.f32 -1.442695, %v5570_v47 }
 0x523   : > { %v14266_v23 = vpop.eup %12597  ;;  %v6092_v2 = vmul.f32 %v12596_v17, %v5633_v41  ;;  %12615 = vrcp.f32 %v5869_v12  ;;  %v9852_v60 = vmul.f32 -1.442695, %v5571_v56 }
 0x524   : > { %v12600_v51 = vpop.eup %12599  ;;  %12617 = vrcp.f32 %v5870_v11  ;;  %v14269_v3 = vmul.f32 %v14266_v23, %v5633_v41  ;;  %v6157_v58 = vld [vmem:[#allocation2 + $0x48] sm:$0xff] }
 0x525   : > { %v14274_v31 = vpop.eup %12601  ;;  %6125 = vst [vmem:[#allocation2 + $0x61] sm:$0xff] %v6092_v2  ;;  %v6093_v36 = vmul.f32 %v12600_v51, %v5634_v14  ;;  %12619 = vpow2.f32 %v9849_v13  ;;  %v5168_v45 = vpop.f32.mrb[28].mxu0  ;;  %10875 = vmatpush3.bf16.msra.mxu1 %v12470_v29 }
 0x526   : > { %v12604_v30 = vpop.eup %12603  ;;  %12621 = vpow2.f32 %v9850_v37  ;;  %v5573_v49 = vadd.f32 %v14169_v62, %v5168_v45  ;;  %v5170_v54 = vpop.f32.mrb[29].mxu0  ;;  %v6158_v42 = vld [vmem:[#allocation2 + $0x50] sm:$0xff]  ;;  %10876 = vmatprep.subr.bf16.mxu1 %v12471_v1  ;;  %v14278_v4 = vmul.f32 %v14274_v31, %v5634_v14 }
 0x527   : > { %v12606_v22 = vpop.eup %12605  ;;  %6126 = vst [vmem:[#allocation2 + $0x69] sm:$0xff] %v6093_v36  ;;  %v5871_v8 = vadd.f32 1.0, %v12604_v30  ;;  %12623 = vpow2.f32 %v9851_v7  ;;  %v5574_v33 = vadd.f32 %v14171_v40, %v5170_v54  ;;  %v5172_v55 = vpop.f32.mrb[30].mxu0  ;;  %v6186_v6 = vpack.c.bf16 %v6158_v42, %v6157_v58  ;;  %v5637_v58 = vld [vmem:[%s14200_s12 + $0x50] sm:$0xff] }
 0x528   : > { %v12608_v21 = vpop.eup %12607  ;;  %v5872_v20 = vadd.f32 1.0, %v12606_v22  ;;  %12625 = vpow2.f32 %v9852_v60  ;;  %v5576_v39 = vadd.f32 %v14169_v62, %v5172_v55  ;;  %v5174_v25 = vpop.f32.mrb[31].mxu0  ;;  %v9853_v43 = vmul.f32 -1.442695, %v5573_v49  ;;  %v12474_v60 = vld [vmem:[%s15081_s3 + $0x78] sm:$0xff]  }
 0x529   : > { %v12610_v34 = vpop.eup %12609  ;;  %12627 = vrcp.f32 %v5871_v8  ;;  %v5873_v26 = vadd.f32 1.0, %v12608_v21  ;;  %v5577_v52 = vadd.f32 %v14171_v40, %v5174_v25  ;;  %10841 = vmatmul.mubr.bf16.gmra.mrb[4].mxu1 %v6186_v6  ;;  %v9854_v0 = vmul.f32 -1.442695, %v5574_v33 }
 0x52a   : > { %12629 = vrcp.f32 %v5872_v20  ;;  %v5874_v29 = vadd.f32 1.0, %v12610_v34  ;;  %10877 = vmatpush3.bf16.msra.mxu1 %v12471_v1  ;;  %v9855_v35 = vmul.f32 -1.442695, %v5576_v39  ;;  %v14310_v39 = vld [vmem:[%s15081_s3 + $0x80] sm:$0xff]  }
 0x52b   : > { %v12612_v9 = vpop.eup %12611  ;;  %12631 = vrcp.f32 %v5873_v26  ;;  %10878 = vmatprep.subr.bf16.mxu1 %v12472_v10  ;;  %v9856_v47 = vmul.f32 -1.442695, %v5577_v52 }
 0x52c   : > { %v14291_v41 = vpop.eup %12613  ;;  %v6094_v18 = vmul.f32 %v12612_v9, %v5635_v57  ;;  %12633 = vrcp.f32 %v5874_v29  ;;  %v6159_v11 = vld [vmem:[#allocation2 + $0x60] sm:$0xff] }
 0x52d   : > { %15108 = vst [vmem:[#allocation3_spill] sm:$0xff] %v14291_v41  ;;  %v12616_v50 = vpop.eup %12615  ;;  %12635 = vpow2.f32 %v9853_v43  ;;  %v5178_v15 = vpop.f32.mrb[32].mxu0  ;;  %v14294_v12 = vmul.f32 %v14291_v41, %v5635_v57 }
 0x52e   : > { %v14296_v13 = vpop.eup %12617  ;;  %6127 = vst [vmem:[#allocation2 + $0x79] sm:$0xff] %v6094_v18  ;;  %v6095_v56 = vmul.f32 %v12616_v50, %v5636_v32  ;;  %12637 = vpow2.f32 %v9854_v0  ;;  %v5579_v17 = vadd.f32 %v14169_v62, %v5178_v15  ;;  %v5180_v14 = vpop.f32.mrb[33].mxu0  ;;  %v6160_v37 = vld [vmem:[#allocation2 + $0x68] sm:$0xff]  ;;  %10879 = vmatpush3.bf16.msra.mxu1 %v12472_v10  ;;  %v5638_v10 = vld [vmem:[%s14200_s12 + $0x58] sm:$0xff] }
 0x52f   : > { %15109 = vst [vmem:[#allocation4_spill] sm:$0xff] %v14294_v12  ;;  %15110 = vst [vmem:[#allocation5_spill] sm:$0xff] %v14296_v13  ;;  %v12620_v1 = vpop.eup %12619  ;;  %12639 = vpow2.f32 %v9855_v35  ;;  %v5580_v2 = vadd.f32 %v14171_v40, %v5180_v14  ;;  %v5182_v7 = vpop.f32.mrb[34].mxu0  ;;  %v6187_v51 = vpack.c.bf16 %v6160_v37, %v6159_v11  ;;  %10880 = vmatprep.subr.bf16.mxu1 %v12473_v38 }
 0x530   : > { %v12622_v36 = vpop.eup %12621  ;;  %6128 = vst [vmem:[#allocation2 + $0x81] sm:$0xff] %v6095_v56  ;;  %v5875_v45 = vadd.f32 1.0, %v12620_v1  ;;  %12641 = vpow2.f32 %v9856_v47  ;;  %v5582_v30 = vadd.f32 %v14169_v62, %v5182_v7  ;;  %v5184_v49 = vpop.f32.mrb[35].mxu0  ;;  %v9857_v55 = vmul.f32 -1.442695, %v5579_v17 }
 0x531   : > { %v12624_v54 = vpop.eup %12623  ;;  %v5876_v42 = vadd.f32 1.0, %v12622_v36  ;;  %v5583_v22 = vadd.f32 %v14171_v40, %v5184_v49  ;;  %10844 = vmatprep.mubr.bf16.mxu1 %v6187_v51  ;;  %v9858_v20 = vmul.f32 -1.442695, %v5580_v2  ;;  %v14317_v26 = vmul.f32 %v14296_v13, %v5636_v32  ;;  %v5639_v36 = vld [vmem:[%s14200_s12 + $0x60] sm:$0xff] }
 0x532   : > { %v12626_v8 = vpop.eup %12625  ;;  %12643 = vrcp.f32 %v5875_v45  ;;  %v5877_v33 = vadd.f32 1.0, %v12624_v54  ;;  %10881 = vmatpush3.bf16.msra.mxu1 %v12473_v38  ;;  %v9859_v57 = vmul.f32 -1.442695, %v5582_v30  ;;  %v5651_v13 = vld [vmem:[%s14200_s12 + $0xc0] sm:$0xff] }
 0x533   : > { %v12628_v6 = vpop.eup %12627  ;;  %12645 = vrcp.f32 %v5876_v42  ;;  %v5878_v21 = vadd.f32 1.0, %v12626_v8  ;;  %10882 = vmatprep.subr.bf16.mxu1 %v12474_v60  ;;  %15112 = vst [vmem:[#allocation7_spill] sm:$0xff] %v14317_v26  ;;  %v9860_v52 = vmul.f32 -1.442695, %v5583_v22  ;;  %v5640_v22 = vld [vmem:[%s14200_s12 + $0x68] sm:$0xff] }
 0x534   : > { %v14312_v25 = vpop.eup %12629  ;;  %v14314_v34 = vmul.f32 %v12628_v6, %v5637_v58  ;;  %12647 = vrcp.f32 %v5877_v33 }
 0x535   : > { %15111 = vst [vmem:[#allocation6_spill] sm:$0xff] %v14312_v25  ;;  %v12632_v43 = vpop.eup %12631  ;;  %12649 = vrcp.f32 %v5878_v21  ;;  %v5188_v29 = vpop.f32.mrb[36].mxu0  ;;  %v14320_v0 = vmul.f32 %v14312_v25, %v5637_v58  ;;  %v6161_v51 = vld [vmem:[#allocation2 + $0x78] sm:$0xff] }
 0x536   : > { %v14322_v9 = vpop.eup %12633  ;;  %6129 = vst [vmem:[#allocation2 + $0x91] sm:$0xff] %v14314_v34  ;;  %v14325_v35 = vmul.f32 %v12632_v43, %v5638_v10  ;;  %12651 = vpow2.f32 %v9857_v55  ;;  %v5585_v38 = vadd.f32 %v14169_v62, %v5188_v29  ;;  %v5190_v18 = vpop.f32.mrb[37].mxu0  ;;  %10883 = vmatpush3.bf16.msra.mxu1 %v12474_v60  ;;  %v6460_v25 = vld [vmem:[#allocation2 + $0x31] sm:$0xff] }
 0x537   : > { %15113 = vst [vmem:[#allocation8_spill] sm:$0xff] %v14320_v0  ;;  %15114 = vst [vmem:[#allocation9_spill] sm:$0xff] %v14322_v9  ;;  %v12636_v32 = vpop.eup %12635  ;;  %12653 = vpow2.f32 %v9858_v20  ;;  %v5586_v47 = vadd.f32 %v14171_v40, %v5190_v18  ;;  %v5192_v50 = vpop.f32.mrb[38].mxu0  ;;  %v6162_v15 = vld [vmem:[#allocation2 + $0x80] sm:$0xff]  ;;  %10916 = vmatprep.subr.bf16.mxu1 %v14310_v39  ;;  %v14331_v56 = vmul.f32 %v14322_v9, %v5638_v10 }
 0x538   : > { %v12638_v17 = vpop.eup %12637  ;;  %6130 = vst [vmem:[#allocation2 + $0x99] sm:$0xff] %v14325_v35  ;;  %v5879_v14 = vadd.f32 1.0, %v12636_v32  ;;  %12655 = vpow2.f32 %v9859_v57  ;;  %v5588_v11 = vadd.f32 %v14169_v62, %v5192_v50  ;;  %v5194_v37 = vpop.f32.mrb[39].mxu0  ;;  %v9861_v30 = vmul.f32 -1.442695, %v5585_v38 }
 0x539   : > { %15115 = vst [vmem:[#allocation10_spill] sm:$0xff] %v14331_v56  ;;  %v12640_v1 = vpop.eup %12639  ;;  %v5880_v2 = vadd.f32 1.0, %v12638_v17  ;;  %12657 = vpow2.f32 %v9860_v52  ;;  %v5589_v7 = vadd.f32 %v14171_v40, %v5194_v37  ;;  %v14337_v49 = vpack.c.bf16 %v6162_v15, %v6161_v51 }
 0x53a   : > { %v12642_v60 = vpop.eup %12641  ;;  %12659 = vrcp.f32 %v5879_v14  ;;  %v5881_v45 = vadd.f32 1.0, %v12640_v1  ;;  %v9862_v58 = vmul.f32 -1.442695, %v5586_v47  ;;  %v9863_v8 = vmul.f32 -1.442695, %v5588_v11 }
 0x53b   : > { %12661 = vrcp.f32 %v5880_v2  ;;  %v5882_v54 = vadd.f32 1.0, %v12642_v60  ;;  %10845 = vmatmul.mubr.bf16.gmra.mrb[8].mxu1 %v14337_v49  ;;  %v9864_v10 = vmul.f32 -1.442695, %v5589_v7  ;;  %v5641_v60 = vld [vmem:[%s14200_s12 + $0x70] sm:$0xff] }
 0x53c   : > { %v12644_v42 = vpop.eup %12643  ;;  %12663 = vrcp.f32 %v5881_v45 }
 0x53d   : > { %v14343_v55 = vpop.eup %12645  ;;  %v14345_v6 = vmul.f32 %v12644_v42, %v5639_v36  ;;  %12665 = vrcp.f32 %v5882_v54  ;;  %v5198_v21 = vpop.f32.mrb[40].mxu0  ;;  %v6163_v47 = vld [vmem:[#allocation2 + $0x90] sm:$0xff] }
 0x53e   : > { %15116 = vst [vmem:[#allocation11_spill] sm:$0xff] %v14343_v55  ;;  %v12648_v20 = vpop.eup %12647  ;;  %12667 = vpow2.f32 %v9861_v30  ;;  %v5591_v57 = vadd.f32 %v14169_v62, %v5198_v21  ;;  %v5200_v43 = vpop.f32.mrb[41].mxu0  ;;  %v14349_v52 = vmul.f32 %v14343_v55, %v5639_v36 }
 0x53f   : > { %v14351_v29 = vpop.eup %12649  ;;  %6131 = vst [vmem:[#allocation2 + $0xa9] sm:$0xff] %v14345_v6  ;;  %v14354_v38 = vmul.f32 %v12648_v20, %v5640_v22  ;;  %12669 = vpow2.f32 %v9862_v58  ;;  %v5592_v18 = vadd.f32 %v14171_v40, %v5200_v43  ;;  %v5202_v32 = vpop.f32.mrb[42].mxu0  ;;  %v6164_v50 = vld [vmem:[#allocation2 + $0x98] sm:$0xff] }
 0x540   : > { %15117 = vst [vmem:[#allocation12_spill] sm:$0xff] %v14349_v52  ;;  %15118 = vst [vmem:[#allocation13_spill] sm:$0xff] %v14351_v29  ;;  %v12652_v15 = vpop.eup %12651  ;;  %12671 = vpow2.f32 %v9863_v8  ;;  %v9865_v17 = vmul.f32 -1.442695, %v5591_v57  ;;  %v5594_v14 = vadd.f32 %v14169_v62, %v5202_v32  ;;  %v5204_v11 = vpop.f32.mrb[43].mxu0  ;;  %v14358_v37 = vpack.c.bf16 %v6164_v50, %v6163_v47  ;;  %v5642_v8 = vld [vmem:[%s14200_s12 + $0x78] sm:$0xff] }
 0x541   : > { %v12654_v1 = vpop.eup %12653  ;;  %6132 = vst [vmem:[#allocation2 + $0xb1] sm:$0xff] %v14354_v38  ;;  %v5883_v2 = vadd.f32 1.0, %v12652_v15  ;;  %12673 = vpow2.f32 %v9864_v10  ;;  %v5595_v7 = vadd.f32 %v14171_v40, %v5204_v11  ;;  %v9866_v58 = vmul.f32 -1.442695, %v5592_v18 }
 0x542   : > { %v12656_v51 = vpop.eup %12655  ;;  %v5884_v36 = vadd.f32 1.0, %v12654_v1  ;;  %12675 = vpow2.f32 %v9865_v17  ;;  %10848 = vmatprep.mubr.bf16.mxu1 %v14358_v37  ;;  %v9867_v10 = vmul.f32 -1.442695, %v5594_v14  ;;  %v14372_v47 = vmul.f32 %v14351_v29, %v5640_v22 }
 0x543   : > { %v12658_v30 = vpop.eup %12657  ;;  %12677 = vrcp.f32 %v5883_v2  ;;  %v5885_v54 = vadd.f32 1.0, %v12656_v51  ;;  %v9868_v43 = vmul.f32 -1.442695, %v5595_v7 }
 0x544   : > { %v12660_v42 = vpop.eup %12659  ;;  %12679 = vrcp.f32 %v5884_v36  ;;  %v5886_v21 = vadd.f32 1.0, %v12658_v30  ;;  %15120 = vst [vmem:[#allocation15_spill] sm:$0xff] %v14372_v47 }
 0x545   : > { %v14367_v20 = vpop.eup %12661  ;;  %v14369_v57 = vmul.f32 %v12660_v42, %v5641_v60  ;;  %12681 = vrcp.f32 %v5885_v54  ;;  %v5208_v32 = vpop.f32.mrb[44].mxu0 }
 0x546   : > { %15119 = vst [vmem:[#allocation14_spill] sm:$0xff] %v14367_v20  ;;  %v12664_v50 = vpop.eup %12663  ;;  %12683 = vrcp.f32 %v5886_v21  ;;  %v5597_v15 = vadd.f32 %v14169_v62, %v5208_v32  ;;  %v5210_v18 = vpop.f32.mrb[45].mxu0  ;;  %v14376_v17 = vmul.f32 %v14367_v20, %v5641_v60 }
 0x547   : > { %v14378_v11 = vpop.eup %12665  ;;  %6133 = vst [vmem:[#allocation2 + $0xc1] sm:$0xff] %v14369_v57  ;;  %v14381_v14 = vmul.f32 %v12664_v50, %v5642_v8  ;;  %12685 = vpow2.f32 %v9866_v58  ;;  %v5212_v1 = vpop.f32.mrb[46].mxu0  ;;  %v5598_v7 = vadd.f32 %v14171_v40, %v5210_v18  ;;  %v6165_v58 = vld [vmem:[#allocation2 + $0xa8] sm:$0xff]  ;;  %v5643_v18 = vld [vmem:[%s14200_s12 + $0x80] sm:$0xff] }
 0x548   : > { %15121 = vst [vmem:[#allocation16_spill] sm:$0xff] %v14376_v17  ;;  %15122 = vst [vmem:[#allocation17_spill] sm:$0xff] %v14378_v11  ;;  %v12668_v2 = vpop.eup %12667  ;;  %12687 = vpow2.f32 %v9867_v10  ;;  %v9869_v22 = vmul.f32 -1.442695, %v5597_v15  ;;  %v5214_v51 = vpop.f32.mrb[47].mxu0  ;;  %v6166_v36 = vld [vmem:[#allocation2 + $0xb0] sm:$0xff]  ;;  %v14385_v30 = vmul.f32 %v14378_v11, %v5642_v8  ;;  %v5600_v42 = vadd.f32 %v14169_v62, %v5212_v1 }
 0x549   : > { %v12670_v60 = vpop.eup %12669  ;;  %6134 = vst [vmem:[#allocation2 + $0xc9] sm:$0xff] %v14381_v14  ;;  %v5887_v54 = vadd.f32 1.0, %v12668_v2  ;;  %12689 = vpow2.f32 %v9868_v43  ;;  %v5601_v32 = vadd.f32 %v14171_v40, %v5214_v51  ;;  %v14390_v50 = vpack.c.bf16 %v6166_v36, %v6165_v58 }
 0x54a   : > { %15123 = vst [vmem:[#allocation18_spill] sm:$0xff] %v14385_v30  ;;  %v12672_v21 = vpop.eup %12671  ;;  %v5888_v10 = vadd.f32 1.0, %v12670_v60  ;;  %12691 = vpow2.f32 %v9869_v22  ;;  %v9870_v1 = vmul.f32 -1.442695, %v5598_v7  ;;  %v5644_v60 = vld [vmem:[%s14200_s12 + $0x88] sm:$0xff] }
 0x54b   : > { %v12674_v15 = vpop.eup %12673  ;;  %12693 = vrcp.f32 %v5887_v54  ;;  %v5889_v8 = vadd.f32 1.0, %v12672_v21  ;;  %10849 = vmatmul.mubr.bf16.gmra.mrb[12].mxu1 %v14390_v50  ;;  %v9871_v51 = vmul.f32 -1.442695, %v5600_v42  ;;  %v9872_v54 = vmul.f32 -1.442695, %v5601_v32 }
 0x54c   : > { %v12676_v2 = vpop.eup %12675  ;;  %12695 = vrcp.f32 %v5888_v10  ;;  %v5890_v43 = vadd.f32 1.0, %v12674_v15 }
 0x54d   : > { %v12678_v33 = vpop.eup %12677  ;;  %12697 = vrcp.f32 %v5889_v8  ;;  %v5891_v22 = vadd.f32 1.0, %v12676_v2  ;;  %v5218_v36 = vpop.f32.mrb[48].mxu0 }
 0x54e   : > { %v14397_v58 = vpop.eup %12679  ;;  %v14399_v47 = vmul.f32 %v12678_v33, %v5643_v18  ;;  %12699 = vrcp.f32 %v5890_v43  ;;  %v5603_v21 = vadd.f32 %v14169_v62, %v5218_v36  ;;  %v5220_v45 = vpop.f32.mrb[49].mxu0  ;;  %v6167_v2 = vld [vmem:[#allocation2 + $0xc0] sm:$0xff] }
 0x54f   : > { %15124 = vst [vmem:[#allocation19_spill] sm:$0xff] %v14397_v58  ;;  %v12682_v10 = vpop.eup %12681  ;;  %12701 = vrcp.f32 %v5891_v22  ;;  %v5222_v7 = vpop.f32.mrb[50].mxu0  ;;  %v14403_v15 = vmul.f32 %v14397_v58, %v5643_v18  ;;  %v5604_v32 = vadd.f32 %v14171_v40, %v5220_v45 }
 0x550   : > { %v14405_v30 = vpop.eup %12683  ;;  %6135 = vst [vmem:[#allocation2 + $0xd9] sm:$0xff] %v14399_v47  ;;  %v14408_v42 = vmul.f32 %v12682_v10, %v5644_v60  ;;  %12703 = vpow2.f32 %v9870_v1  ;;  %v9873_v33 = vmul.f32 -1.442695, %v5603_v21  ;;  %v5224_v8 = vpop.f32.mrb[51].mxu0  ;;  %v6168_v43 = vld [vmem:[#allocation2 + $0xc8] sm:$0xff]  ;;  %v5606_v18 = vadd.f32 %v14169_v62, %v5222_v7  ;;  %v5645_v10 = vld [vmem:[%s14200_s12 + $0x90] sm:$0xff] }
 0x551   : > { %15125 = vst [vmem:[#allocation20_spill] sm:$0xff] %v14403_v15  ;;  %15126 = vst [vmem:[#allocation21_spill] sm:$0xff] %v14405_v30  ;;  %v12686_v36 = vpop.eup %12685  ;;  %12705 = vpow2.f32 %v9871_v51  ;;  %v5607_v22 = vadd.f32 %v14171_v40, %v5224_v8  ;;  %v14413_v15 = vpack.c.bf16 %v6168_v43, %v6167_v2  ;;  %v5646_v7 = vld [vmem:[%s14200_s12 + $0x98] sm:$0xff]  ;;  %v9874_v2 = vmul.f32 -1.442695, %v5604_v32 }
 0x552   : > { %v12688_v58 = vpop.eup %12687  ;;  %6136 = vst [vmem:[#allocation2 + $0xe1] sm:$0xff] %v14408_v42  ;;  %v5892_v1 = vadd.f32 1.0, %v12686_v36  ;;  %12707 = vpow2.f32 %v9872_v54  ;;  %v9875_v36 = vmul.f32 -1.442695, %v5606_v18  ;;  %v14427_v55 = vmul.f32 %v14405_v30, %v5644_v60 }
 0x553   : > { %v12690_v21 = vpop.eup %12689  ;;  %v5893_v52 = vadd.f32 1.0, %v12688_v58  ;;  %12709 = vpow2.f32 %v9873_v33  ;;  %10852 = vmatprep.mubr.bf16.mxu1 %v14413_v15  ;;  %v9876_v54 = vmul.f32 -1.442695, %v5607_v22 }
 0x554   : > { %v12692_v51 = vpop.eup %12691  ;;  %12711 = vrcp.f32 %v5892_v1  ;;  %v5894_v8 = vadd.f32 1.0, %v12690_v21  ;;  %15128 = vst [vmem:[#allocation23_spill] sm:$0xff] %v14427_v55  ;;  %v5647_v21 = vld [vmem:[%s14200_s12 + $0xa0] sm:$0xff] }
 0x555   : > { %v12694_v43 = vpop.eup %12693  ;;  %12713 = vrcp.f32 %v5893_v52  ;;  %v5895_v17 = vadd.f32 1.0, %v12692_v51  ;;  %v5228_v29 = vpop.f32.mrb[52].mxu0 }
 0x556   : > { %v14421_v11 = vpop.eup %12695  ;;  %v14423_v45 = vmul.f32 %v12694_v43, %v5645_v10  ;;  %12715 = vrcp.f32 %v5894_v8  ;;  %v5609_v58 = vadd.f32 %v14169_v62, %v5228_v29  ;;  %v5230_v33 = vpop.f32.mrb[53].mxu0 }
 0x557   : > { %15127 = vst [vmem:[#allocation22_spill] sm:$0xff] %v14421_v11  ;;  %v12698_v1 = vpop.eup %12697  ;;  %12717 = vrcp.f32 %v5895_v17  ;;  %v5610_v52 = vadd.f32 %v14171_v40, %v5230_v33  ;;  %v5232_v32 = vpop.f32.mrb[54].mxu0  ;;  %v14432_v18 = vmul.f32 %v14421_v11, %v5645_v10  ;;  %v6169_v55 = vld [vmem:[#allocation2 + $0xd8] sm:$0xff] }
 0x558   : > { %v14434_v22 = vpop.eup %12699  ;;  %6137 = vst [vmem:[#allocation2 + $0xf1] sm:$0xff] %v14423_v45  ;;  %v14437_v51 = vmul.f32 %v12698_v1, %v5646_v7  ;;  %12719 = vpow2.f32 %v9874_v2  ;;  %v9877_v29 = vmul.f32 -1.442695, %v5609_v58  ;;  %v5234_v8 = vpop.f32.mrb[55].mxu0  ;;  %v5612_v17 = vadd.f32 %v14169_v62, %v5232_v32 }
 0x559   : > { %15129 = vst [vmem:[#allocation24_spill] sm:$0xff] %v14432_v18  ;;  %15130 = vst [vmem:[#allocation25_spill] sm:$0xff] %v14434_v22  ;;  %v12702_v60 = vpop.eup %12701  ;;  %12721 = vpow2.f32 %v9875_v36  ;;  %v9878_v43 = vmul.f32 -1.442695, %v5610_v52  ;;  %v6170_v33 = vld [vmem:[#allocation2 + $0xe0] sm:$0xff]  ;;  %v14441_v30 = vmul.f32 %v14434_v22, %v5646_v7  ;;  %v5613_v2 = vadd.f32 %v14171_v40, %v5234_v8 }
 0x55a   : > { %v12704_v10 = vpop.eup %12703  ;;  %6138 = vst [vmem:[#allocation2 + $0xf9] sm:$0xff] %v14437_v51  ;;  %v14444_v18 = vmul.f32 %v12702_v60, %v5647_v21  ;;  %12723 = vpow2.f32 %v9876_v54  ;;  %v14447_v58 = vpack.c.bf16 %v6170_v33, %v6169_v55  ;;  %v5648_v54 = vld [vmem:[%s14200_s12 + $0xa8] sm:$0xff]  ;;  %v9879_v55 = vmul.f32 -1.442695, %v5612_v17 }
 0x55b   : > { %15131 = vst [vmem:[#allocation26_spill] sm:$0xff] %v14441_v30  ;;  %v12706_v36 = vpop.eup %12705  ;;  %v5896_v1 = vadd.f32 1.0, %v12704_v10  ;;  %12725 = vpow2.f32 %v9877_v29  ;;  %v9880_v10 = vmul.f32 -1.442695, %v5613_v2 }
 0x55c   : > { %v12708_v32 = vpop.eup %12707  ;;  %6139 = vst [vmem:[#allocation2 + $0x109] sm:$0xff] %v14444_v18  ;;  %v5897_v7 = vadd.f32 1.0, %v12706_v36  ;;  %12727 = vpow2.f32 %v9878_v43  ;;  %10853 = vmatmul.mubr.bf16.gmra.mrb[16].mxu1 %v14447_v58  ;;  %v5649_v36 = vld [vmem:[%s14200_s12 + $0xb0] sm:$0xff] }
 0x55d   : > { %v12710_v60 = vpop.eup %12709  ;;  %12729 = vrcp.f32 %v5896_v1  ;;  %v5898_v8 = vadd.f32 1.0, %v12708_v32  ;;  %v5238_v33 = vpop.f32.mrb[56].mxu0 }
 0x55e   : > { %v14454_v30 = vpop.eup %12711  ;;  %12731 = vrcp.f32 %v5897_v7  ;;  %v5899_v29 = vadd.f32 1.0, %v12710_v60  ;;  %v5615_v52 = vadd.f32 %v14169_v62, %v5238_v33  ;;  %v5240_v22 = vpop.f32.mrb[57].mxu0 }
 0x55f   : > { %15132 = vst [vmem:[#allocation27_spill] sm:$0xff] %v14454_v30  ;;  %v12714_v11 = vpop.eup %12713  ;;  %12733 = vrcp.f32 %v5898_v8  ;;  %v5616_v43 = vadd.f32 %v14171_v40, %v5240_v22  ;;  %v5242_v20 = vpop.f32.mrb[58].mxu0  ;;  %v14460_v26 = vmul.f32 %v14454_v30, %v5647_v21  ;;  %v6171_v56 = vld [vmem:[#allocation2 + $0xf0] sm:$0xff] }
 0x560   : > { %v14462_v1 = vpop.eup %12715  ;;  %v14464_v17 = vmul.f32 %v12714_v11, %v5648_v54  ;;  %12735 = vrcp.f32 %v5899_v29  ;;  %v9881_v32 = vmul.f32 -1.442695, %v5615_v52  ;;  %v5244_v7 = vpop.f32.mrb[59].mxu0  ;;  %v5618_v33 = vadd.f32 %v14169_v62, %v5242_v20 }
 0x561   : > { %15133 = vst [vmem:[#allocation28_spill] sm:$0xff] %v14460_v26  ;;  %15134 = vst [vmem:[#allocation29_spill] sm:$0xff] %v14462_v1  ;;  %v12718_v2 = vpop.eup %12717  ;;  %12737 = vpow2.f32 %v9879_v55  ;;  %v9882_v60 = vmul.f32 -1.442695, %v5616_v43  ;;  %v6172_v8 = vld [vmem:[#allocation2 + $0xf8] sm:$0xff]  ;;  %v5619_v52 = vadd.f32 %v14171_v40, %v5244_v7  ;;  %v14480_v30 = vmul.f32 %v14462_v1, %v5648_v54 }
 0x562   : > { %v12720_v12 = vpop.eup %12719  ;;  %6140 = vst [vmem:[#allocation2 + $0x111] sm:$0xff] %v14464_v17  ;;  %v14468_v22 = vmul.f32 %v12718_v2, %v5649_v36  ;;  %12739 = vpow2.f32 %v9880_v10  ;;  %v14470_v21 = vpack.c.bf16 %v6172_v8, %v6171_v56  ;;  %v9883_v10 = vmul.f32 -1.442695, %v5618_v33 }
 0x563   : > { %v12722_v11 = vpop.eup %12721  ;;  %v5900_v29 = vadd.f32 1.0, %v12720_v12  ;;  %12741 = vpow2.f32 %v9881_v32  ;;  %v5650_v32 = vld [vmem:[%s14200_s12 + $0xb8] sm:$0xff]  ;;  %15135 = vst [vmem:[#allocation30_spill] sm:$0xff] %v14480_v30  ;;  %v9884_v0 = vmul.f32 -1.442695, %v5619_v52 }
 0x564   : > { %v12724_v20 = vpop.eup %12723  ;;  %6141 = vst [vmem:[#allocation2 + $0x121] sm:$0xff] %v14468_v22  ;;  %v5901_v43 = vadd.f32 1.0, %v12722_v11  ;;  %12743 = vpow2.f32 %v9882_v60  ;;  %10856 = vmatprep.mubr.bf16.mxu1 %v14470_v21 }
 0x565   : > { %v12726_v2 = vpop.eup %12725  ;;  %12745 = vrcp.f32 %v5900_v29  ;;  %v5902_v56 = vadd.f32 1.0, %v12724_v20  ;;  %v5248_v8 = vpop.f32.mrb[60].mxu0 }
 0x566   : > { %v12728_v12 = vpop.eup %12727  ;;  %12747 = vrcp.f32 %v5901_v43  ;;  %v5903_v7 = vadd.f32 1.0, %v12726_v2  ;;  %v5621_v26 = vadd.f32 %v14169_v62, %v5248_v8  ;;  %v5250_v55 = vpop.f32.mrb[61].mxu0 }
 0x567   : > { %v14482_v11 = vpop.eup %12729  ;;  %12749 = vrcp.f32 %v5902_v56  ;;  %v5904_v60 = vadd.f32 1.0, %v12728_v12  ;;  %v5622_v29 = vadd.f32 %v14171_v40, %v5250_v55  ;;  %v5252_v33 = vpop.f32.mrb[62].mxu0  ;;  %v6173_v56 = vld [vmem:[#allocation2 + $0x108] sm:$0xff] }
 0x568   : > { %15136 = vst [vmem:[#allocation31_spill] sm:$0xff] %v14482_v11  ;;  %v12732_v20 = vpop.eup %12731  ;;  %12751 = vrcp.f32 %v5903_v7  ;;  %v9885_v9 = vmul.f32 -1.442695, %v5621_v26  ;;  %v5254_v43 = vpop.f32.mrb[63].mxu0  ;;  %v14487_v2 = vmul.f32 %v14482_v11, %v5649_v36  ;;  %v5624_v55 = vadd.f32 %v14169_v62, %v5252_v33 }
 0x569   : > { %v14489_v8 = vpop.eup %12733  ;;  %v14491_v54 = vmul.f32 %v12732_v20, %v5650_v32  ;;  %12753 = vrcp.f32 %v5904_v60  ;;  %v9886_v30 = vmul.f32 -1.442695, %v5622_v29  ;;  %v6174_v12 = vld [vmem:[#allocation2 + $0x110] sm:$0xff]  ;;  %v5625_v7 = vadd.f32 %v14171_v40, %v5254_v43 }
 0x56a   : > { %15137 = vst [vmem:[#allocation32_spill] sm:$0xff] %v14487_v2  ;;  %15138 = vst [vmem:[#allocation33_spill] sm:$0xff] %v14489_v8  ;;  %v12736_v52 = vpop.eup %12735  ;;  %12755 = vpow2.f32 %v9883_v10  ;;  %v14494_v1 = vpack.c.bf16 %v6174_v12, %v6173_v56  ;;  %v5652_v56 = vld [vmem:[%s14200_s12 + $0xc8] sm:$0xff]  ;;  %v9887_v12 = vmul.f32 -1.442695, %v5624_v55  ;;  %v14506_v40 = vmul.f32 %v14489_v8, %v5650_v32  ;;  %v5653_v60 = vld [vmem:[%s14200_s12 + $0xd0] sm:$0xff] }
 0x56b   : > { %v12738_v26 = vpop.eup %12737  ;;  %6142 = vst [vmem:[#allocation2 + $0x129] sm:$0xff] %v14491_v54  ;;  %v14497_v36 = vmul.f32 %v12736_v52, %v5651_v13  ;;  %12757 = vpow2.f32 %v9884_v0  ;;  %v9888_v52 = vmul.f32 -1.442695, %v5625_v7  ;;  %v6175_v32 = vld [vmem:[#allocation2 + $0x120] sm:$0xff] }
 0x56c   : > { %v12740_v29 = vpop.eup %12739  ;;  %v5905_v20 = vadd.f32 1.0, %v12738_v26  ;;  %12759 = vpow2.f32 %v9885_v9  ;;  %10857 = vmatmul.mubr.bf16.gmra.mrb[20].mxu1 %v14494_v1  ;;  %15139 = vst [vmem:[#allocation34_spill] sm:$0xff] %v14506_v40 }
 0x56d   : > { %v12742_v62 = vpop.eup %12741  ;;  %6143 = vst [vmem:[#allocation2 + $0x139] sm:$0xff] %v14497_v36  ;;  %v5906_v10 = vadd.f32 1.0, %v12740_v29  ;;  %12761 = vpow2.f32 %v9886_v30 }
 0x56e   : > { %v12744_v33 = vpop.eup %12743  ;;  %12763 = vrcp.f32 %v5905_v20  ;;  %v5907_v0 = vadd.f32 1.0, %v12742_v62 }
 0x56f   : > { %v14508_v43 = vpop.eup %12745  ;;  %12765 = vrcp.f32 %v5906_v10  ;;  %v5908_v9 = vadd.f32 1.0, %v12744_v33 }
 0x570   : > { %15140 = vst [vmem:[#allocation35_spill] sm:$0xff] %v14508_v43  ;;  %v12748_v26 = vpop.eup %12747  ;;  %12767 = vrcp.f32 %v5907_v0  ;;  %v14512_v2 = vmul.f32 %v14508_v43, %v5651_v13 }
 0x571   : > { %v14514_v30 = vpop.eup %12749  ;;  %v14516_v29 = vmul.f32 %v12748_v26, %v5652_v56  ;;  %12769 = vrcp.f32 %v5908_v9 }
 0x572   : > { %15141 = vst [vmem:[#allocation36_spill] sm:$0xff] %v14512_v2  ;;  %15142 = vst [vmem:[#allocation37_spill] sm:$0xff] %v14514_v30  ;;  %v12752_v55 = vpop.eup %12751  ;;  %12771 = vpow2.f32 %v9887_v12  ;;  %v6176_v20 = vld [vmem:[#allocation2 + $0x128] sm:$0xff]  ;;  %v14519_v62 = vmul.f32 %v14514_v30, %v5652_v56  ;;  %v5655_v2 = vld [vmem:[%s14200_s12 + $0xe0] sm:$0xff] }
 0x573   : > { %v14521_v7 = vpop.eup %12753  ;;  %6144 = vst [vmem:[#allocation2 + $0x141] sm:$0xff] %v14516_v29  ;;  %v14524_v10 = vmul.f32 %v12752_v55, %v5653_v60  ;;  %12773 = vpow2.f32 %v9888_v52  ;;  %v14526_v13 = vpack.c.bf16 %v6176_v20, %v6175_v32  ;;  %v5654_v55 = vld [vmem:[%s14200_s12 + $0xd8] sm:$0xff] }
 0x574   : > { %15143 = vst [vmem:[#allocation38_spill] sm:$0xff] %v14519_v62  ;;  %15144 = vst [vmem:[#allocation39_spill] sm:$0xff] %v14521_v7  ;;  %v12756_v0 = vpop.eup %12755  ;;  %v14531_v12 = vmul.f32 %v14521_v7, %v5653_v60 }
 0x575   : > { %v12758_v9 = vpop.eup %12757  ;;  %6145 = vst [vmem:[#allocation2 + $0x151] sm:$0xff] %v14524_v10  ;;  %v5909_v56 = vadd.f32 1.0, %v12756_v0  ;;  %10860 = vmatprep.mubr.bf16.mxu1 %v14526_v13  ;;  %v6177_v0 = vld [vmem:[#allocation2 + $0x138] sm:$0xff] }
 0x576   : > { %15145 = vst [vmem:[#allocation40_spill] sm:$0xff] %v14531_v12  ;;  %v12760_v26 = vpop.eup %12759  ;;  %v5910_v62 = vadd.f32 1.0, %v12758_v9 }
 0x577   : > { %v12762_v52 = vpop.eup %12761  ;;  %12775 = vrcp.f32 %v5909_v56  ;;  %v5911_v32 = vadd.f32 1.0, %v12760_v26 }
 0x578   : > { %v12764_v20 = vpop.eup %12763  ;;  %12777 = vrcp.f32 %v5910_v62  ;;  %v5912_v33 = vadd.f32 1.0, %v12762_v52 }
 0x579   : > { %v14537_v30 = vpop.eup %12765  ;;  %v14539_v60 = vmul.f32 %v12764_v20, %v5654_v55  ;;  %12779 = vrcp.f32 %v5911_v32 }
 0x57a   : > { %15146 = vst [vmem:[#allocation41_spill] sm:$0xff] %v14537_v30  ;;  %v12768_v12 = vpop.eup %12767  ;;  %12781 = vrcp.f32 %v5912_v33  ;;  %v6178_v43 = vld [vmem:[#allocation2 + $0x140] sm:$0xff]  ;;  %v14542_v7 = vmul.f32 %v14537_v30, %v5654_v55 }
 0x57b   : > { %v14544_v9 = vpop.eup %12769  ;;  %6146 = vst [vmem:[#allocation2 + $0x159] sm:$0xff] %v14539_v60  ;;  %v6114_v62 = vmul.f32 %v12768_v12, %v5655_v2  ;;  %v14547_v56 = vpack.c.bf16 %v6178_v43, %v6177_v0  ;;  %v5657_v43 = vld [vmem:[%s14200_s12 + $0xf0] sm:$0xff] }
 0x57c   : > { %15147 = vst [vmem:[#allocation42_spill] sm:$0xff] %v14542_v7  ;;  %15148 = vst [vmem:[#allocation43_spill] sm:$0xff] %v14544_v9  ;;  %v12772_v52 = vpop.eup %12771  ;;  %v14552_v33 = vmul.f32 %v14544_v9, %v5655_v2  ;;  %v5656_v7 = vld [vmem:[%s14200_s12 + $0xe8] sm:$0xff]  ;;  %v6179_v26 = vld [vmem:[#allocation2 + $0x150] sm:$0xff] }
 0x57d   : > { %v12774_v32 = vpop.eup %12773  ;;  %6147 = vst [vmem:[#allocation2 + $0x169] sm:$0xff] %v6114_v62  ;;  %v5913_v20 = vadd.f32 1.0, %v12772_v52  ;;  %10861 = vmatmul.mubr.bf16.gmra.mrb[24].mxu1 %v14547_v56 }
 0x57e   : > { %15149 = vst [vmem:[#allocation44_spill] sm:$0xff] %v14552_v33  ;;  %v5914_v55 = vadd.f32 1.0, %v12774_v32 }
 0x57f   : > { %12783 = vrcp.f32 %v5913_v20 }
 0x580   : > { %12785 = vrcp.f32 %v5914_v55 }
 0x581   : > { %v12776_v30 = vpop.eup %12775 }
 0x582   : > { %v14557_v12 = vpop.eup %12777  ;;  %v6115_v0 = vmul.f32 %v12776_v30, %v5656_v7  ;;  %v6180_v40 = vld [vmem:[#allocation2 + $0x158] sm:$0xff] }
 0x583   : > { %15150 = vst [vmem:[#allocation45_spill] sm:$0xff] %v14557_v12  ;;  %v12780_v8 = vpop.eup %12779  ;;  %v14559_v2 = vpack.c.bf16 %v6180_v40, %v6179_v26  ;;  %v14562_v33 = vmul.f32 %v14557_v12, %v5656_v7  ;;  %v5658_v30 = vld [vmem:[%s14200_s12 + $0xf8] sm:$0xff]  ;;  %v6456_v40 = vld [vmem:[#allocation2 + $0x1] sm:$0xff]  ;;  %v6457_v26 = vld [vmem:[#allocation2 + $0x9] sm:$0xff] }
 0x584   : > { %v14564_v52 = vpop.eup %12781  ;;  %6148 = vst [vmem:[#allocation2 + $0x171] sm:$0xff] %v6115_v0  ;;  %v14566_v32 = vmul.f32 %v12780_v8, %v5657_v43  ;;  %v14568_v20 = vpack.c.bf16 %v6115_v0, %v6114_v62  ;;  %v6181_v12 = vld [vmem:[#allocation2 + $0x168] sm:$0xff]  ;;  %v6488_v11 = vpack.c.bf16 %v6457_v26, %v6456_v40  ;;  %v7071_v0 = vld [vmem:[#allocation2 + $0x38] sm:$0xff] }
 0x585   : > { %15151 = vst [vmem:[#allocation46_spill] sm:$0xff] %v14562_v33  ;;  %15152 = vst [vmem:[#allocation47_spill] sm:$0xff] %v14564_v52  ;;  %10864 = vmatprep.mubr.bf16.mxu1 %v14559_v2  ;;  %v14572_v55 = vmul.f32 %v14564_v52, %v5657_v43  ;;  %v6461_v52 = vld [vmem:[#allocation2 + $0x39] sm:$0xff]  ;;  %v6462_v26 = vld [vmem:[#allocation2 + $0x49] sm:$0xff] }
 0x586   : > { %6149 = vst [vmem:[#allocation2 + $0x181] sm:$0xff] %v14566_v32  ;;  %v14594_v40 = vpack.c.bf16 %v6461_v52, %v6460_v25  ;;  %v12478_v25 = vld [vmem:[%s15081_s3 + $0x98] sm:$0xff]  }
 0x587   : > { %15153 = vst [vmem:[#allocation48_spill] sm:$0xff] %v14572_v55  ;;  %v6459_v55 = vld [vmem:[#allocation2 + $0x21] sm:$0xff] }
 0x589   : > { %v12784_v9 = vpop.eup %12783 }
 0x58a   : > { %v14576_v7 = vpop.eup %12785  ;;  %v14578_v33 = vmul.f32 %v12784_v9, %v5658_v30  ;;  %v6458_v9 = vld [vmem:[#allocation2 + $0x19] sm:$0xff] }
 0x58b   : > { %15154 = vst [vmem:[#allocation49_spill] sm:$0xff] %v14576_v7  ;;  %v6182_v8 = vld [vmem:[#allocation2 + $0x170] sm:$0xff]  ;;  %v14581_v62 = vmul.f32 %v14576_v7, %v5658_v30  ;;  %v14589_v41 = vpack.c.bf16 %v6459_v55, %v6458_v9  ;;  %v12476_v30 = vld [vmem:[%s15081_s3 + $0x88] sm:$0xff]  }
 0x58c   : > { %6150 = vst [vmem:[#allocation2 + $0x189] sm:$0xff] %v14578_v33  ;;  %v14584_v43 = vpack.c.bf16 %v6182_v8, %v6181_v12  ;;  %v6463_v12 = vld [vmem:[#allocation2 + $0x51] sm:$0xff]  ;;  %v6465_v55 = vld [vmem:[#allocation2 + $0x69] sm:$0xff]  ;;  %v6464_v9 = vld [vmem:[#allocation2 + $0x61] sm:$0xff] }
 0x58d   : > { %15155 = vst [vmem:[#allocation50_spill] sm:$0xff] %v14581_v62  ;;  %v14602_v8 = vpack.c.bf16 %v6463_v12, %v6462_v26  ;;  %v14607_v52 = vpack.c.bf16 %v6465_v55, %v6464_v9  ;;  %v6466_v12 = vld [vmem:[#allocation2 + $0x79] sm:$0xff]  ;;  %v12480_v55 = vld [vmem:[%s15081_s3 + $0xa8] sm:$0xff]   ;;  %v12481_v9 = vld [vmem:[%s15081_s3 + $0xb0] sm:$0xff]  }
 0x58e   : > { %10865 = vmatmul.mubr.bf16.gmra.mrb[28].mxu1 %v14584_v43  ;;  %v7073_v62 = vld [vmem:[#allocation2 + $0x50] sm:$0xff] }
 0x58f   : > { %10884 = vmatprep.mubr.bf16.mxu1 %v6488_v11  ;;  %v12477_v11 = vld [vmem:[%s15081_s3 + $0x90] sm:$0xff]  }
 0x596   : > { %10885 = vmatmul.mubr.bf16.vlgmr.msra.gmra.mrb[0].mxu1 %v14589_v41 }
 0x597   : > { %10888 = vmatprep.mubr.bf16.mxu1 %v14594_v40  ;;  %10917 = vmatpush3.bf16.msra.mxu1 %v14310_v39  ;;  %v12479_v39 = vld [vmem:[%s15081_s3 + $0xa0] sm:$0xff]  }
 0x598   : > { %10918 = vmatprep.subr.bf16.mxu1 %v12476_v30 }
 0x59b   : > { %10919 = vmatpush3.bf16.msra.mxu1 %v12476_v30  ;;  %v6467_v30 = vld [vmem:[#allocation2 + $0x81] sm:$0xff] }
 0x59c   : > { %10920 = vmatprep.subr.bf16.mxu1 %v12477_v11  ;;  %v14614_v26 = vpack.c.bf16 %v6467_v30, %v6466_v12  ;;  %v15157_v30 = vpack.c.bf16 %v14354_v38, %v14345_v6  ;;  %v15160_v6 = vpack.c.bf16 %v14437_v51, %v14423_v45  ;;  %v15161_v38 = vpack.c.bf16 %v14464_v17, %v14444_v18  ;;  %v6763_v12 = vld [vmem:[#allocation2 + $0xa] sm:$0xff]  ;;  %v6764_v18 = vld [vmem:[#allocation2 + $0x1a] sm:$0xff]  ;;  %v6765_v51 = vld [vmem:[#allocation2 + $0x22] sm:$0xff] }
 0x59d   : > { %v6766_v17 = vld [vmem:[#allocation2 + $0x32] sm:$0xff] }
 0x59e   : > { %10889 = vmatmul.mubr.bf16.gmra.mrb[4].mxu1 %v14602_v8 }
 0x59f   : > { %10892 = vmatprep.mubr.bf16.mxu1 %v14607_v52  ;;  %10921 = vmatpush3.bf16.msra.mxu1 %v12477_v11  ;;  %v15156_v11 = vpack.c.bf16 %v14325_v35, %v14314_v34  ;;  %v15158_v34 = vpack.c.bf16 %v14381_v14, %v14369_v57  ;;  %v12483_v35 = vld [vmem:[%s15081_s3 + $0xc0] sm:$0xff]   ;;  %v15162_v57 = vpack.c.bf16 %v14491_v54, %v14468_v22  ;;  %v12484_v54 = vld [vmem:[%s15081_s3 + $0xc8] sm:$0xff]  }
 0x5a0   : > { %10922 = vmatprep.subr.bf16.mxu1 %v12478_v25  ;;  %v15163_v14 = vpack.c.bf16 %v14516_v29, %v14497_v36  ;;  %v14657_v22 = vpack.c.bf16 %v6765_v51, %v6764_v18  ;;  %v12485_v29 = vld [vmem:[%s15081_s3 + $0xd0] sm:$0xff]   ;;  %v6778_v51 = vld [vmem:[#allocation2 + $0xc2] sm:$0xff] }
 0x5a1   : > { %v6777_v18 = vld [vmem:[#allocation2 + $0xb2] sm:$0xff] }
 0x5a3   : > { %10923 = vmatpush3.bf16.msra.mxu1 %v12478_v25  ;;  %v12482_v25 = vld [vmem:[%s15081_s3 + $0xb8] sm:$0xff]  }
 0x5a4   : > { %10924 = vmatprep.subr.bf16.mxu1 %v12479_v39 }
 0x5a6   : > { %10893 = vmatmul.mubr.bf16.gmra.mrb[8].mxu1 %v14614_v26 }
 0x5a7   : > { %10896 = vmatprep.mubr.bf16.mxu1 %v15156_v11  ;;  %10925 = vmatpush3.bf16.msra.mxu1 %v12479_v39  ;;  %v15159_v39 = vpack.c.bf16 %v14408_v42, %v14399_v47  ;;  %v15164_v47 = vpack.c.bf16 %v14539_v60, %v14524_v10  ;;  %v6762_v42 = vld [vmem:[#allocation2 + $0x2] sm:$0xff]  ;;  %v6768_v10 = vld [vmem:[#allocation2 + $0x4a] sm:$0xff]  ;;  %v6769_v60 = vld [vmem:[#allocation2 + $0x52] sm:$0xff] }
 0x5a8   : > { %10926 = vmatprep.subr.bf16.mxu1 %v12480_v55  ;;  %v6794_v45 = vpack.c.bf16 %v6763_v12, %v6762_v42  ;;  %v6770_v11 = vld [vmem:[#allocation2 + $0x62] sm:$0xff]  ;;  %v12489_v12 = vld [vmem:[%s15081_s3 + $0xf0] sm:$0xff]  }
 0x5ab   : > { %10927 = vmatpush3.bf16.msra.mxu1 %v12480_v55  ;;  %v6767_v55 = vld [vmem:[#allocation2 + $0x3a] sm:$0xff] }
 0x5ac   : > { %10928 = vmatprep.subr.bf16.mxu1 %v12481_v9  ;;  %v14662_v36 = vpack.c.bf16 %v6767_v55, %v6766_v17  ;;  %v6779_v17 = vld [vmem:[#allocation2 + $0xca] sm:$0xff] }
 0x5ae   : > { %10897 = vmatmul.mubr.bf16.gmra.mrb[12].mxu1 %v15157_v30  ;;  %v12486_v30 = vld [vmem:[%s15081_s3 + $0xd8] sm:$0xff]  }
 0x5af   : > { %10900 = vmatprep.mubr.bf16.mxu1 %v15158_v34  ;;  %10929 = vmatpush3.bf16.msra.mxu1 %v12481_v9  ;;  %v6771_v9 = vld [vmem:[#allocation2 + $0x6a] sm:$0xff] }
 0x5b0   : > { %10930 = vmatprep.subr.bf16.mxu1 %v12482_v25  ;;  %v14674_v34 = vpack.c.bf16 %v6771_v9, %v6770_v11  ;;  %v6781_v11 = vld [vmem:[#allocation2 + $0xe2] sm:$0xff]  ;;  %v6782_v9 = vld [vmem:[#allocation2 + $0xf2] sm:$0xff] }
 0x5b3   : > { %10931 = vmatpush3.bf16.msra.mxu1 %v12482_v25  ;;  %v14669_v25 = vpack.c.bf16 %v6769_v60, %v6768_v10  ;;  %v12491_v10 = vld [vmem:[%s15081_s3 + $0x100] sm:$0xff]  }
 0x5b4   : > { %10964 = vmatprep.subr.bf16.mxu1 %v12483_v35  ;;  %v6780_v60 = vld [vmem:[#allocation2 + $0xda] sm:$0xff] }
 0x5b6   : > { %10901 = vmatmul.mubr.bf16.gmra.mrb[16].mxu1 %v15159_v39  ;;  %v6772_v39 = vld [vmem:[#allocation2 + $0x7a] sm:$0xff] }
 0x5b7   : > { %10904 = vmatprep.mubr.bf16.mxu1 %v15160_v6  ;;  %v6773_v6 = vld [vmem:[#allocation2 + $0x82] sm:$0xff] }
 0x5be   : > { %10905 = vmatmul.mubr.bf16.gmra.mrb[20].mxu1 %v15161_v38  ;;  %v6774_v38 = vld [vmem:[#allocation2 + $0x92] sm:$0xff] }
 0x5bf   : > { %10908 = vmatprep.mubr.bf16.mxu1 %v15162_v57  ;;  %v6775_v57 = vld [vmem:[#allocation2 + $0x9a] sm:$0xff] }
 0x5c0   : > { %v14686_v42 = vpack.c.bf16 %v6775_v57, %v6774_v38  ;;  %v6785_v38 = vld [vmem:[#allocation2 + $0x112] sm:$0xff]  ;;  %v6786_v57 = vld [vmem:[#allocation2 + $0x122] sm:$0xff] }
 0x5c6   : > { %10909 = vmatmul.mubr.bf16.gmra.mrb[24].mxu1 %v15163_v14  ;;  %v14681_v14 = vpack.c.bf16 %v6773_v6, %v6772_v39  ;;  %v6784_v6 = vld [vmem:[#allocation2 + $0x10a] sm:$0xff] }
 0x5c7   : > { %10912 = vmatprep.mubr.bf16.mxu1 %v15164_v47  ;;  %v12488_v47 = vld [vmem:[%s15081_s3 + $0xe8] sm:$0xff]  }
 0x5ce   : > { %10913 = vmatmul.mubr.bf16.gmra.mrb[28].mxu1 %v14568_v20 }
 0x5cf   : > { %10932 = vmatprep.mubr.bf16.mxu1 %v6794_v45  ;;  %v6776_v45 = vld [vmem:[#allocation2 + $0xaa] sm:$0xff] }
 0x5d0   : > { %v14693_v55 = vpack.c.bf16 %v6777_v18, %v6776_v45  ;;  %v6788_v18 = vld [vmem:[#allocation2 + $0x13a] sm:$0xff] }
 0x5d6   : > { %10933 = vmatmul.mubr.bf16.vlgmr.msra.gmra.mrb[0].mxu1 %v14657_v22 }
 0x5d7   : > { %10936 = vmatprep.mubr.bf16.mxu1 %v14662_v36  ;;  %10965 = vmatpush3.bf16.msra.mxu1 %v12483_v35  ;;  %v12487_v35 = vld [vmem:[%s15081_s3 + $0xe0] sm:$0xff]  }
 0x5d8   : > { %10966 = vmatprep.subr.bf16.mxu1 %v12484_v54 }
 0x5db   : > { %10967 = vmatpush3.bf16.msra.mxu1 %v12484_v54  ;;  %v12490_v54 = vld [vmem:[%s15081_s3 + $0xf8] sm:$0xff]  }
 0x5dc   : > { %10968 = vmatprep.subr.bf16.mxu1 %v12485_v29 }
 0x5de   : > { %10937 = vmatmul.mubr.bf16.gmra.mrb[4].mxu1 %v14669_v25 }
 0x5df   : > { %10940 = vmatprep.mubr.bf16.mxu1 %v14674_v34  ;;  %10969 = vmatpush3.bf16.msra.mxu1 %v12485_v29  ;;  %v14698_v29 = vpack.c.bf16 %v6779_v17, %v6778_v51  ;;  %v6789_v51 = vld [vmem:[#allocation2 + $0x142] sm:$0xff]  ;;  %v6790_v17 = vld [vmem:[#allocation2 + $0x152] sm:$0xff] }
 0x5e0   : > { %10970 = vmatprep.subr.bf16.mxu1 %v12486_v30 }
 0x5e3   : > { %10971 = vmatpush3.bf16.msra.mxu1 %v12486_v30  ;;  %v6783_v30 = vld [vmem:[#allocation2 + $0xfa] sm:$0xff] }
 0x5e4   : > { %10972 = vmatprep.subr.bf16.mxu1 %v12487_v35  ;;  %v14707_v39 = vpack.c.bf16 %v6783_v30, %v6782_v9  ;;  %v6792_v9 = vld [vmem:[#allocation2 + $0x16a] sm:$0xff]  ;;  %v6793_v30 = vld [vmem:[#allocation2 + $0x172] sm:$0xff] }
 0x5e6   : > { %10941 = vmatmul.mubr.bf16.gmra.mrb[8].mxu1 %v14681_v14 }
 0x5e7   : > { %10944 = vmatprep.mubr.bf16.mxu1 %v14686_v42  ;;  %10973 = vmatpush3.bf16.msra.mxu1 %v12487_v35  ;;  %v14705_v35 = vpack.c.bf16 %v6781_v11, %v6780_v60  ;;  %v14717_v60 = vpack.c.bf16 %v6789_v51, %v6788_v18  ;;  %v7070_v18 = vld [vmem:[#allocation2 + $0x30] sm:$0xff] }
 0x5e8   : > { %10974 = vmatprep.subr.bf16.mxu1 %v12488_v47  ;;  %v14726_v51 = vpack.c.bf16 %v7071_v0, %v7070_v18  ;;  %v7074_v0 = vld [vmem:[#allocation2 + $0x60] sm:$0xff] }
 0x5eb   : > { %10975 = vmatpush3.bf16.msra.mxu1 %v12488_v47  ;;  %v6787_v47 = vld [vmem:[#allocation2 + $0x12a] sm:$0xff] }
 0x5ec   : > { %10976 = vmatprep.subr.bf16.mxu1 %v12489_v12  ;;  %v14713_v45 = vpack.c.bf16 %v6787_v47, %v6786_v57  ;;  %v7068_v57 = vld [vmem:[#allocation2 + $0x18] sm:$0xff] }
 0x5ee   : > { %10945 = vmatmul.mubr.bf16.gmra.mrb[12].mxu1 %v14693_v55 }
 0x5ef   : > { %10948 = vmatprep.mubr.bf16.mxu1 %v14698_v29  ;;  %10977 = vmatpush3.bf16.msra.mxu1 %v12489_v12  ;;  %v14711_v12 = vpack.c.bf16 %v6785_v38, %v6784_v6  ;;  %v7069_v6 = vld [vmem:[#allocation2 + $0x20] sm:$0xff]  ;;  %v14723_v38 = vpack.c.bf16 %v6793_v30, %v6792_v9  ;;  %v12493_v9 = vld [vmem:[%s15081_s3 + $0x110] sm:$0xff]   ;;  %v7075_v30 = vld [vmem:[#allocation2 + $0x68] sm:$0xff] }
 0x5f0   : > { %10978 = vmatprep.subr.bf16.mxu1 %v12490_v54  ;;  %v7100_v47 = vpack.c.bf16 %v7069_v6, %v7068_v57  ;;  %v14738_v6 = vpack.c.bf16 %v7075_v30, %v7074_v0  ;;  %v12496_v57 = vld [vmem:[%s15081_s3 + $0x128] sm:$0xff]   ;;  %v7390_v0 = vld [vmem:[#allocation2 + $0xd9] sm:$0xff] }
 0x5f3   : > { %10979 = vmatpush3.bf16.msra.mxu1 %v12490_v54  ;;  %v6791_v54 = vld [vmem:[#allocation2 + $0x15a] sm:$0xff] }
 0x5f4   : > { %11012 = vmatprep.subr.bf16.mxu1 %v12491_v10  ;;  %v14719_v11 = vpack.c.bf16 %v6791_v54, %v6790_v17  ;;  %v7072_v17 = vld [vmem:[#allocation2 + $0x48] sm:$0xff] }
 0x5f5   : > { %v12492_v54 = vld [vmem:[%s15081_s3 + $0x108] sm:$0xff]   ;;  %v14731_v7 = vpack.c.bf16 %v7073_v62, %v7072_v17  ;;  %v12494_v62 = vld [vmem:[%s15081_s3 + $0x118] sm:$0xff]  }
 0x5f6   : > { %10949 = vmatmul.mubr.bf16.gmra.mrb[16].mxu1 %v14705_v35  ;;  %v7389_v17 = vld [vmem:[#allocation2 + $0xc9] sm:$0xff] }
 0x5f7   : > { %10952 = vmatprep.mubr.bf16.mxu1 %v14707_v39 }
 0x5fe   : > { %10953 = vmatmul.mubr.bf16.gmra.mrb[20].mxu1 %v14711_v12 }
 0x5ff   : > { %10956 = vmatprep.mubr.bf16.mxu1 %v14713_v45 }
 0x606   : > { %10957 = vmatmul.mubr.bf16.gmra.mrb[24].mxu1 %v14717_v60 }
 0x607   : > { %10960 = vmatprep.mubr.bf16.mxu1 %v14719_v11 }
 0x60e   : > { %10961 = vmatmul.mubr.bf16.gmra.mrb[28].mxu1 %v14723_v38 }
 0x60f   : > { %10980 = vmatprep.mubr.bf16.mxu1 %v7100_v47  ;;  %v12498_v47 = vld [vmem:[%s15081_s3 + $0x138] sm:$0xff]  }
 0x616   : > { %10981 = vmatmul.mubr.bf16.vlgmr.msra.gmra.mrb[0].mxu1 %v14726_v51 }
 0x617   : > { %10984 = vmatprep.mubr.bf16.mxu1 %v14731_v7  ;;  %11013 = vmatpush3.bf16.msra.mxu1 %v12491_v10  ;;  %v12495_v10 = vld [vmem:[%s15081_s3 + $0x120] sm:$0xff]  }
 0x618   : > { %11014 = vmatprep.subr.bf16.mxu1 %v12492_v54 }
 0x61b   : > { %11015 = vmatpush3.bf16.msra.mxu1 %v12492_v54  ;;  %v7391_v54 = vld [vmem:[#allocation2 + $0xe1] sm:$0xff] }
 0x61c   : > { %11016 = vmatprep.subr.bf16.mxu1 %v12493_v9 }
 0x61e   : > { %10985 = vmatmul.mubr.bf16.gmra.mrb[4].mxu1 %v14738_v6 }
 0x61f   : > { %10988 = vmatprep.mubr.bf16.mxu1 %v14337_v49  ;;  %11017 = vmatpush3.bf16.msra.mxu1 %v12493_v9  ;;  %v12497_v49 = vld [vmem:[%s15081_s3 + $0x130] sm:$0xff]   ;;  %v7388_v9 = vld [vmem:[#allocation2 + $0xc1] sm:$0xff] }
 0x620   : > { %11018 = vmatprep.subr.bf16.mxu1 %v12494_v62  ;;  %v14802_v30 = vpack.c.bf16 %v7389_v17, %v7388_v9  ;;  %v15165_v17 = vpack.c.bf16 %v14578_v33, %v14566_v32  ;;  %v12510_v33 = vld [vmem:[%s15081_s3 + $0x198] sm:$0xff]   ;;  %v12511_v32 = vld [vmem:[%s15081_s3 + $0x1a0] sm:$0xff]   ;;  %v8000_v9 = vld [vmem:[#allocation2 + $0xc8] sm:$0xff] }
 0x623   : > { %11019 = vmatpush3.bf16.msra.mxu1 %v12494_v62  ;;  %v12506_v62 = vld [vmem:[%s15081_s3 + $0x178] sm:$0xff]  }
 0x624   : > { %11020 = vmatprep.subr.bf16.mxu1 %v12495_v10 }
 0x626   : > { %10989 = vmatmul.mubr.bf16.gmra.mrb[8].mxu1 %v14358_v37  ;;  %v12499_v37 = vld [vmem:[%s15081_s3 + $0x140] sm:$0xff]  }
 0x627   : > { %10992 = vmatprep.mubr.bf16.mxu1 %v14390_v50  ;;  %11021 = vmatpush3.bf16.msra.mxu1 %v12495_v10  ;;  %v7099_v50 = vld [vmem:[#allocation2 + $0x188] sm:$0xff]  ;;  %v14807_v10 = vpack.c.bf16 %v7391_v54, %v7390_v0 }
 0x628   : > { %11022 = vmatprep.subr.bf16.mxu1 %v12496_v57  ;;  %v12508_v54 = vld [vmem:[%s15081_s3 + $0x188] sm:$0xff]  }
 0x629   : > { %v7997_v0 = vld [vmem:[#allocation2 + $0xa8] sm:$0xff] }
 0x62b   : > { %11023 = vmatpush3.bf16.msra.mxu1 %v12496_v57  ;;  %v12507_v57 = vld [vmem:[%s15081_s3 + $0x180] sm:$0xff]  }
 0x62c   : > { %11024 = vmatprep.subr.bf16.mxu1 %v12497_v49 }
 0x62e   : > { %10993 = vmatmul.mubr.bf16.gmra.mrb[12].mxu1 %v14413_v15  ;;  %v7098_v15 = vld [vmem:[#allocation2 + $0x180] sm:$0xff] }
 0x62f   : > { %10996 = vmatprep.mubr.bf16.mxu1 %v14447_v58  ;;  %11025 = vmatpush3.bf16.msra.mxu1 %v12497_v49  ;;  %v14770_v58 = vpack.c.bf16 %v7099_v50, %v7098_v15  ;;  %v7393_v49 = vld [vmem:[#allocation2 + $0xf9] sm:$0xff]  ;;  %v7394_v15 = vld [vmem:[#allocation2 + $0x109] sm:$0xff] }
 0x630   : > { %11026 = vmatprep.subr.bf16.mxu1 %v12498_v47 }
 0x633   : > { %11027 = vmatpush3.bf16.msra.mxu1 %v12498_v47  ;;  %v7395_v47 = vld [vmem:[#allocation2 + $0x111] sm:$0xff] }
 0x634   : > { %11060 = vmatprep.subr.bf16.mxu1 %v12499_v37 }
 0x636   : > { %10997 = vmatmul.mubr.bf16.gmra.mrb[16].mxu1 %v14470_v21  ;;  %v12501_v21 = vld [vmem:[%s15081_s3 + $0x150] sm:$0xff]  }
 0x637   : > { %11000 = vmatprep.mubr.bf16.mxu1 %v14494_v1  ;;  %v12500_v1 = vld [vmem:[%s15081_s3 + $0x148] sm:$0xff]  }
 0x63e   : > { %11001 = vmatmul.mubr.bf16.gmra.mrb[20].mxu1 %v14526_v13  ;;  %v12503_v13 = vld [vmem:[%s15081_s3 + $0x160] sm:$0xff]  }
 0x63f   : > { %11004 = vmatprep.mubr.bf16.mxu1 %v14547_v56  ;;  %v7385_v56 = vld [vmem:[#allocation2 + $0x99] sm:$0xff] }
 0x646   : > { %11005 = vmatmul.mubr.bf16.gmra.mrb[24].mxu1 %v14559_v2  ;;  %v7387_v2 = vld [vmem:[#allocation2 + $0xb1] sm:$0xff] }
 0x647   : > { %11008 = vmatprep.mubr.bf16.mxu1 %v14584_v43  ;;  %v7384_v43 = vld [vmem:[#allocation2 + $0x91] sm:$0xff] }
 0x64e   : > { %11009 = vmatmul.mubr.bf16.gmra.mrb[28].mxu1 %v14770_v58 }
 0x64f   : > { %11028 = vmatprep.mubr.bf16.mxu1 %v14589_v41  ;;  %v12502_v41 = vld [vmem:[%s15081_s3 + $0x158] sm:$0xff]  }
 0x656   : > { %11029 = vmatmul.mubr.bf16.vlgmr.msra.gmra.mrb[0].mxu1 %v14594_v40  ;;  %v14790_v40 = vpack.c.bf16 %v7385_v56, %v7384_v43 }
 0x657   : > { %11032 = vmatprep.mubr.bf16.mxu1 %v14602_v8  ;;  %11061 = vmatpush3.bf16.msra.mxu1 %v12499_v37  ;;  %v7386_v8 = vld [vmem:[#allocation2 + $0xa9] sm:$0xff]  ;;  %v7392_v37 = vld [vmem:[#allocation2 + $0xf1] sm:$0xff] }
 0x658   : > { %11062 = vmatprep.subr.bf16.mxu1 %v12500_v1  ;;  %v14795_v18 = vpack.c.bf16 %v7387_v2, %v7386_v8  ;;  %v14814_v50 = vpack.c.bf16 %v7393_v49, %v7392_v37  ;;  %v7398_v2 = vld [vmem:[#allocation2 + $0x139] sm:$0xff]  ;;  %v12520_v49 = vld [vmem:[%s15081_s3 + $0x1e8] sm:$0xff]   ;;  %v12521_v37 = vld [vmem:[%s15081_s3 + $0x1f0] sm:$0xff]  }
 0x659   : > { %v7401_v8 = vld [vmem:[#allocation2 + $0x159] sm:$0xff] }
 0x65b   : > { %11063 = vmatpush3.bf16.msra.mxu1 %v12500_v1  ;;  %v14816_v1 = vpack.c.bf16 %v7395_v47, %v7394_v15  ;;  %v8002_v15 = vld [vmem:[#allocation2 + $0xe0] sm:$0xff] }
 0x65c   : > { %11064 = vmatprep.subr.bf16.mxu1 %v12501_v21 }
 0x65e   : > { %11033 = vmatmul.mubr.bf16.gmra.mrb[4].mxu1 %v14607_v52  ;;  %v12504_v52 = vld [vmem:[%s15081_s3 + $0x168] sm:$0xff]  }
 0x65f   : > { %11036 = vmatprep.mubr.bf16.mxu1 %v14614_v26  ;;  %11065 = vmatpush3.bf16.msra.mxu1 %v12501_v21  ;;  %v12505_v26 = vld [vmem:[%s15081_s3 + $0x170] sm:$0xff]  }
 0x660   : > { %11066 = vmatprep.subr.bf16.mxu1 %v12502_v41  ;;  %v7397_v21 = vld [vmem:[#allocation2 + $0x129] sm:$0xff] }
 0x663   : > { %11067 = vmatpush3.bf16.msra.mxu1 %v12502_v41  ;;  %v7399_v41 = vld [vmem:[#allocation2 + $0x141] sm:$0xff] }
 0x664   : > { %11068 = vmatprep.subr.bf16.mxu1 %v12503_v13  ;;  %v14822_v43 = vpack.c.bf16 %v7399_v41, %v7398_v2  ;;  %v8001_v41 = vld [vmem:[#allocation2 + $0xd8] sm:$0xff]  ;;  %v8003_v2 = vld [vmem:[#allocation2 + $0xf0] sm:$0xff] }
 0x666   : > { %11037 = vmatmul.mubr.bf16.gmra.mrb[8].mxu1 %v14790_v40 }
 0x667   : > { %11040 = vmatprep.mubr.bf16.mxu1 %v14795_v18  ;;  %11069 = vmatpush3.bf16.msra.mxu1 %v12503_v13  ;;  %v7396_v13 = vld [vmem:[#allocation2 + $0x121] sm:$0xff] }
 0x668   : > { %11070 = vmatprep.subr.bf16.mxu1 %v12504_v52  ;;  %v14820_v56 = vpack.c.bf16 %v7397_v21, %v7396_v13  ;;  %v8004_v21 = vld [vmem:[#allocation2 + $0xf8] sm:$0xff]  ;;  %v8026_v13 = vpack.c.bf16 %v8002_v15, %v8001_v41  ;;  %v8300_v15 = vld [vmem:[#allocation2 + $0x81] sm:$0xff] }
 0x66b   : > { %11071 = vmatpush3.bf16.msra.mxu1 %v12504_v52  ;;  %v7400_v52 = vld [vmem:[#allocation2 + $0x151] sm:$0xff] }
 0x66c   : > { %11072 = vmatprep.subr.bf16.mxu1 %v12505_v26 }
 0x66e   : > { %11041 = vmatmul.mubr.bf16.gmra.mrb[12].mxu1 %v14802_v30 }
 0x66f   : > { %11044 = vmatprep.mubr.bf16.mxu1 %v14807_v10  ;;  %11073 = vmatpush3.bf16.msra.mxu1 %v12505_v26  ;;  %v14826_v26 = vpack.c.bf16 %v7401_v8, %v7400_v52  ;;  %v12522_v8 = vld [vmem:[%s15081_s3 + $0x1f8] sm:$0xff]   ;;  %v8027_v52 = vpack.c.bf16 %v8004_v21, %v8003_v2  ;;  %v12527_v2 = vld [vmem:[%s15081_s3 + $0x220] sm:$0xff]  }
 0x670   : > { %11074 = vmatprep.subr.bf16.mxu1 %v12506_v62  ;;  %v8299_v21 = vld [vmem:[#allocation2 + $0x79] sm:$0xff] }
 0x671   : > { %v8328_v41 = vpack.c.bf16 %v8300_v15, %v8299_v21  ;;  %v8619_v15 = vld [vmem:[#allocation2 + $0x122] sm:$0xff]  ;;  %v8620_v21 = vld [vmem:[#allocation2 + $0x12a] sm:$0xff] }
 0x673   : > { %11075 = vmatpush3.bf16.msra.mxu1 %v12506_v62 }
 0x674   : > { %11108 = vmatprep.subr.bf16.mxu1 %v12507_v57 }
 0x676   : > { %11045 = vmatmul.mubr.bf16.gmra.mrb[16].mxu1 %v14814_v50 }
 0x677   : > { %11048 = vmatprep.mubr.bf16.mxu1 %v14816_v1 }
 0x67e   : > { %11049 = vmatmul.mubr.bf16.gmra.mrb[20].mxu1 %v14820_v56 }
 0x67f   : > { %11052 = vmatprep.mubr.bf16.mxu1 %v14822_v43 }
 0x686   : > { %11053 = vmatmul.mubr.bf16.gmra.mrb[24].mxu1 %v14826_v26 }
 0x687   : > { %11056 = vmatprep.mubr.bf16.mxu1 %v14568_v20  ;;  %v12509_v20 = vld [vmem:[%s15081_s3 + $0x190] sm:$0xff]  }
 0x68e   : > { %11057 = vmatmul.mubr.bf16.gmra.mrb[28].mxu1 %v15165_v17  ;;  %v12523_v17 = vld [vmem:[%s15081_s3 + $0x200] sm:$0xff]  }
 0x68f   : > { %11076 = vmatprep.mubr.bf16.mxu1 %v14657_v22  ;;  %v12512_v22 = vld [vmem:[%s15081_s3 + $0x1a8] sm:$0xff]  }
 0x696   : > { %11077 = vmatmul.mubr.bf16.vlgmr.msra.gmra.mrb[0].mxu1 %v14662_v36  ;;  %v12513_v36 = vld [vmem:[%s15081_s3 + $0x1b0] sm:$0xff]  }
 0x697   : > { %11080 = vmatprep.mubr.bf16.mxu1 %v14669_v25  ;;  %11109 = vmatpush3.bf16.msra.mxu1 %v12507_v57  ;;  %v12514_v25 = vld [vmem:[%s15081_s3 + $0x1b8] sm:$0xff]   ;;  %v7999_v57 = vld [vmem:[#allocation2 + $0xc0] sm:$0xff] }
 0x698   : > { %11110 = vmatprep.subr.bf16.mxu1 %v12508_v54  ;;  %v8025_v47 = vpack.c.bf16 %v8000_v9, %v7999_v57  ;;  %v8296_v9 = vld [vmem:[#allocation2 + $0x51] sm:$0xff] }
 0x69b   : > { %11111 = vmatpush3.bf16.msra.mxu1 %v12508_v54  ;;  %v8006_v54 = vld [vmem:[#allocation2 + $0x110] sm:$0xff] }
 0x69c   : > { %11112 = vmatprep.subr.bf16.mxu1 %v12509_v20 }
 0x69e   : > { %11081 = vmatmul.mubr.bf16.gmra.mrb[4].mxu1 %v14674_v34  ;;  %v12515_v34 = vld [vmem:[%s15081_s3 + $0x1c0] sm:$0xff]  }
 0x69f   : > { %11084 = vmatprep.mubr.bf16.mxu1 %v14681_v14  ;;  %11113 = vmatpush3.bf16.msra.mxu1 %v12509_v20  ;;  %v7710_v14 = vld [vmem:[#allocation2 + $0x182] sm:$0xff] }
 0x6a0   : > { %11114 = vmatprep.subr.bf16.mxu1 %v12510_v33  ;;  %v8008_v20 = vld [vmem:[#allocation2 + $0x128] sm:$0xff] }
 0x6a3   : > { %11115 = vmatpush3.bf16.msra.mxu1 %v12510_v33  ;;  %v8005_v33 = vld [vmem:[#allocation2 + $0x108] sm:$0xff] }
 0x6a4   : > { %11116 = vmatprep.subr.bf16.mxu1 %v12511_v32 }
 0x6a6   : > { %11085 = vmatmul.mubr.bf16.gmra.mrb[8].mxu1 %v14686_v42  ;;  %v7711_v42 = vld [vmem:[#allocation2 + $0x18a] sm:$0xff] }
 0x6a7   : > { %11088 = vmatprep.mubr.bf16.mxu1 %v14693_v55  ;;  %11117 = vmatpush3.bf16.msra.mxu1 %v12511_v32  ;;  %v14872_v55 = vpack.c.bf16 %v7711_v42, %v7710_v14  ;;  %v8028_v32 = vpack.c.bf16 %v8006_v54, %v8005_v33  ;;  %v8009_v14 = vld [vmem:[#allocation2 + $0x138] sm:$0xff] }
 0x6a8   : > { %11118 = vmatprep.subr.bf16.mxu1 %v12512_v22 }
 0x6ab   : > { %11119 = vmatpush3.bf16.msra.mxu1 %v12512_v22  ;;  %v8007_v22 = vld [vmem:[#allocation2 + $0x120] sm:$0xff] }
 0x6ac   : > { %11120 = vmatprep.subr.bf16.mxu1 %v12513_v36 }
 0x6ae   : > { %11089 = vmatmul.mubr.bf16.gmra.mrb[12].mxu1 %v14698_v29  ;;  %v12516_v29 = vld [vmem:[%s15081_s3 + $0x1c8] sm:$0xff]  }
 0x6af   : > { %11092 = vmatprep.mubr.bf16.mxu1 %v14705_v35  ;;  %11121 = vmatpush3.bf16.msra.mxu1 %v12513_v36  ;;  %v12517_v35 = vld [vmem:[%s15081_s3 + $0x1d0] sm:$0xff]   ;;  %v8029_v36 = vpack.c.bf16 %v8008_v20, %v8007_v22  ;;  %v8321_v20 = vld [vmem:[#allocation2 + $0x181] sm:$0xff] }
 0x6b0   : > { %11122 = vmatprep.subr.bf16.mxu1 %v12514_v25  ;;  %v8599_v22 = vld [vmem:[#allocation2 + $0x32] sm:$0xff] }
 0x6b3   : > { %11123 = vmatpush3.bf16.msra.mxu1 %v12514_v25  ;;  %v8010_v25 = vld [vmem:[#allocation2 + $0x140] sm:$0xff] }
 0x6b4   : > { %11156 = vmatprep.subr.bf16.mxu1 %v12515_v34  ;;  %v8030_v42 = vpack.c.bf16 %v8010_v25, %v8009_v14  ;;  %v8603_v25 = vld [vmem:[#allocation2 + $0x62] sm:$0xff] }
 0x6b6   : > { %11093 = vmatmul.mubr.bf16.gmra.mrb[16].mxu1 %v14707_v39  ;;  %v7994_v39 = vld [vmem:[#allocation2 + $0x80] sm:$0xff] }
 0x6b7   : > { %11096 = vmatprep.mubr.bf16.mxu1 %v14711_v12  ;;  %v7996_v12 = vld [vmem:[#allocation2 + $0x98] sm:$0xff] }
 0x6be   : > { %11097 = vmatmul.mubr.bf16.gmra.mrb[20].mxu1 %v14713_v45  ;;  %v7993_v45 = vld [vmem:[#allocation2 + $0x78] sm:$0xff] }
 0x6bf   : > { %11100 = vmatprep.mubr.bf16.mxu1 %v14717_v60  ;;  %v8022_v60 = vpack.c.bf16 %v7994_v39, %v7993_v45  ;;  %v8014_v39 = vld [vmem:[#allocation2 + $0x170] sm:$0xff] }
 0x6c6   : > { %11101 = vmatmul.mubr.bf16.gmra.mrb[24].mxu1 %v14719_v11  ;;  %v7995_v11 = vld [vmem:[#allocation2 + $0x90] sm:$0xff] }
 0x6c7   : > { %11104 = vmatprep.mubr.bf16.mxu1 %v14723_v38  ;;  %v12518_v38 = vld [vmem:[%s15081_s3 + $0x1d8] sm:$0xff]  }
 0x6ce   : > { %11105 = vmatmul.mubr.bf16.gmra.mrb[28].mxu1 %v14872_v55 }
 0x6cf   : > { %11124 = vmatprep.mubr.bf16.mxu1 %v14726_v51  ;;  %v12519_v51 = vld [vmem:[%s15081_s3 + $0x1e0] sm:$0xff]  }
 0x6d6   : > { %11125 = vmatmul.mubr.bf16.vlgmr.msra.gmra.mrb[0].mxu1 %v14731_v7  ;;  %v8023_v7 = vpack.c.bf16 %v7996_v12, %v7995_v11  ;;  %v8013_v12 = vld [vmem:[#allocation2 + $0x168] sm:$0xff] }
 0x6d7   : > { %11128 = vmatprep.mubr.bf16.mxu1 %v14738_v6  ;;  %11157 = vmatpush3.bf16.msra.mxu1 %v12515_v34  ;;  %v7998_v6 = vld [vmem:[#allocation2 + $0xb0] sm:$0xff]  ;;  %v8012_v34 = vld [vmem:[#allocation2 + $0x158] sm:$0xff]  ;;  %v8032_v45 = vpack.c.bf16 %v8014_v39, %v8013_v12  ;;  %v12787_v11 = vld [vmem:[#allocation2 + $0x8] sm:$0xff] }
 0x6d8   : > { %11158 = vmatprep.subr.bf16.mxu1 %v12516_v29  ;;  %v8024_v62 = vpack.c.bf16 %v7998_v6, %v7997_v0  ;;  %v8298_v0 = vld [vmem:[#allocation2 + $0x69] sm:$0xff]  ;;  %v8608_v39 = vld [vmem:[#allocation2 + $0x9a] sm:$0xff] }
 0x6db   : > { %11159 = vmatpush3.bf16.msra.mxu1 %v12516_v29  ;;  %v8011_v29 = vld [vmem:[#allocation2 + $0x150] sm:$0xff] }
 0x6dc   : > { %11160 = vmatprep.subr.bf16.mxu1 %v12517_v35 }
 0x6de   : > { %11129 = vmatmul.mubr.bf16.gmra.mrb[4].mxu1 %v8022_v60  ;;  %v8017_v60 = vld [vmem:[#allocation2 + $0x198] sm:$0xff] }
 0x6df   : > { %11132 = vmatprep.mubr.bf16.mxu1 %v8023_v7  ;;  %11161 = vmatpush3.bf16.msra.mxu1 %v12517_v35  ;;  %v8031_v35 = vpack.c.bf16 %v8012_v34, %v8011_v29  ;;  %v8294_v7 = vld [vmem:[#allocation2 + $0x39] sm:$0xff]  ;;  %v8606_v29 = vld [vmem:[#allocation2 + $0x82] sm:$0xff] }
 0x6e0   : > { %11162 = vmatprep.subr.bf16.mxu1 %v12518_v38 }
 0x6e3   : > { %11163 = vmatpush3.bf16.msra.mxu1 %v12518_v38  ;;  %v8034_v38 = vpack.c.bf16 %v12787_v11, %v8017_v60  ;;  %v8609_v60 = vld [vmem:[#allocation2 + $0xaa] sm:$0xff]  ;;  %v8610_v11 = vld [vmem:[#allocation2 + $0xb2] sm:$0xff] }
 0x6e4   : > { %11164 = vmatprep.subr.bf16.mxu1 %v12519_v51 }
 0x6e6   : > { %11133 = vmatmul.mubr.bf16.gmra.mrb[8].mxu1 %v8024_v62  ;;  %v8295_v62 = vld [vmem:[#allocation2 + $0x49] sm:$0xff] }
 0x6e7   : > { %11136 = vmatprep.mubr.bf16.mxu1 %v8025_v47  ;;  %11165 = vmatpush3.bf16.msra.mxu1 %v12519_v51  ;;  %v8293_v51 = vld [vmem:[#allocation2 + $0x31] sm:$0xff]  ;;  %v8326_v57 = vpack.c.bf16 %v8296_v9, %v8295_v62  ;;  %v12524_v47 = vld [vmem:[%s15081_s3 + $0x208] sm:$0xff]   ;;  %v8613_v9 = vld [vmem:[#allocation2 + $0xda] sm:$0xff] }
 0x6e8   : > { %11166 = vmatprep.subr.bf16.mxu1 %v12520_v49  ;;  %v8325_v6 = vpack.c.bf16 %v8294_v7, %v8293_v51  ;;  %v8612_v7 = vld [vmem:[#allocation2 + $0xca] sm:$0xff]  ;;  %v8636_v51 = vpack.c.bf16 %v8610_v11, %v8609_v60  ;;  %v8615_v62 = vld [vmem:[#allocation2 + $0xf2] sm:$0xff]  ;;  %v8970_v11 = vsub.f32 1.0, %v14213_v24 }
 0x6eb   : > { %11167 = vmatpush3.bf16.msra.mxu1 %v12520_v49  ;;  %v8297_v49 = vld [vmem:[#allocation2 + $0x61] sm:$0xff] }
 0x6ec   : > { %11168 = vmatprep.subr.bf16.mxu1 %v12521_v37 }
 0x6ee   : > { %11137 = vmatmul.mubr.bf16.gmra.mrb[12].mxu1 %v8026_v13  ;;  %v12526_v13 = vld [vmem:[%s15081_s3 + $0x218] sm:$0xff]  }
 0x6ef   : > { %11140 = vmatprep.mubr.bf16.mxu1 %v8027_v52  ;;  %11169 = vmatpush3.bf16.msra.mxu1 %v12521_v37  ;;  %v8327_v37 = vpack.c.bf16 %v8298_v0, %v8297_v49  ;;  %v12530_v52 = vld [vmem:[%s15081_s3 + $0x238] sm:$0xff]   ;;  %v8614_v0 = vld [vmem:[#allocation2 + $0xe2] sm:$0xff] }
 0x6f0   : > { %11170 = vmatprep.subr.bf16.mxu1 %v12522_v8  ;;  %v8638_v49 = vpack.c.bf16 %v8614_v0, %v8613_v9 }
 0x6f3   : > { %11171 = vmatpush3.bf16.msra.mxu1 %v12522_v8  ;;  %v12528_v8 = vld [vmem:[%s15081_s3 + $0x228] sm:$0xff]  }
 0x6f4   : > { %11204 = vmatprep.subr.bf16.mxu1 %v12523_v17 }
 0x6f6   : > { %11141 = vmatmul.mubr.bf16.gmra.mrb[16].mxu1 %v8028_v32 }
 0x6f7   : > { %11144 = vmatprep.mubr.bf16.mxu1 %v8029_v36  ;;  %v8600_v36 = vld [vmem:[#allocation2 + $0x3a] sm:$0xff] }
 0x6fe   : > { %11145 = vmatmul.mubr.bf16.gmra.mrb[20].mxu1 %v8030_v42  ;;  %v8605_v42 = vld [vmem:[#allocation2 + $0x7a] sm:$0xff] }
 0x6ff   : > { %11148 = vmatprep.mubr.bf16.mxu1 %v8031_v35  ;;  %v8607_v35 = vld [vmem:[#allocation2 + $0x92] sm:$0xff]  ;;  %v8634_v12 = vpack.c.bf16 %v8606_v29, %v8605_v42  ;;  %v8969_v29 = vsub.f32 1.0, %v14208_v63 }
 0x706   : > { %11149 = vmatmul.mubr.bf16.gmra.mrb[24].mxu1 %v8032_v45  ;;  %v8635_v45 = vpack.c.bf16 %v8608_v39, %v8607_v35 }
 0x707   : > { %11152 = vmatprep.mubr.bf16.mxu1 %v14770_v58  ;;  %v12525_v58 = vld [vmem:[%s15081_s3 + $0x210] sm:$0xff]  }
 0x70e   : > { %11153 = vmatmul.mubr.bf16.gmra.mrb[28].mxu1 %v8034_v38  ;;  %v8611_v38 = vld [vmem:[#allocation2 + $0xc2] sm:$0xff] }
 0x70f   : > { %11172 = vmatprep.mubr.bf16.mxu1 %v8325_v6  ;;  %v8637_v6 = vpack.c.bf16 %v8612_v7, %v8611_v38 }
 0x716   : > { %11173 = vmatmul.mubr.bf16.vlgmr.msra.gmra.mrb[0].mxu1 %v8326_v57  ;;  %v8616_v57 = vld [vmem:[#allocation2 + $0xfa] sm:$0xff] }
 0x717   : > { %11176 = vmatprep.mubr.bf16.mxu1 %v8327_v37  ;;  %11205 = vmatpush3.bf16.msra.mxu1 %v12523_v17  ;;  %v8319_v17 = vld [vmem:[#allocation2 + $0x169] sm:$0xff] }
 0x718   : > { %11206 = vmatprep.subr.bf16.mxu1 %v12524_v47  ;;  %v8617_v37 = vld [vmem:[#allocation2 + $0x10a] sm:$0xff] }
 0x71b   : > { %11207 = vmatpush3.bf16.msra.mxu1 %v12524_v47  ;;  %v8639_v47 = vpack.c.bf16 %v8616_v57, %v8615_v62 }
 0x71c   : > { %11208 = vmatprep.subr.bf16.mxu1 %v12525_v58 }
 0x71e   : > { %11177 = vmatmul.mubr.bf16.gmra.mrb[4].mxu1 %v8328_v41 }
 0x71f   : > { %11180 = vmatprep.mubr.bf16.mxu1 %v14790_v40  ;;  %11209 = vmatpush3.bf16.msra.mxu1 %v12525_v58  ;;  %v12529_v40 = vld [vmem:[%s15081_s3 + $0x230] sm:$0xff]  }
 0x720   : > { %11210 = vmatprep.subr.bf16.mxu1 %v12526_v13  ;;  %v8618_v58 = vld [vmem:[#allocation2 + $0x112] sm:$0xff] }
 0x721   : > { %v8640_v41 = vpack.c.bf16 %v8618_v58, %v8617_v37 }
 0x723   : > { %11211 = vmatpush3.bf16.msra.mxu1 %v12526_v13  ;;  %v8641_v13 = vpack.c.bf16 %v8620_v21, %v8619_v15  ;;  %v8976_v21 = vsub.f32 1.0, %v14274_v31 }
 0x724   : > { %11212 = vmatprep.subr.bf16.mxu1 %v12527_v2 }
 0x726   : > { %11181 = vmatmul.mubr.bf16.gmra.mrb[8].mxu1 %v14795_v18  ;;  %v8320_v18 = vld [vmem:[#allocation2 + $0x171] sm:$0xff] }
 0x727   : > { %11184 = vmatprep.mubr.bf16.mxu1 %v14802_v30  ;;  %11213 = vmatpush3.bf16.msra.mxu1 %v12527_v2  ;;  %v8322_v30 = vld [vmem:[#allocation2 + $0x189] sm:$0xff]  ;;  %v8338_v54 = vpack.c.bf16 %v8320_v18, %v8319_v17  ;;  %v8621_v2 = vld [vmem:[#allocation2 + $0x13a] sm:$0xff] }
 0x728   : > { %11214 = vmatprep.subr.bf16.mxu1 %v12528_v8  ;;  %v8339_v33 = vpack.c.bf16 %v8322_v30, %v8321_v20  ;;  %v8625_v17 = vld [vmem:[#allocation2 + $0x16a] sm:$0xff] }
 0x72b   : > { %11215 = vmatpush3.bf16.msra.mxu1 %v12528_v8  ;;  %v8622_v8 = vld [vmem:[#allocation2 + $0x142] sm:$0xff] }
 0x72c   : > { %11216 = vmatprep.subr.bf16.mxu1 %v12529_v40  ;;  %v8642_v18 = vpack.c.bf16 %v8622_v8, %v8621_v2 }
 0x72e   : > { %11185 = vmatmul.mubr.bf16.gmra.mrb[12].mxu1 %v14807_v10  ;;  %v8323_v10 = vld [vmem:[#allocation2 + $0x199] sm:$0xff] }
 0x72f   : > { %11188 = vmatprep.mubr.bf16.mxu1 %v14814_v50  ;;  %11217 = vmatpush3.bf16.msra.mxu1 %v12529_v40  ;;  %v8324_v50 = vld [vmem:[#allocation2 + $0x1a1] sm:$0xff]  ;;  %v8623_v40 = vld [vmem:[#allocation2 + $0x152] sm:$0xff] }
 0x730   : > { %11218 = vmatprep.subr.bf16.mxu1 %v12530_v52  ;;  %v8340_v32 = vpack.c.bf16 %v8324_v50, %v8323_v10  ;;  %v8630_v10 = vld [vmem:[#allocation2 + $0x1a2] sm:$0xff] }
 0x733   : > { %11219 = vmatpush3.bf16.msra.mxu1 %v12530_v52  ;;  %v8624_v52 = vld [vmem:[#allocation2 + $0x15a] sm:$0xff] }
 0x734   : > { %v8643_v30 = vpack.c.bf16 %v8624_v52, %v8623_v40 }
 0x736   : > { %11189 = vmatmul.mubr.bf16.gmra.mrb[16].mxu1 %v14816_v1  ;;  %v8631_v1 = vpack.c.bf16 %v8600_v36, %v8599_v22  ;;  %v12788_v22 = vld [vmem:[%s15082_s4] sm:$0x7] }
 0x737   : > { %11192 = vmatprep.mubr.bf16.mxu1 %v14820_v56  ;;  %v8601_v56 = vld [vmem:[#allocation2 + $0x4a] sm:$0xff] }
 0x73e   : > { %11193 = vmatmul.mubr.bf16.gmra.mrb[20].mxu1 %v14822_v43  ;;  %v8602_v43 = vld [vmem:[#allocation2 + $0x52] sm:$0xff] }
 0x73f   : > { %11196 = vmatprep.mubr.bf16.mxu1 %v14826_v26  ;;  %v8604_v26 = vld [vmem:[#allocation2 + $0x6a] sm:$0xff]  ;;  %v8632_v34 = vpack.c.bf16 %v8602_v43, %v8601_v56 }
 0x740   : > { %v8633_v14 = vpack.c.bf16 %v8604_v26, %v8603_v25 }
 0x746   : > { %11197 = vmatmul.mubr.bf16.gmra.mrb[24].mxu1 %v8338_v54  ;;  %v8626_v54 = vld [vmem:[#allocation2 + $0x172] sm:$0xff] }
 0x747   : > { %11200 = vmatprep.mubr.bf16.mxu1 %v8339_v33  ;;  %v8644_v20 = vpack.c.bf16 %v8626_v54, %v8625_v17  ;;  %v8629_v33 = vld [vmem:[#allocation2 + $0x19a] sm:$0xff] }
 0x748   : > { %v8646_v50 = vpack.c.bf16 %v8630_v10, %v8629_v33 }
 0x74e   : > { %11201 = vmatmul.mubr.bf16.gmra.mrb[28].mxu1 %v8340_v32  ;;  %v5526_v32 = vsub.s32 2, %v14162_v46 }
 0x74f   : > { %11220 = vmatprep.mubr.bf16.mxu1 %v8631_v1 }
 0x750   : > { %v14938_v36 = vrot.slane %v12788_v22, %v5526_v32 }
 0x756   : > { %11221 = vmatmul.mubr.bf16.vlgmr.msra.gmra.mrb[0].mxu1 %v8632_v34  ;;  %v8971_v34 = vsub.f32 1.0, %v14224_v44 }
 0x757   : > { %11224 = vmatprep.mubr.bf16.mxu1 %v8633_v14 }
 0x75e   : > { %11225 = vmatmul.mubr.bf16.gmra.mrb[4].mxu1 %v8634_v12 }
 0x75f   : > { %11228 = vmatprep.mubr.bf16.mxu1 %v8635_v45  ;;  %v8972_v45 = vsub.f32 1.0, %v14229_v53 }
 0x766   : > { %11229 = vmatmul.mubr.bf16.gmra.mrb[8].mxu1 %v8636_v51 }
 0x767   : > { %11232 = vmatprep.mubr.bf16.mxu1 %v8637_v6 }
 0x76e   : > { %11233 = vmatmul.mubr.bf16.gmra.mrb[12].mxu1 %v8638_v49  ;;  %v8975_v49 = vsub.f32 1.0, %v14266_v23  ;;  %v8974_v23 = vsub.f32 1.0, %v14252_v28 }
 0x76f   : > { %11236 = vmatprep.mubr.bf16.mxu1 %v8639_v47 }
 0x776   : > { %11237 = vmatmul.mubr.bf16.gmra.mrb[16].mxu1 %v8640_v41 }
 0x777   : > { %11240 = vmatprep.mubr.bf16.mxu1 %v8641_v13 }
 0x77e   : > { %11241 = vmatmul.mubr.bf16.gmra.mrb[20].mxu1 %v8642_v18 }
 0x77f   : > { %11244 = vmatprep.mubr.bf16.mxu1 %v8643_v30 }
 0x786   : > { %11245 = vmatmul.mubr.bf16.gmra.mrb[24].mxu1 %v8644_v20  ;;  %v15166_v20 = vld [vmem:[#allocation6_spill] sm:$0xff] }
 0x787   : > { %11248 = vmatprep.mubr.bf16.mxu1 %v14872_v55  ;;  %v8979_v33 = vsub.f32 1.0, %v15166_v20 }
 0x78e   : > { %11249 = vmatmul.mubr.bf16.gmra.mrb[28].mxu1 %v8646_v50 }
 0x829   : > { %v11222_v1 = vpop.f32.mrb[0].mxu1 }
 0x82a   : > { %v11252_v56 = vadd.f32 %v11222_v1, %v14938_v36  ;;  %v8746_v43 = vpop.f32.mrb[1].mxu1 }
 0x82b   : > { %v11253_v25 = vadd.f32 %v8746_v43, %v14938_v36  ;;  %v11223_v55 = vpop.f32.mrb[2].mxu1 }
 0x82c   : > { %v8907_v26 = vmax.f32 %v11252_v56, 0.0  ;;  %v11254_v14 = vadd.f32 %v11223_v55, %v14938_v36  ;;  %v8749_v46 = vpop.f32.mrb[3].mxu1  ;;  %v15168_v56 = vld [vmem:[#allocation9_spill] sm:$0xff] }
 0x82d   : > { %v8905_v42 = vmax.f32 %v11253_v25, 0.0  ;;  %v11255_v35 = vadd.f32 %v8749_v46, %v14938_v36  ;;  %v8980_v43 = vsub.f32 1.0, %v15168_v56 }
 0x82e   : > { %v9003_v39 = vmul.f32 %v8971_v34, %v8907_v26  ;;  %v8908_v12 = vmax.f32 %v11254_v14, 0.0  ;;  %v15169_v26 = vld [vmem:[#allocation5_spill] sm:$0xff]  ;;  %v15170_v14 = vld [vmem:[#allocation8_spill] sm:$0xff] }
 0x82f   : > { %v9001_v44 = vmul.f32 %v8969_v29, %v8905_v42  ;;  %v8906_v60 = vmax.f32 %v11255_v35, 0.0  ;;  %v8978_v34 = vsub.f32 1.0, %v15169_v26  ;;  %v15171_v29 = vld [vmem:[#allocation4_spill] sm:$0xff] }
 0x830   : > { %v9035_v63 = vadd.f32 %v9003_v39, %v14227_v5  ;;  %v9004_v38 = vmul.f32 %v8972_v45, %v8908_v12  ;;  %v15172_v45 = vld [vmem:[#allocation10_spill] sm:$0xff] }
 0x831   : > { %v9033_v7 = vadd.f32 %v9001_v44, %v14211_v48  ;;  %v9002_v53 = vmul.f32 %v8970_v11, %v8906_v60  ;;  %v11226_v51 = vpop.f32.mrb[4].mxu1 }
 0x832   : > { %9067 = vst [vmem:[%s14952_s11 + $0x10] sm:$0xff] %v9035_v63  ;;  %v9036_v6 = vadd.f32 %v9004_v38, %v14232_v59  ;;  %v11256_v9 = vadd.f32 %v11226_v51, %v14938_v36  ;;  %v8762_v0 = vpop.f32.mrb[5].mxu1  ;;  %v8973_v59 = vsub.f32 1.0, %v14247_v61  ;;  %v15173_v63 = vld [vmem:[#allocation7_spill] sm:$0xff] }
 0x833   : > { %9065 = vst [vmem:[%s14952_s11] sm:$0xff] %v9033_v7  ;;  %v9034_v62 = vadd.f32 %v9002_v53, %v14216_v19  ;;  %v11257_v57 = vadd.f32 %v8762_v0, %v14938_v36  ;;  %v11227_v24 = vpop.f32.mrb[6].mxu1 }
 0x834   : > { %9068 = vst [vmem:[%s14952_s11 + $0x18] sm:$0xff] %v9036_v6  ;;  %v8911_v5 = vmax.f32 %v11256_v9, 0.0  ;;  %v11258_v48 = vadd.f32 %v11227_v24, %v14938_v36  ;;  %v8765_v47 = vpop.f32.mrb[7].mxu1  ;;  %v15174_v6 = vld [vmem:[#allocation14_spill] sm:$0xff]  ;;  %v15175_v24 = vld [vmem:[#allocation11_spill] sm:$0xff] }
 0x835   : > { %9066 = vst [vmem:[%s14952_s11 + $0x8] sm:$0xff] %v9034_v62  ;;  %v8909_v37 = vmax.f32 %v11257_v57, 0.0  ;;  %v11259_v58 = vadd.f32 %v8765_v47, %v14938_v36  ;;  %v8983_v9 = vsub.f32 1.0, %v15174_v6 }
 0x836   : > { %v9007_v15 = vmul.f32 %v8975_v49, %v8911_v5  ;;  %v8912_v19 = vmax.f32 %v11258_v48, 0.0  ;;  %v8981_v5 = vsub.f32 1.0, %v15175_v24 }
 0x837   : > { %v9005_v41 = vmul.f32 %v8973_v59, %v8909_v37  ;;  %v8910_v13 = vmax.f32 %v11259_v58, 0.0  ;;  %v15176_v37 = vld [vmem:[#allocation17_spill] sm:$0xff] }
 0x838   : > { %v9039_v2 = vadd.f32 %v9007_v15, %v14269_v3  ;;  %v9008_v8 = vmul.f32 %v8976_v21, %v8912_v19  ;;  %v8984_v59 = vsub.f32 1.0, %v15176_v37  ;;  %v15177_v19 = vld [vmem:[#allocation13_spill] sm:$0xff] }
 0x839   : > { %v9037_v40 = vadd.f32 %v9005_v41, %v14250_v16  ;;  %v9006_v52 = vmul.f32 %v8974_v23, %v8910_v13  ;;  %v11230_v61 = vpop.f32.mrb[8].mxu1  ;;  %v8982_v21 = vsub.f32 1.0, %v15177_v19  ;;  %v15178_v41 = vld [vmem:[#allocation16_spill] sm:$0xff] }
 0x83a   : > { %9071 = vst [vmem:[%s14952_s11 + $0x30] sm:$0xff] %v9039_v2  ;;  %v9040_v18 = vadd.f32 %v9008_v8, %v14278_v4  ;;  %v11260_v30 = vadd.f32 %v11230_v61, %v14938_v36  ;;  %v8778_v17 = vpop.f32.mrb[9].mxu1  ;;  %v15167_v4 = vld [vmem:[#allocation3_spill] sm:$0xff]  ;;  %v15179_v2 = vld [vmem:[#allocation12_spill] sm:$0xff]  ;;  %v15180_v61 = vld [vmem:[#allocation18_spill] sm:$0xff] }
 0x83b   : > { %9069 = vst [vmem:[%s14952_s11 + $0x20] sm:$0xff] %v9037_v40  ;;  %v9038_v31 = vadd.f32 %v9006_v52, %v14272_v27  ;;  %v11261_v54 = vadd.f32 %v8778_v17, %v14938_v36  ;;  %v11231_v28 = vpop.f32.mrb[10].mxu1  ;;  %v8977_v32 = vsub.f32 1.0, %v15167_v4 }
 0x83c   : > { %9072 = vst [vmem:[%s14952_s11 + $0x38] sm:$0xff] %v9040_v18  ;;  %v8915_v3 = vmax.f32 %v11260_v30, 0.0  ;;  %v11262_v16 = vadd.f32 %v11231_v28, %v14938_v36  ;;  %v8781_v10 = vpop.f32.mrb[11].mxu1 }
 0x83d   : > { %9070 = vst [vmem:[%s14952_s11 + $0x28] sm:$0xff] %v9038_v31  ;;  %v8913_v50 = vmax.f32 %v11261_v54, 0.0  ;;  %v11263_v22 = vadd.f32 %v8781_v10, %v14938_v36  ;;  %v15181_v31 = vld [vmem:[#allocation15_spill] sm:$0xff] }
 0x83e   : > { %v9011_v1 = vmul.f32 %v8979_v33, %v8915_v3  ;;  %v8916_v27 = vmax.f32 %v11262_v16, 0.0  ;;  %v15182_v33 = vld [vmem:[#allocation22_spill] sm:$0xff] }
 0x83f   : > { %v9009_v25 = vmul.f32 %v8977_v32, %v8913_v50  ;;  %v8914_v55 = vmax.f32 %v11263_v22, 0.0  ;;  %v8987_v16 = vsub.f32 1.0, %v15182_v33  ;;  %v15183_v32 = vld [vmem:[#allocation19_spill] sm:$0xff] }
 0x840   : > { %v9043_v46 = vadd.f32 %v9011_v1, %v15170_v14  ;;  %v9012_v42 = vmul.f32 %v8980_v43, %v8916_v27  ;;  %v8985_v22 = vsub.f32 1.0, %v15183_v32  ;;  %v15184_v43 = vld [vmem:[#allocation25_spill] sm:$0xff] }
 0x841   : > { %v9041_v35 = vadd.f32 %v9009_v25, %v15171_v29  ;;  %v9010_v39 = vmul.f32 %v8978_v34, %v8914_v55  ;;  %v11234_v12 = vpop.f32.mrb[12].mxu1  ;;  %v8988_v25 = vsub.f32 1.0, %v15184_v43  ;;  %v15185_v34 = vld [vmem:[#allocation21_spill] sm:$0xff] }
 0x842   : > { %9075 = vst [vmem:[%s14952_s11 + $0x50] sm:$0xff] %v9043_v46  ;;  %v9044_v44 = vadd.f32 %v9012_v42, %v15172_v45  ;;  %v11264_v60 = vadd.f32 %v11234_v12, %v14938_v36  ;;  %v8794_v11 = vpop.f32.mrb[13].mxu1  ;;  %v8986_v14 = vsub.f32 1.0, %v15185_v34  ;;  %v15186_v46 = vld [vmem:[#allocation24_spill] sm:$0xff] }
 0x843   : > { %9073 = vst [vmem:[%s14952_s11 + $0x40] sm:$0xff] %v9041_v35  ;;  %v9042_v38 = vadd.f32 %v9010_v39, %v15173_v63  ;;  %v11265_v7 = vadd.f32 %v8794_v11, %v14938_v36  ;;  %v11235_v53 = vpop.f32.mrb[14].mxu1  ;;  %v15187_v35 = vld [vmem:[#allocation20_spill] sm:$0xff] }
 0x844   : > { %9076 = vst [vmem:[%s14952_s11 + $0x58] sm:$0xff] %v9044_v44  ;;  %v8919_v51 = vmax.f32 %v11264_v60, 0.0  ;;  %v11266_v0 = vadd.f32 %v11235_v53, %v14938_v36  ;;  %v8797_v62 = vpop.f32.mrb[15].mxu1  ;;  %v15188_v44 = vld [vmem:[#allocation26_spill] sm:$0xff] }
 0x845   : > { %9074 = vst [vmem:[%s14952_s11 + $0x48] sm:$0xff] %v9042_v38  ;;  %v8917_v57 = vmax.f32 %v11265_v7, 0.0  ;;  %v11267_v49 = vadd.f32 %v8797_v62, %v14938_v36  ;;  %v15189_v38 = vld [vmem:[#allocation23_spill] sm:$0xff] }
 0x846   : > { %v9015_v48 = vmul.f32 %v8983_v9, %v8919_v51  ;;  %v8920_v47 = vmax.f32 %v11266_v0, 0.0  ;;  %v15190_v9 = vld [vmem:[#allocation31_spill] sm:$0xff] }
 0x847   : > { %v9013_v58 = vmul.f32 %v8981_v5, %v8917_v57  ;;  %v8918_v15 = vmax.f32 %v11267_v49, 0.0  ;;  %v8991_v0 = vsub.f32 1.0, %v15190_v9  ;;  %v15191_v5 = vld [vmem:[#allocation27_spill] sm:$0xff] }
 0x848   : > { %v9047_v13 = vadd.f32 %v9015_v48, %v15178_v41  ;;  %v9016_v23 = vmul.f32 %v8984_v59, %v8920_v47  ;;  %v8989_v49 = vsub.f32 1.0, %v15191_v5  ;;  %v15192_v59 = vld [vmem:[#allocation33_spill] sm:$0xff] }
 0x849   : > { %v9045_v8 = vadd.f32 %v9013_v58, %v15179_v2  ;;  %v9014_v40 = vmul.f32 %v8982_v21, %v8918_v15  ;;  %v11238_v52 = vpop.f32.mrb[16].mxu1  ;;  %v8992_v58 = vsub.f32 1.0, %v15192_v59  ;;  %v15193_v21 = vld [vmem:[#allocation29_spill] sm:$0xff] }
 0x84a   : > { %9079 = vst [vmem:[%s14952_s11 + $0x70] sm:$0xff] %v9047_v13  ;;  %v9048_v18 = vadd.f32 %v9016_v23, %v15180_v61  ;;  %v11268_v30 = vadd.f32 %v11238_v52, %v14938_v36  ;;  %v8810_v17 = vpop.f32.mrb[17].mxu1  ;;  %v8990_v41 = vsub.f32 1.0, %v15193_v21  ;;  %v15194_v13 = vld [vmem:[#allocation32_spill] sm:$0xff] }
 0x84b   : > { %9077 = vst [vmem:[%s14952_s11 + $0x60] sm:$0xff] %v9045_v8  ;;  %v9046_v54 = vadd.f32 %v9014_v40, %v15181_v31  ;;  %v11269_v28 = vadd.f32 %v8810_v17, %v14938_v36  ;;  %v11239_v3 = vpop.f32.mrb[18].mxu1  ;;  %v15195_v8 = vld [vmem:[#allocation28_spill] sm:$0xff] }
 0x84c   : > { %9080 = vst [vmem:[%s14952_s11 + $0x78] sm:$0xff] %v9048_v18  ;;  %v8923_v20 = vmax.f32 %v11268_v30, 0.0  ;;  %v11270_v10 = vadd.f32 %v11239_v3, %v14938_v36  ;;  %v8813_v50 = vpop.f32.mrb[19].mxu1  ;;  %v15196_v18 = vld [vmem:[#allocation34_spill] sm:$0xff] }
 0x84d   : > { %9078 = vst [vmem:[%s14952_s11 + $0x68] sm:$0xff] %v9046_v54  ;;  %v8921_v4 = vmax.f32 %v11269_v28, 0.0  ;;  %v11271_v1 = vadd.f32 %v8813_v50, %v14938_v36  ;;  %v15197_v54 = vld [vmem:[#allocation30_spill] sm:$0xff] }
 0x84e   : > { %v9019_v27 = vmul.f32 %v8987_v16, %v8923_v20  ;;  %v8924_v56 = vmax.f32 %v11270_v10, 0.0  ;;  %v15198_v16 = vld [vmem:[#allocation39_spill] sm:$0xff] }
 0x84f   : > { %v9017_v55 = vmul.f32 %v8985_v22, %v8921_v4  ;;  %v8922_v26 = vmax.f32 %v11271_v1, 0.0  ;;  %v8995_v10 = vsub.f32 1.0, %v15198_v16  ;;  %v15199_v22 = vld [vmem:[#allocation35_spill] sm:$0xff] }
 0x850   : > { %v9051_v42 = vadd.f32 %v9019_v27, %v15186_v46  ;;  %v9020_v29 = vmul.f32 %v8988_v25, %v8924_v56  ;;  %v8993_v1 = vsub.f32 1.0, %v15199_v22  ;;  %v15200_v25 = vld [vmem:[#allocation41_spill] sm:$0xff] }
 0x851   : > { %v9049_v39 = vadd.f32 %v9017_v55, %v15187_v35  ;;  %v9018_v12 = vmul.f32 %v8986_v14, %v8922_v26  ;;  %v11242_v45 = vpop.f32.mrb[20].mxu1  ;;  %v8996_v55 = vsub.f32 1.0, %v15200_v25  ;;  %v15201_v14 = vld [vmem:[#allocation37_spill] sm:$0xff] }
 0x852   : > { %9083 = vst [vmem:[%s14952_s11 + $0x90] sm:$0xff] %v9051_v42  ;;  %v9052_v60 = vadd.f32 %v9020_v29, %v15188_v44  ;;  %v11272_v11 = vadd.f32 %v11242_v45, %v14938_v36  ;;  %v8826_v63 = vpop.f32.mrb[21].mxu1  ;;  %v8994_v46 = vsub.f32 1.0, %v15201_v14  ;;  %v15202_v42 = vld [vmem:[#allocation40_spill] sm:$0xff] }
 0x853   : > { %9081 = vst [vmem:[%s14952_s11 + $0x80] sm:$0xff] %v9049_v39  ;;  %v9050_v7 = vadd.f32 %v9018_v12, %v15189_v38  ;;  %v11273_v53 = vadd.f32 %v8826_v63, %v14938_v36  ;;  %v11243_v51 = vpop.f32.mrb[22].mxu1  ;;  %v15203_v39 = vld [vmem:[#allocation36_spill] sm:$0xff] }
 0x854   : > { %9084 = vst [vmem:[%s14952_s11 + $0x98] sm:$0xff] %v9052_v60  ;;  %v8927_v6 = vmax.f32 %v11272_v11, 0.0  ;;  %v11274_v62 = vadd.f32 %v11243_v51, %v14938_v36  ;;  %v8829_v57 = vpop.f32.mrb[23].mxu1  ;;  %v15204_v60 = vld [vmem:[#allocation42_spill] sm:$0xff] }
 0x855   : > { %9082 = vst [vmem:[%s14952_s11 + $0x88] sm:$0xff] %v9050_v7  ;;  %v8925_v24 = vmax.f32 %v11273_v53, 0.0  ;;  %v11275_v48 = vadd.f32 %v8829_v57, %v14938_v36  ;;  %v15205_v7 = vld [vmem:[#allocation38_spill] sm:$0xff] }
 0x856   : > { %v9023_v47 = vmul.f32 %v8991_v0, %v8927_v6  ;;  %v8928_v37 = vmax.f32 %v11274_v62, 0.0  ;;  %v15206_v0 = vld [vmem:[#allocation47_spill] sm:$0xff] }
 0x857   : > { %v9021_v15 = vmul.f32 %v8989_v49, %v8925_v24  ;;  %v8926_v19 = vmax.f32 %v11275_v48, 0.0  ;;  %v8999_v62 = vsub.f32 1.0, %v15206_v0  ;;  %v15207_v49 = vld [vmem:[#allocation43_spill] sm:$0xff] }
 0x858   : > { %v9055_v23 = vadd.f32 %v9023_v47, %v15194_v13  ;;  %v9024_v2 = vmul.f32 %v8992_v58, %v8928_v37  ;;  %v8997_v48 = vsub.f32 1.0, %v15207_v49  ;;  %v15208_v58 = vld [vmem:[#allocation49_spill] sm:$0xff] }
 0x859   : > { %v9053_v40 = vadd.f32 %v9021_v15, %v15195_v8  ;;  %v9022_v52 = vmul.f32 %v8990_v41, %v8926_v19  ;;  %v11246_v61 = vpop.f32.mrb[24].mxu1  ;;  %v9000_v15 = vsub.f32 1.0, %v15208_v58  ;;  %v15209_v41 = vld [vmem:[#allocation45_spill] sm:$0xff] }
 0x85a   : > { %9087 = vst [vmem:[%s14952_s11 + $0xb0] sm:$0xff] %v9055_v23  ;;  %v9056_v30 = vadd.f32 %v9024_v2, %v15196_v18  ;;  %v11276_v17 = vadd.f32 %v11246_v61, %v14938_v36  ;;  %v8842_v31 = vpop.f32.mrb[25].mxu1  ;;  %v8998_v13 = vsub.f32 1.0, %v15209_v41  ;;  %v15210_v23 = vld [vmem:[#allocation48_spill] sm:$0xff]  ;;  %v15212_v18 = vld [vmem:[#allocation50_spill] sm:$0xff] }
 0x85b   : > { %9085 = vst [vmem:[%s14952_s11 + $0xa0] sm:$0xff] %v9053_v40  ;;  %v9054_v28 = vadd.f32 %v9022_v52, %v15197_v54  ;;  %v11277_v3 = vadd.f32 %v8842_v31, %v14938_v36  ;;  %v11247_v20 = vpop.f32.mrb[26].mxu1  ;;  %v15211_v40 = vld [vmem:[#allocation44_spill] sm:$0xff] }
 0x85c   : > { %9088 = vst [vmem:[%s14952_s11 + $0xb8] sm:$0xff] %v9056_v30  ;;  %v8931_v33 = vmax.f32 %v11276_v17, 0.0  ;;  %v11278_v50 = vadd.f32 %v11247_v20, %v14938_v36  ;;  %v8845_v4 = vpop.f32.mrb[27].mxu1 }
 0x85d   : > { %9086 = vst [vmem:[%s14952_s11 + $0xa8] sm:$0xff] %v9054_v28  ;;  %v8929_v32 = vmax.f32 %v11277_v3, 0.0  ;;  %v11279_v27 = vadd.f32 %v8845_v4, %v14938_v36 }
 0x85e   : > { %v9027_v56 = vmul.f32 %v8995_v10, %v8931_v33  ;;  %v8932_v43 = vmax.f32 %v11278_v50, 0.0 }
 0x85f   : > { %v9025_v26 = vmul.f32 %v8993_v1, %v8929_v32  ;;  %v8930_v34 = vmax.f32 %v11279_v27, 0.0 }
 0x860   : > { %v9059_v29 = vadd.f32 %v9027_v56, %v15202_v42  ;;  %v9028_v35 = vmul.f32 %v8996_v55, %v8932_v43 }
 0x861   : > { %v9057_v12 = vadd.f32 %v9025_v26, %v15203_v39  ;;  %v9026_v45 = vmul.f32 %v8994_v46, %v8930_v34  ;;  %v11250_v44 = vpop.f32.mrb[28].mxu1 }
 0x862   : > { %9091 = vst [vmem:[%s14952_s11 + $0xd0] sm:$0xff] %v9059_v29  ;;  %v9060_v11 = vadd.f32 %v9028_v35, %v15204_v60  ;;  %v11280_v63 = vadd.f32 %v11250_v44, %v14938_v36  ;;  %v8858_v38 = vpop.f32.mrb[29].mxu1 }
 0x863   : > { %9089 = vst [vmem:[%s14952_s11 + $0xc0] sm:$0xff] %v9057_v12  ;;  %v9058_v53 = vadd.f32 %v9026_v45, %v15205_v7  ;;  %v11281_v51 = vadd.f32 %v8858_v38, %v14938_v36  ;;  %v11251_v6 = vpop.f32.mrb[30].mxu1 }
 0x864   : > { %9092 = vst [vmem:[%s14952_s11 + $0xd8] sm:$0xff] %v9060_v11  ;;  %v8935_v9 = vmax.f32 %v11280_v63, 0.0  ;;  %v11282_v57 = vadd.f32 %v11251_v6, %v14938_v36  ;;  %v8861_v24 = vpop.f32.mrb[31].mxu1 }
 0x865   : > { %9090 = vst [vmem:[%s14952_s11 + $0xc8] sm:$0xff] %v9058_v53  ;;  %v8933_v5 = vmax.f32 %v11281_v51, 0.0  ;;  %v11283_v47 = vadd.f32 %v8861_v24, %v14938_v36  ;;  %v15213_v36 = vld [vmem:[#allocation46_spill] sm:$0xff] }
 0x866   : > { %v9031_v37 = vmul.f32 %v8999_v62, %v8935_v9  ;;  %v8936_v59 = vmax.f32 %v11282_v57, 0.0 }
 0x867   : > { %v9029_v19 = vmul.f32 %v8997_v48, %v8933_v5  ;;  %v8934_v21 = vmax.f32 %v11283_v47, 0.0 }
 0x868   : > { %v9063_v2 = vadd.f32 %v9031_v37, %v15210_v23  ;;  %v9032_v8 = vmul.f32 %v9000_v15, %v8936_v59 }
 0x869   : > { %v9061_v52 = vadd.f32 %v9029_v19, %v15211_v40  ;;  %v9030_v61 = vmul.f32 %v8998_v13, %v8934_v21 }
 0x86a   : > { %9095 = vst [vmem:[%s14952_s11 + $0xf0] sm:$0xff] %v9063_v2  ;;  %v9064_v30 = vadd.f32 %v9032_v8, %v15212_v18 }
 0x86b   : > { %9093 = vst [vmem:[%s14952_s11 + $0xe0] sm:$0xff] %v9061_v52  ;;  %v9062_v17 = vadd.f32 %v9030_v61, %v15213_v36 }
 0x86c   : > { %9096 = vst [vmem:[%s14952_s11 + $0xf8] sm:$0xff] %v9064_v30 }
 0x86d   : > { %9094 = vst [vmem:[%s14952_s11 + $0xe8] sm:$0xff] %v9062_v17 }
 0x86e PF: > { %s15_s18 = sadd.s32 1, %s12795_s18  }
 0x86f   : > { %p12_p5 = scmp.ge.s32.totalorder %s15_s18, 4  }
 0x871   :  { %14 = sbr.rel (!%p12_p5) target bundleno = 1 (0x1), region = 94 }

</bundles_post_ra>
